<compile_context>
chip_gen: v7x
topology: tpu7x:2x2x1
jax: 0.10.0
libtpu: 0.0.40
codegen_flags: <defaults>
</compile_context>

<pallas_src>
import jax
import jax.numpy as jnp
from jax import lax
from jax.experimental import pallas as pl
from jax.experimental.pallas import tpu as pltpu

UNK_ID = 0  # only used by DropWord during training (identity in eval)

# Matmul-operand dtype (MXU).  Accumulation / gate math stay f32 everywhere.
MATMUL_DTYPE = jnp.bfloat16

VMEM_SPEC = pl.BlockSpec(memory_space=pltpu.MemorySpace.VMEM)


def _vmem_limit_bytes():
  try:
    cap = int(pltpu.get_tpu_info().vmem_capacity_bytes)
  except Exception:  # conservative fallback if the query is unavailable
    cap = 64 * 1024 * 1024
  # ~3/4 of physical, capped: ~96 MiB on v5e/v6e (128 MiB), ~48 MiB on v7x.
  return int(min(cap * 3 // 4, 96 * 1024 * 1024))


VMEM_LIMIT = _vmem_limit_bytes()


# ----------------------------------------------------------------------------
# Pallas kernels
# ----------------------------------------------------------------------------
def encoder_lstm_kernel(x_ref, len_ref, wih_ref, whh_ref, b_ref, hn_ref,
                        xproj_ref):
  """Encoder LSTM: returns only hn (hidden at each sequence's last valid step).

  x_ref:   (T*B, E)  time-major embeddings (MATMUL_DTYPE)
  len_ref: (B, 1)    int32 valid lengths
  wih:(E,4H) whh:(H,4H) b:(1,4H)  gate order i,f,g,o (PyTorch; b = b_ih + b_hh)
  hn_ref:  (B, H)    f32
  xproj:   (T*B,4H)  f32 scratch
  """
  B, H = hn_ref.shape
  T = x_ref.shape[0] // B

  # Hoisted input projection: one (T*B,E)@(E,4H) MXU matmul + bias.
  xproj_ref[...] = (
      jnp.dot(x_ref[...], wih_ref[...], preferred_element_type=jnp.float32)
      + b_ref[...])

  lens = len_ref[...]  # loop-invariant, held in vregs

  def step(t, carry):
    h, c = carry
    row = pl.multiple_of(t * B, B)
    gates = xproj_ref[pl.ds(row, B), :] + jnp.dot(
        h.astype(whh_ref.dtype), whh_ref[...],
        preferred_element_type=jnp.float32)                     # (B, 4H) f32
    i_g = jax.nn.sigmoid(gates[:, 0 * H:1 * H])
    f_g = jax.nn.sigmoid(gates[:, 1 * H:2 * H])
    g_g = jnp.tanh(gates[:, 2 * H:3 * H])
    o_g = jax.nn.sigmoid(gates[:, 3 * H:4 * H])
    c_new = f_g * c + i_g * g_g
    h_new = o_g * jnp.tanh(c_new)
    mask = t < lens                                   # (B,1): freeze past len
    return (jnp.where(mask, h_new, h), jnp.where(mask, c_new, c))

  zeros = jnp.zeros((B, H), jnp.float32)
  # T is static: full unroll gives the scheduler cross-step visibility.
  # TODO(synk): for long sequences use a partial unroll (e.g. unroll=4).
  h_fin, _ = lax.fori_loop(0, T, step, (zeros, zeros), unroll=True)
  hn_ref[...] = h_fin


def decoder_fused_kernel(x_ref, len_ref, h0_ref, c0_ref, wih_ref, whh_ref,
                         b_ref, wout_ref, bout_ref, logits_ref, xproj_ref):
  """Decoder LSTM with the fcout projection fused into the time loop.

  logits_ref: (B, T*V) f32 -- step t writes columns [t*V, (t+1)*V) (V a
  multiple of 128 => unmasked lane-dense stores), so the host reshape to
  (B, T, V) is free and no (T*B, H) sequence ever hits HBM.
  Padded steps write fcout(0) = bias (== pad_packed_sequence + Linear).
  """
  B, H = h0_ref.shape
  T = x_ref.shape[0] // B
  V = bout_ref.shape[1]

  # Hoisted input projection.
  # TODO(synk): chunk xproj over T (double-buffered) when T*B*4H*4B nears the
  # v7x 64 MiB VMEM budget.
  xproj_ref[...] = (
      jnp.dot(x_ref[...], wih_ref[...], preferred_element_type=jnp.float32)
      + b_ref[...])

  lens = len_ref[...]
  h = h0_ref[...]
  c = c0_ref[...]
  # Static Python unroll (T static): static xproj row slices + static,
  # lane-aligned logits column stores; full scheduler visibility across steps.
  # TODO(synk): hold W_hh / W_out resident via pltpu.matmul_push_rhs/acc_lhs
  # if the per-step weight re-push shows up as the MXU bottleneck.
  for t in range(T):
    gates = xproj_ref[t * B:(t + 1) * B, :] + jnp.dot(
        h.astype(whh_ref.dtype), whh_ref[...],
        preferred_element_type=jnp.float32)
    i_g = jax.nn.sigmoid(gates[:, 0 * H:1 * H])
    f_g = jax.nn.sigmoid(gates[:, 1 * H:2 * H])
    g_g = jnp.tanh(gates[:, 2 * H:3 * H])
    o_g = jax.nn.sigmoid(gates[:, 3 * H:4 * H])
    c_new = f_g * c + i_g * g_g
    h_new = o_g * jnp.tanh(c_new)
    mask = t < lens
    h_out = jnp.where(mask, h_new, 0.0)          # pad_packed zeros -> bias
    logits_t = jnp.dot(h_out.astype(wout_ref.dtype), wout_ref[...],
                       preferred_element_type=jnp.float32) + bout_ref[...]
    logits_ref[:, t * V:(t + 1) * V] = logits_t.astype(logits_ref.dtype)
    h = jnp.where(mask, h_new, h)
    c = jnp.where(mask, c_new, c)


def decoder_seq_kernel(x_ref, len_ref, h0_ref, c0_ref, wih_ref, whh_ref, b_ref,
                       out_ref, xproj_ref):
  """Decoder LSTM emitting the length-masked hidden sequence (T*B, H).

  Large-vocab path: fcout is applied afterwards by run_fcout_time_major.
  Output stored in MATMUL_DTYPE to halve the HBM round trip.
  """
  B, H = h0_ref.shape
  T = x_ref.shape[0] // B

  xproj_ref[...] = (
      jnp.dot(x_ref[...], wih_ref[...], preferred_element_type=jnp.float32)
      + b_ref[...])

  lens = len_ref[...]
  h = h0_ref[...]
  c = c0_ref[...]
  for t in range(T):
    gates = xproj_ref[t * B:(t + 1) * B, :] + jnp.dot(
        h.astype(whh_ref.dtype), whh_ref[...],
        preferred_element_type=jnp.float32)
    i_g = jax.nn.sigmoid(gates[:, 0 * H:1 * H])
    f_g = jax.nn.sigmoid(gates[:, 1 * H:2 * H])
    g_g = jnp.tanh(gates[:, 2 * H:3 * H])
    o_g = jax.nn.sigmoid(gates[:, 3 * H:4 * H])
    c_new = f_g * c + i_g * g_g
    h_new = o_g * jnp.tanh(c_new)
    mask = t < lens
    out_ref[t * B:(t + 1) * B, :] = jnp.where(mask, h_new, 0.0).astype(
        out_ref.dtype)
    h = jnp.where(mask, h_new, h)
    c = jnp.where(mask, c_new, c)


def latent_head_kernel(hn_ref, wmulv_ref, bmulv_ref, wz_ref, bz_ref,
                       w1_ref, b1_ref, w2_ref, b2_ref,
                       mulv_ref, h0_ref, c0_ref, bow_ref):
  """Fused post-encoder head.

  [fcmu | fclogvar] as ONE (H, 2C) matmul, fcz(z)+tanh+chunk, bow MLP.
  Eval mode: z = mu.  mu/logvar are split host-side from mulv (tiny).
  """
  hn = hn_ref[...].astype(wmulv_ref.dtype)
  mulv = (jnp.dot(hn, wmulv_ref[...], preferred_element_type=jnp.float32)
          + bmulv_ref[...])                              # (B, 2C) = [mu|logvar]
  mulv_ref[...] = mulv
  C = mulv_ref.shape[1] // 2
  z = mulv[:, :C]  # eval mode: z = mu
  # TODO(synk): training-mode reparameterize() noise / dropout not emitted.

  # fcz(z) -> tanh -> chunk(2): first half = h0, second half = c0.
  hc = jnp.tanh(jnp.dot(z.astype(wz_ref.dtype), wz_ref[...],
                        preferred_element_type=jnp.float32) + bz_ref[...])
  H = h0_ref.shape[1]
  h0_ref[...] = hc[:, :H]
  c0_ref[...] = hc[:, H:]

  # Bag-of-words MLP (C -> H -> V).
  # TODO(synk): at production vocab sizes tile the (H, V) second layer like
  # fcout instead of a whole-array VMEM block.
  hid = jnp.maximum(
      jnp.dot(z.astype(w1_ref.dtype), w1_ref[...],
              preferred_element_type=jnp.float32) + b1_ref[...], 0.0)
  bow_ref[...] = (jnp.dot(hid.astype(w2_ref.dtype), w2_ref[...],
                          preferred_element_type=jnp.float32) + b2_ref[...])


def fcout_kernel(x_ref, w_ref, b_ref, o_ref):
  o_ref[...] = (
      jnp.dot(x_ref[...].astype(w_ref.dtype), w_ref[...],
              preferred_element_type=jnp.float32)
      + b_ref[...]).astype(o_ref.dtype)


# ----------------------------------------------------------------------------
# pallas_call wrappers
# ----------------------------------------------------------------------------
def run_encoder(x_flat, len_col, params):
  TB = x_flat.shape[0]
  B = len_col.shape[0]
  H = params["enc_whh"].shape[0]
  return pl.pallas_call(
      encoder_lstm_kernel,
      out_shape=jax.ShapeDtypeStruct((B, H), jnp.float32),
      in_specs=[VMEM_SPEC] * 5,
      out_specs=VMEM_SPEC,
      scratch_shapes=[pltpu.VMEM((TB, 4 * H), jnp.float32)],
      compiler_params=pltpu.CompilerParams(vmem_limit_bytes=VMEM_LIMIT),
  )(x_flat, len_col, params["enc_wih"], params["enc_whh"], params["enc_b"])


def run_latent_head(hn, params):
  B, H = hn.shape
  C2 = params["bmulv"].shape[1]
  V = params["bow_w2"].shape[1]
  return pl.pallas_call(
      latent_head_kernel,
      out_shape=(jax.ShapeDtypeStruct((B, C2), jnp.float32),  # [mu | logvar]
                 jax.ShapeDtypeStruct((B, H), jnp.float32),   # decoder h0
                 jax.ShapeDtypeStruct((B, H), jnp.float32),   # decoder c0
                 jax.ShapeDtypeStruct((B, V), jnp.float32)),  # bow
      in_specs=[VMEM_SPEC] * 9,
      out_specs=(VMEM_SPEC,) * 4,
      compiler_params=pltpu.CompilerParams(vmem_limit_bytes=VMEM_LIMIT),
  )(hn, params["wmulv"], params["bmulv"], params["wz"], params["bz"],
    params["bow_w1"], params["bow_b1"], params["bow_w2"], params["bow_b2"])


def run_decoder_fused(x_flat, len_col, h0, c0, params):
  TB = x_flat.shape[0]
  B, H = h0.shape
  T = TB // B
  V = params["bout"].shape[1]
  return pl.pallas_call(
      decoder_fused_kernel,
      out_shape=jax.ShapeDtypeStruct((B, T * V), jnp.float32),
      in_specs=[VMEM_SPEC] * 9,
      out_specs=VMEM_SPEC,
      scratch_shapes=[pltpu.VMEM((TB, 4 * H), jnp.float32)],
      compiler_params=pltpu.CompilerParams(vmem_limit_bytes=VMEM_LIMIT),
  )(x_flat, len_col, h0, c0, params["dec_wih"], params["dec_whh"],
    params["dec_b"], params["wout"], params["bout"])


def run_decoder_seq(x_flat, len_col, h0, c0, params):
  TB = x_flat.shape[0]
  B, H = h0.shape
  return pl.pallas_call(
      decoder_seq_kernel,
      out_shape=jax.ShapeDtypeStruct((TB, H), MATMUL_DTYPE),
      in_specs=[VMEM_SPEC] * 7,
      out_specs=VMEM_SPEC,
      scratch_shapes=[pltpu.VMEM((TB, 4 * H), jnp.float32)],
      compiler_params=pltpu.CompilerParams(vmem_limit_bytes=VMEM_LIMIT),
  )(x_flat, len_col, h0, c0, params["dec_wih"], params["dec_whh"],
    params["dec_b"])


def run_fcout_time_major(x_flat, w, b, *, batch, tn=512):
  """Tiled fcout over a time-major (T*B, H) hidden sequence (large-vocab path).

  Reads one (B, H) row slab per timestep directly via BlockSpec (no XLA
  transpose), writes lane-dense (B, tn) column tiles of a (B, T*Vp) output.
  V is padded up to a multiple of tn (tn a multiple of 128): no full-array
  fallback tile, no masked partial stores.  Caller reshapes / slices back.
  """
  TB, H = x_flat.shape
  B = batch
  T = TB // B
  V = w.shape[1]
  nj = pl.cdiv(V, tn)
  Vp = nj * tn
  if Vp != V:
    w = jnp.pad(w, ((0, 0), (0, Vp - V)))
    b = jnp.pad(b, ((0, 0), (0, Vp - V)))
  # TODO(synk): pad B up to a multiple of 8 if the batch is not sublane-aligned.
  return pl.pallas_call(
      fcout_kernel,
      out_shape=jax.ShapeDtypeStruct((B, T * Vp), jnp.float32),
      grid=(T, nj),
      in_specs=[pl.BlockSpec((B, H), lambda t, j: (t, 0)),
                pl.BlockSpec((H, tn), lambda t, j: (0, j)),
                pl.BlockSpec((1, tn), lambda t, j: (0, j))],
      out_specs=pl.BlockSpec((B, tn), lambda t, j: (0, t * nj + j)),
      compiler_params=pltpu.CompilerParams(
          # >=2 blocks on a parallel axis lets v7x shard across its 2 TCs.
          dimension_semantics=("parallel", "parallel"),
          vmem_limit_bytes=VMEM_LIMIT),
      cost_estimate=pl.CostEstimate(
          flops=2 * TB * Vp * H,
          transcendentals=0,
          bytes_accessed=(TB * H * x_flat.dtype.itemsize
                          + H * Vp * w.dtype.itemsize + B * T * Vp * 4)),
  )(x_flat, w, b)


# ----------------------------------------------------------------------------
# Parameter init (deterministic, synthetic)
# ----------------------------------------------------------------------------
def init_params(key, vocab_size, embed_size, hidden_size, code_size):
  """Weights / embeddings stored once in MATMUL_DTYPE; biases stay f32."""
  def u(k, shape, scale=0.1):
    return jax.random.uniform(k, shape, jnp.float32, -scale, scale)

  ks = jax.random.split(key, 16)
  H, E, C, V = hidden_size, embed_size, code_size, vocab_size
  md = MATMUL_DTYPE
  wmu, bmu = u(ks[7], (H, C)), u(ks[8], (1, C))
  wlv, blv = u(ks[9], (H, C)), u(ks[10], (1, C))
  return dict(
      embedding=u(ks[0], (V, E)).astype(md),
      # encoder LSTM (weights stored as (in, 4H); gate order i,f,g,o)
      enc_wih=u(ks[1], (E, 4 * H)).astype(md),
      enc_whh=u(ks[2], (H, 4 * H)).astype(md),
      enc_b=u(ks[3], (1, 4 * H)),
      # decoder LSTM
      dec_wih=u(ks[4], (E, 4 * H)).astype(md),
      dec_whh=u(ks[5], (H, 4 * H)).astype(md),
      dec_b=u(ks[6], (1, 4 * H)),
      # fcmu / fclogvar fused into one H -> 2C projection
      wmulv=jnp.concatenate([wmu, wlv], axis=1).astype(md),
      bmulv=jnp.concatenate([bmu, blv], axis=1),
      # fcz : C -> 2H
      wz=u(ks[11], (C, 2 * H)).astype(md),
      bz=u(ks[12], (1, 2 * H)),
      # fcout : H -> V
      wout=u(ks[13], (H, V)).astype(md),
      bout=u(ks[14], (1, V)),
      # bow predictor MLP : C -> H -> V
      bow_w1=u(ks[15], (C, H)).astype(md),
      bow_b1=jnp.zeros((1, H), jnp.float32),
      bow_w2=u(jax.random.fold_in(key, 99), (H, V)).astype(md),
      bow_b2=jnp.zeros((1, V), jnp.float32),
  )


# ----------------------------------------------------------------------------
# Forward pass (TextVAE.forward, eval mode)
# ----------------------------------------------------------------------------
def text_vae_forward(params, inputs, lengths):
  B, T = inputs.shape
  H = params["enc_whh"].shape[0]
  V = params["bout"].shape[1]

  # Time-major embedding gather: transpose the tiny (B, T) index array, not
  # the (T, B, E) activations.  Embeddings are already MATMUL_DTYPE.
  x_flat = jnp.take(params["embedding"], inputs.T, axis=0).reshape(T * B, -1)
  len_col = lengths.astype(jnp.int32).reshape(B, 1)

  # ---- Encoder LSTM: hn at each sequence's last valid step ----
  hn = run_encoder(x_flat, len_col, params)

  # ---- Fused latent head: [mu|logvar], (h0,c0)=chunk(tanh(fcz(z))), bow ----
  mulv, h0d, c0d, bow = run_latent_head(hn, params)
  C = mulv.shape[1] // 2
  mu, logvar = mulv[:, :C], mulv[:, C:]

  # ---- Decoder LSTM (+ fcout fused into the loop when it fits VMEM) ----
  itemsize = jnp.dtype(MATMUL_DTYPE).itemsize
  fused_bytes = H * V * itemsize + B * T * V * 4 + T * B * 4 * H * 4
  if fused_bytes <= VMEM_LIMIT // 4:
    logits = run_decoder_fused(x_flat, len_col, h0d, c0d,
                               params).reshape(B, T, V)
  else:
    # Large-vocab path: masked hidden sequence + tiled fcout reading the
    # time-major layout directly (cdiv grid, padded vocab, no transpose).
    dec_seq = run_decoder_seq(x_flat, len_col, h0d, c0d, params)
    logits = run_fcout_time_major(dec_seq, params["wout"], params["bout"],
                                  batch=B)
    logits = logits.reshape(B, T, -1)[:, :, :V]

  # Match PyTorch shapes: mu / logvar carry the num_layers=1 leading axis.
  return logits, mu[None, :, :], logvar[None, :, :], bow


# ----------------------------------------------------------------------------
if __name__ == "__main__":
  # H=128 keeps gate slices lane-aligned; B=8 fills the sublane dim; V is a
  # multiple of 128 so every per-step logits store is an unmasked full vreg.
  VOCAB, EMBED, HIDDEN, CODE = 512, 64, 128, 16
  B, T = 8, 16

  key = jax.random.PRNGKey(0)
  k_param, k_tok = jax.random.split(key)
  params = init_params(k_param, VOCAB, EMBED, HIDDEN, CODE)

  inputs = jax.random.randint(k_tok, (B, T), 0, VOCAB, dtype=jnp.int32)
  # lengths sorted descending, max == T (pack_padded_sequence convention)
  lengths = jnp.array([16, 14, 12, 10, 8, 6, 4, 2], dtype=jnp.int32)

  logits, mu, logvar, bow = text_vae_forward(params, inputs, lengths)
  jax.block_until_ready((logits, mu, logvar, bow))

  assert logits.shape == (B, T, VOCAB)
  assert mu.shape == (1, B, CODE) and logvar.shape == (1, B, CODE)
  assert bow.shape == (B, VOCAB)
  print("KERNEL_OK")
</pallas_src>

<mosaic_0001>
module attributes {stable_mosaic.version = 11 : i64} {
  func.func @encoder_lstm_kernel(%arg0: memref<128x64xbf16, #tpu.memory_space<vmem>>, %arg1: memref<8x1xi32, #tpu.memory_space<vmem>>, %arg2: memref<64x512xbf16, #tpu.memory_space<vmem>>, %arg3: memref<128x512xbf16, #tpu.memory_space<vmem>>, %arg4: memref<1x512xf32, #tpu.memory_space<vmem>>, %arg5: memref<8x128xf32, #tpu.memory_space<vmem>>, %arg6: memref<128x512xf32, #tpu.memory_space<vmem>>) attributes {dimension_semantics = [], scalar_prefetch = 0 : i64, scratch_operands = 1 : i64, tpu.core_type = #tpu.core_type<tc>} {
    %c0 = arith.constant 0 : index
    %c0_0 = arith.constant 0 : index
    %0 = vector.load %arg0[%c0, %c0_0] : memref<128x64xbf16, #tpu.memory_space<vmem>>, vector<128x64xbf16>
    %c0_1 = arith.constant 0 : index
    %c0_2 = arith.constant 0 : index
    %1 = vector.load %arg2[%c0_1, %c0_2] : memref<64x512xbf16, #tpu.memory_space<vmem>>, vector<64x512xbf16>
    %cst = arith.constant dense<0.000000e+00> : vector<128x512xf32>
    %2 = tpu.matmul %0, %1, %cst {dimension_numbers = #tpu.dot_dimension_numbers<[1], [0], [0], [1], [0, 0, 1, 1], [], []>} : vector<128x64xbf16>, vector<64x512xbf16>, vector<128x512xf32> -> vector<128x512xf32>
    %c0_3 = arith.constant 0 : index
    %c0_4 = arith.constant 0 : index
    %3 = vector.load %arg4[%c0_3, %c0_4] : memref<1x512xf32, #tpu.memory_space<vmem>>, vector<1x512xf32>
    %4 = vector.broadcast %3 : vector<1x512xf32> to vector<128x512xf32>
    %5 = arith.addf %2, %4 : vector<128x512xf32>
    %c0_5 = arith.constant 0 : index
    %c0_6 = arith.constant 0 : index
    %6 = vector.load %arg6[%c0_5, %c0_6] : memref<128x512xf32, #tpu.memory_space<vmem>>, vector<128x512xf32>
    tpu.vector_store %arg6[%c0_5, %c0_6], %5 {strides = array<i32>} : memref<128x512xf32, #tpu.memory_space<vmem>>, vector<128x512xf32>,
    %c0_7 = arith.constant 0 : index
    %c0_8 = arith.constant 0 : index
    %7 = vector.load %arg1[%c0_7, %c0_8] : memref<8x1xi32, #tpu.memory_space<vmem>>, vector<8x1xi32>
    %cst_9 = arith.constant 0.000000e+00 : f32
    %8 = vector.broadcast %cst_9 : f32 to vector<8x128xf32>
    %c0_i32 = arith.constant 0 : i32
    %c8_i32 = arith.constant 8 : i32
    %9 = arith.muli %c0_i32, %c8_i32 : i32
    %10 = tpu.assume_multiple %9, 8 : i32
    %11 = arith.index_cast %10 : i32 to index
    %c0_10 = arith.constant 0 : index
    %12 = vector.load %arg6[%11, %c0_10] : memref<128x512xf32, #tpu.memory_space<vmem>>, vector<8x512xf32>
    %13 = arith.truncf %8 : vector<8x128xf32> to vector<8x128xbf16>
    %c0_11 = arith.constant 0 : index
    %c0_12 = arith.constant 0 : index
    %14 = vector.load %arg3[%c0_11, %c0_12] : memref<128x512xbf16, #tpu.memory_space<vmem>>, vector<128x512xbf16>
    %cst_13 = arith.constant dense<0.000000e+00> : vector<8x512xf32>
    %15 = tpu.matmul %13, %14, %cst_13 {dimension_numbers = #tpu.dot_dimension_numbers<[1], [0], [0], [1], [0, 0, 1, 1], [], []>} : vector<8x128xbf16>, vector<128x512xbf16>, vector<8x512xf32> -> vector<8x512xf32>
    %16 = arith.addf %12, %15 : vector<8x512xf32>
    %17 = vector.extract_strided_slice %16 {offsets = [0, 0], sizes = [8, 128], strides = [1, 1]} : vector<8x512xf32> to vector<8x128xf32>
    %18 = arith.negf %17 : vector<8x128xf32>
    %19 = math.exp %18 : vector<8x128xf32>
    %cst_14 = arith.constant 1.000000e+00 : f32
    %20 = vector.broadcast %cst_14 : f32 to vector<8x128xf32>
    %21 = arith.addf %20, %19 : vector<8x128xf32>
    %22 = arith.divf %20, %21 : vector<8x128xf32>
    %23 = vector.extract_strided_slice %16 {offsets = [0, 128], sizes = [8, 128], strides = [1, 1]} : vector<8x512xf32> to vector<8x128xf32>
    %24 = arith.negf %23 : vector<8x128xf32>
    %25 = math.exp %24 : vector<8x128xf32>
    %cst_15 = arith.constant 1.000000e+00 : f32
    %26 = vector.broadcast %cst_15 : f32 to vector<8x128xf32>
    %27 = arith.addf %26, %25 : vector<8x128xf32>
    %28 = arith.divf %26, %27 : vector<8x128xf32>
    %29 = vector.extract_strided_slice %16 {offsets = [0, 256], sizes = [8, 128], strides = [1, 1]} : vector<8x512xf32> to vector<8x128xf32>
    %30 = math.tanh %29 : vector<8x128xf32>
    %31 = vector.extract_strided_slice %16 {offsets = [0, 384], sizes = [8, 128], strides = [1, 1]} : vector<8x512xf32> to vector<8x128xf32>
    %32 = arith.negf %31 : vector<8x128xf32>
    %33 = math.exp %32 : vector<8x128xf32>
    %cst_16 = arith.constant 1.000000e+00 : f32
    %34 = vector.broadcast %cst_16 : f32 to vector<8x128xf32>
    %35 = arith.addf %34, %33 : vector<8x128xf32>
    %36 = arith.divf %34, %35 : vector<8x128xf32>
    %37 = arith.mulf %28, %8 : vector<8x128xf32>
    %38 = arith.mulf %22, %30 : vector<8x128xf32>
    %39 = arith.addf %37, %38 : vector<8x128xf32>
    %40 = math.tanh %39 : vector<8x128xf32>
    %41 = arith.mulf %36, %40 : vector<8x128xf32>
    %42 = vector.broadcast %c0_i32 : i32 to vector<8x1xi32>
    %43 = arith.cmpi slt, %42, %7 : vector<8x1xi32>
    %44 = vector.shape_cast %43 : vector<8x1xi1> to vector<8x1xi1>
    %45 = vector.broadcast %44 : vector<8x1xi1> to vector<8x128xi1>
    %46 = arith.select %45, %41, %8 : vector<8x128xi1>, vector<8x128xf32>
    %47 = vector.shape_cast %43 : vector<8x1xi1> to vector<8x1xi1>
    %48 = vector.broadcast %47 : vector<8x1xi1> to vector<8x128xi1>
    %49 = arith.select %48, %39, %8 : vector<8x128xi1>, vector<8x128xf32>
    %c1_i32 = arith.constant 1 : i32
    %c8_i32_17 = arith.constant 8 : i32
    %50 = arith.muli %c1_i32, %c8_i32_17 : i32
    %51 = tpu.assume_multiple %50, 8 : i32
    %52 = arith.index_cast %51 : i32 to index
    %c0_18 = arith.constant 0 : index
    %53 = vector.load %arg6[%52, %c0_18] : memref<128x512xf32, #tpu.memory_space<vmem>>, vector<8x512xf32>
    %54 = arith.truncf %46 : vector<8x128xf32> to vector<8x128xbf16>
    %c0_19 = arith.constant 0 : index
    %c0_20 = arith.constant 0 : index
    %55 = vector.load %arg3[%c0_19, %c0_20] : memref<128x512xbf16, #tpu.memory_space<vmem>>, vector<128x512xbf16>
    %cst_21 = arith.constant dense<0.000000e+00> : vector<8x512xf32>
    %56 = tpu.matmul %54, %55, %cst_21 {dimension_numbers = #tpu.dot_dimension_numbers<[1], [0], [0], [1], [0, 0, 1, 1], [], []>} : vector<8x128xbf16>, vector<128x512xbf16>, vector<8x512xf32> -> vector<8x512xf32>
    %57 = arith.addf %53, %56 : vector<8x512xf32>
    %58 = vector.extract_strided_slice %57 {offsets = [0, 0], sizes = [8, 128], strides = [1, 1]} : vector<8x512xf32> to vector<8x128xf32>
    %59 = arith.negf %58 : vector<8x128xf32>
    %60 = math.exp %59 : vector<8x128xf32>
    %cst_22 = arith.constant 1.000000e+00 : f32
    %61 = vector.broadcast %cst_22 : f32 to vector<8x128xf32>
    %62 = arith.addf %61, %60 : vector<8x128xf32>
    %63 = arith.divf %61, %62 : vector<8x128xf32>
    %64 = vector.extract_strided_slice %57 {offsets = [0, 128], sizes = [8, 128], strides = [1, 1]} : vector<8x512xf32> to vector<8x128xf32>
    %65 = arith.negf %64 : vector<8x128xf32>
    %66 = math.exp %65 : vector<8x128xf32>
    %cst_23 = arith.constant 1.000000e+00 : f32
    %67 = vector.broadcast %cst_23 : f32 to vector<8x128xf32>
    %68 = arith.addf %67, %66 : vector<8x128xf32>
    %69 = arith.divf %67, %68 : vector<8x128xf32>
    %70 = vector.extract_strided_slice %57 {offsets = [0, 256], sizes = [8, 128], strides = [1, 1]} : vector<8x512xf32> to vector<8x128xf32>
    %71 = math.tanh %70 : vector<8x128xf32>
    %72 = vector.extract_strided_slice %57 {offsets = [0, 384], sizes = [8, 128], strides = [1, 1]} : vector<8x512xf32> to vector<8x128xf32>
    %73 = arith.negf %72 : vector<8x128xf32>
    %74 = math.exp %73 : vector<8x128xf32>
    %cst_24 = arith.constant 1.000000e+00 : f32
    %75 = vector.broadcast %cst_24 : f32 to vector<8x128xf32>
    %76 = arith.addf %75, %74 : vector<8x128xf32>
    %77 = arith.divf %75, %76 : vector<8x128xf32>
    %78 = arith.mulf %69, %49 : vector<8x128xf32>
    %79 = arith.mulf %63, %71 : vector<8x128xf32>
    %80 = arith.addf %78, %79 : vector<8x128xf32>
    %81 = math.tanh %80 : vector<8x128xf32>
    %82 = arith.mulf %77, %81 : vector<8x128xf32>
    %83 = vector.broadcast %c1_i32 : i32 to vector<8x1xi32>
    %84 = arith.cmpi slt, %83, %7 : vector<8x1xi32>
    %85 = vector.shape_cast %84 : vector<8x1xi1> to vector<8x1xi1>
    %86 = vector.broadcast %85 : vector<8x1xi1> to vector<8x128xi1>
    %87 = arith.select %86, %82, %46 : vector<8x128xi1>, vector<8x128xf32>
    %88 = vector.shape_cast %84 : vector<8x1xi1> to vector<8x1xi1>
    %89 = vector.broadcast %88 : vector<8x1xi1> to vector<8x128xi1>
    %90 = arith.select %89, %80, %49 : vector<8x128xi1>, vector<8x128xf32>
    %c2_i32 = arith.constant 2 : i32
    %c8_i32_25 = arith.constant 8 : i32
    %91 = arith.muli %c2_i32, %c8_i32_25 : i32
    %92 = tpu.assume_multiple %91, 8 : i32
    %93 = arith.index_cast %92 : i32 to index
    %c0_26 = arith.constant 0 : index
    %94 = vector.load %arg6[%93, %c0_26] : memref<128x512xf32, #tpu.memory_space<vmem>>, vector<8x512xf32>
    %95 = arith.truncf %87 : vector<8x128xf32> to vector<8x128xbf16>
    %c0_27 = arith.constant 0 : index
    %c0_28 = arith.constant 0 : index
    %96 = vector.load %arg3[%c0_27, %c0_28] : memref<128x512xbf16, #tpu.memory_space<vmem>>, vector<128x512xbf16>
    %cst_29 = arith.constant dense<0.000000e+00> : vector<8x512xf32>
    %97 = tpu.matmul %95, %96, %cst_29 {dimension_numbers = #tpu.dot_dimension_numbers<[1], [0], [0], [1], [0, 0, 1, 1], [], []>} : vector<8x128xbf16>, vector<128x512xbf16>, vector<8x512xf32> -> vector<8x512xf32>
    %98 = arith.addf %94, %97 : vector<8x512xf32>
    %99 = vector.extract_strided_slice %98 {offsets = [0, 0], sizes = [8, 128], strides = [1, 1]} : vector<8x512xf32> to vector<8x128xf32>
    %100 = arith.negf %99 : vector<8x128xf32>
    %101 = math.exp %100 : vector<8x128xf32>
    %cst_30 = arith.constant 1.000000e+00 : f32
    %102 = vector.broadcast %cst_30 : f32 to vector<8x128xf32>
    %103 = arith.addf %102, %101 : vector<8x128xf32>
    %104 = arith.divf %102, %103 : vector<8x128xf32>
    %105 = vector.extract_strided_slice %98 {offsets = [0, 128], sizes = [8, 128], strides = [1, 1]} : vector<8x512xf32> to vector<8x128xf32>
    %106 = arith.negf %105 : vector<8x128xf32>
    %107 = math.exp %106 : vector<8x128xf32>
    %cst_31 = arith.constant 1.000000e+00 : f32
    %108 = vector.broadcast %cst_31 : f32 to vector<8x128xf32>
    %109 = arith.addf %108, %107 : vector<8x128xf32>
    %110 = arith.divf %108, %109 : vector<8x128xf32>
    %111 = vector.extract_strided_slice %98 {offsets = [0, 256], sizes = [8, 128], strides = [1, 1]} : vector<8x512xf32> to vector<8x128xf32>
    %112 = math.tanh %111 : vector<8x128xf32>
    %113 = vector.extract_strided_slice %98 {offsets = [0, 384], sizes = [8, 128], strides = [1, 1]} : vector<8x512xf32> to vector<8x128xf32>
    %114 = arith.negf %113 : vector<8x128xf32>
    %115 = math.exp %114 : vector<8x128xf32>
    %cst_32 = arith.constant 1.000000e+00 : f32
    %116 = vector.broadcast %cst_32 : f32 to vector<8x128xf32>
    %117 = arith.addf %116, %115 : vector<8x128xf32>
    %118 = arith.divf %116, %117 : vector<8x128xf32>
    %119 = arith.mulf %110, %90 : vector<8x128xf32>
    %120 = arith.mulf %104, %112 : vector<8x128xf32>
    %121 = arith.addf %119, %120 : vector<8x128xf32>
    %122 = math.tanh %121 : vector<8x128xf32>
    %123 = arith.mulf %118, %122 : vector<8x128xf32>
    %124 = vector.broadcast %c2_i32 : i32 to vector<8x1xi32>
    %125 = arith.cmpi slt, %124, %7 : vector<8x1xi32>
    %126 = vector.shape_cast %125 : vector<8x1xi1> to vector<8x1xi1>
    %127 = vector.broadcast %126 : vector<8x1xi1> to vector<8x128xi1>
    %128 = arith.select %127, %123, %87 : vector<8x128xi1>, vector<8x128xf32>
    %129 = vector.shape_cast %125 : vector<8x1xi1> to vector<8x1xi1>
    %130 = vector.broadcast %129 : vector<8x1xi1> to vector<8x128xi1>
    %131 = arith.select %130, %121, %90 : vector<8x128xi1>, vector<8x128xf32>
    %c3_i32 = arith.constant 3 : i32
    %c8_i32_33 = arith.constant 8 : i32
    %132 = arith.muli %c3_i32, %c8_i32_33 : i32
    %133 = tpu.assume_multiple %132, 8 : i32
    %134 = arith.index_cast %133 : i32 to index
    %c0_34 = arith.constant 0 : index
    %135 = vector.load %arg6[%134, %c0_34] : memref<128x512xf32, #tpu.memory_space<vmem>>, vector<8x512xf32>
    %136 = arith.truncf %128 : vector<8x128xf32> to vector<8x128xbf16>
    %c0_35 = arith.constant 0 : index
    %c0_36 = arith.constant 0 : index
    %137 = vector.load %arg3[%c0_35, %c0_36] : memref<128x512xbf16, #tpu.memory_space<vmem>>, vector<128x512xbf16>
    %cst_37 = arith.constant dense<0.000000e+00> : vector<8x512xf32>
    %138 = tpu.matmul %136, %137, %cst_37 {dimension_numbers = #tpu.dot_dimension_numbers<[1], [0], [0], [1], [0, 0, 1, 1], [], []>} : vector<8x128xbf16>, vector<128x512xbf16>, vector<8x512xf32> -> vector<8x512xf32>
    %139 = arith.addf %135, %138 : vector<8x512xf32>
    %140 = vector.extract_strided_slice %139 {offsets = [0, 0], sizes = [8, 128], strides = [1, 1]} : vector<8x512xf32> to vector<8x128xf32>
    %141 = arith.negf %140 : vector<8x128xf32>
    %142 = math.exp %141 : vector<8x128xf32>
    %cst_38 = arith.constant 1.000000e+00 : f32
    %143 = vector.broadcast %cst_38 : f32 to vector<8x128xf32>
    %144 = arith.addf %143, %142 : vector<8x128xf32>
    %145 = arith.divf %143, %144 : vector<8x128xf32>
    %146 = vector.extract_strided_slice %139 {offsets = [0, 128], sizes = [8, 128], strides = [1, 1]} : vector<8x512xf32> to vector<8x128xf32>
    %147 = arith.negf %146 : vector<8x128xf32>
    %148 = math.exp %147 : vector<8x128xf32>
    %cst_39 = arith.constant 1.000000e+00 : f32
    %149 = vector.broadcast %cst_39 : f32 to vector<8x128xf32>
    %150 = arith.addf %149, %148 : vector<8x128xf32>
    %151 = arith.divf %149, %150 : vector<8x128xf32>
    %152 = vector.extract_strided_slice %139 {offsets = [0, 256], sizes = [8, 128], strides = [1, 1]} : vector<8x512xf32> to vector<8x128xf32>
    %153 = math.tanh %152 : vector<8x128xf32>
    %154 = vector.extract_strided_slice %139 {offsets = [0, 384], sizes = [8, 128], strides = [1, 1]} : vector<8x512xf32> to vector<8x128xf32>
    %155 = arith.negf %154 : vector<8x128xf32>
    %156 = math.exp %155 : vector<8x128xf32>
    %cst_40 = arith.constant 1.000000e+00 : f32
    %157 = vector.broadcast %cst_40 : f32 to vector<8x128xf32>
    %158 = arith.addf %157, %156 : vector<8x128xf32>
    %159 = arith.divf %157, %158 : vector<8x128xf32>
    %160 = arith.mulf %151, %131 : vector<8x128xf32>
    %161 = arith.mulf %145, %153 : vector<8x128xf32>
    %162 = arith.addf %160, %161 : vector<8x128xf32>
    %163 = math.tanh %162 : vector<8x128xf32>
    %164 = arith.mulf %159, %163 : vector<8x128xf32>
    %165 = vector.broadcast %c3_i32 : i32 to vector<8x1xi32>
    %166 = arith.cmpi slt, %165, %7 : vector<8x1xi32>
    %167 = vector.shape_cast %166 : vector<8x1xi1> to vector<8x1xi1>
    %168 = vector.broadcast %167 : vector<8x1xi1> to vector<8x128xi1>
    %169 = arith.select %168, %164, %128 : vector<8x128xi1>, vector<8x128xf32>
    %170 = vector.shape_cast %166 : vector<8x1xi1> to vector<8x1xi1>
    %171 = vector.broadcast %170 : vector<8x1xi1> to vector<8x128xi1>
    %172 = arith.select %171, %162, %131 : vector<8x128xi1>, vector<8x128xf32>
    %c4_i32 = arith.constant 4 : i32
    %c8_i32_41 = arith.constant 8 : i32
    %173 = arith.muli %c4_i32, %c8_i32_41 : i32
    %174 = tpu.assume_multiple %173, 8 : i32
    %175 = arith.index_cast %174 : i32 to index
    %c0_42 = arith.constant 0 : index
    %176 = vector.load %arg6[%175, %c0_42] : memref<128x512xf32, #tpu.memory_space<vmem>>, vector<8x512xf32>
    %177 = arith.truncf %169 : vector<8x128xf32> to vector<8x128xbf16>
    %c0_43 = arith.constant 0 : index
    %c0_44 = arith.constant 0 : index
    %178 = vector.load %arg3[%c0_43, %c0_44] : memref<128x512xbf16, #tpu.memory_space<vmem>>, vector<128x512xbf16>
    %cst_45 = arith.constant dense<0.000000e+00> : vector<8x512xf32>
    %179 = tpu.matmul %177, %178, %cst_45 {dimension_numbers = #tpu.dot_dimension_numbers<[1], [0], [0], [1], [0, 0, 1, 1], [], []>} : vector<8x128xbf16>, vector<128x512xbf16>, vector<8x512xf32> -> vector<8x512xf32>
    %180 = arith.addf %176, %179 : vector<8x512xf32>
    %181 = vector.extract_strided_slice %180 {offsets = [0, 0], sizes = [8, 128], strides = [1, 1]} : vector<8x512xf32> to vector<8x128xf32>
    %182 = arith.negf %181 : vector<8x128xf32>
    %183 = math.exp %182 : vector<8x128xf32>
    %cst_46 = arith.constant 1.000000e+00 : f32
    %184 = vector.broadcast %cst_46 : f32 to vector<8x128xf32>
    %185 = arith.addf %184, %183 : vector<8x128xf32>
    %186 = arith.divf %184, %185 : vector<8x128xf32>
    %187 = vector.extract_strided_slice %180 {offsets = [0, 128], sizes = [8, 128], strides = [1, 1]} : vector<8x512xf32> to vector<8x128xf32>
    %188 = arith.negf %187 : vector<8x128xf32>
    %189 = math.exp %188 : vector<8x128xf32>
    %cst_47 = arith.constant 1.000000e+00 : f32
    %190 = vector.broadcast %cst_47 : f32 to vector<8x128xf32>
    %191 = arith.addf %190, %189 : vector<8x128xf32>
    %192 = arith.divf %190, %191 : vector<8x128xf32>
    %193 = vector.extract_strided_slice %180 {offsets = [0, 256], sizes = [8, 128], strides = [1, 1]} : vector<8x512xf32> to vector<8x128xf32>
    %194 = math.tanh %193 : vector<8x128xf32>
    %195 = vector.extract_strided_slice %180 {offsets = [0, 384], sizes = [8, 128], strides = [1, 1]} : vector<8x512xf32> to vector<8x128xf32>
    %196 = arith.negf %195 : vector<8x128xf32>
    %197 = math.exp %196 : vector<8x128xf32>
    %cst_48 = arith.constant 1.000000e+00 : f32
    %198 = vector.broadcast %cst_48 : f32 to vector<8x128xf32>
    %199 = arith.addf %198, %197 : vector<8x128xf32>
    %200 = arith.divf %198, %199 : vector<8x128xf32>
    %201 = arith.mulf %192, %172 : vector<8x128xf32>
    %202 = arith.mulf %186, %194 : vector<8x128xf32>
    %203 = arith.addf %201, %202 : vector<8x128xf32>
    %204 = math.tanh %203 : vector<8x128xf32>
    %205 = arith.mulf %200, %204 : vector<8x128xf32>
    %206 = vector.broadcast %c4_i32 : i32 to vector<8x1xi32>
    %207 = arith.cmpi slt, %206, %7 : vector<8x1xi32>
    %208 = vector.shape_cast %207 : vector<8x1xi1> to vector<8x1xi1>
    %209 = vector.broadcast %208 : vector<8x1xi1> to vector<8x128xi1>
    %210 = arith.select %209, %205, %169 : vector<8x128xi1>, vector<8x128xf32>
    %211 = vector.shape_cast %207 : vector<8x1xi1> to vector<8x1xi1>
    %212 = vector.broadcast %211 : vector<8x1xi1> to vector<8x128xi1>
    %213 = arith.select %212, %203, %172 : vector<8x128xi1>, vector<8x128xf32>
    %c5_i32 = arith.constant 5 : i32
    %c8_i32_49 = arith.constant 8 : i32
    %214 = arith.muli %c5_i32, %c8_i32_49 : i32
    %215 = tpu.assume_multiple %214, 8 : i32
    %216 = arith.index_cast %215 : i32 to index
    %c0_50 = arith.constant 0 : index
    %217 = vector.load %arg6[%216, %c0_50] : memref<128x512xf32, #tpu.memory_space<vmem>>, vector<8x512xf32>
    %218 = arith.truncf %210 : vector<8x128xf32> to vector<8x128xbf16>
    %c0_51 = arith.constant 0 : index
    %c0_52 = arith.constant 0 : index
    %219 = vector.load %arg3[%c0_51, %c0_52] : memref<128x512xbf16, #tpu.memory_space<vmem>>, vector<128x512xbf16>
    %cst_53 = arith.constant dense<0.000000e+00> : vector<8x512xf32>
    %220 = tpu.matmul %218, %219, %cst_53 {dimension_numbers = #tpu.dot_dimension_numbers<[1], [0], [0], [1], [0, 0, 1, 1], [], []>} : vector<8x128xbf16>, vector<128x512xbf16>, vector<8x512xf32> -> vector<8x512xf32>
    %221 = arith.addf %217, %220 : vector<8x512xf32>
    %222 = vector.extract_strided_slice %221 {offsets = [0, 0], sizes = [8, 128], strides = [1, 1]} : vector<8x512xf32> to vector<8x128xf32>
    %223 = arith.negf %222 : vector<8x128xf32>
    %224 = math.exp %223 : vector<8x128xf32>
    %cst_54 = arith.constant 1.000000e+00 : f32
    %225 = vector.broadcast %cst_54 : f32 to vector<8x128xf32>
    %226 = arith.addf %225, %224 : vector<8x128xf32>
    %227 = arith.divf %225, %226 : vector<8x128xf32>
    %228 = vector.extract_strided_slice %221 {offsets = [0, 128], sizes = [8, 128], strides = [1, 1]} : vector<8x512xf32> to vector<8x128xf32>
    %229 = arith.negf %228 : vector<8x128xf32>
    %230 = math.exp %229 : vector<8x128xf32>
    %cst_55 = arith.constant 1.000000e+00 : f32
    %231 = vector.broadcast %cst_55 : f32 to vector<8x128xf32>
    %232 = arith.addf %231, %230 : vector<8x128xf32>
    %233 = arith.divf %231, %232 : vector<8x128xf32>
    %234 = vector.extract_strided_slice %221 {offsets = [0, 256], sizes = [8, 128], strides = [1, 1]} : vector<8x512xf32> to vector<8x128xf32>
    %235 = math.tanh %234 : vector<8x128xf32>
    %236 = vector.extract_strided_slice %221 {offsets = [0, 384], sizes = [8, 128], strides = [1, 1]} : vector<8x512xf32> to vector<8x128xf32>
    %237 = arith.negf %236 : vector<8x128xf32>
    %238 = math.exp %237 : vector<8x128xf32>
    %cst_56 = arith.constant 1.000000e+00 : f32
    %239 = vector.broadcast %cst_56 : f32 to vector<8x128xf32>
    %240 = arith.addf %239, %238 : vector<8x128xf32>
    %241 = arith.divf %239, %240 : vector<8x128xf32>
    %242 = arith.mulf %233, %213 : vector<8x128xf32>
    %243 = arith.mulf %227, %235 : vector<8x128xf32>
    %244 = arith.addf %242, %243 : vector<8x128xf32>
    %245 = math.tanh %244 : vector<8x128xf32>
    %246 = arith.mulf %241, %245 : vector<8x128xf32>
    %247 = vector.broadcast %c5_i32 : i32 to vector<8x1xi32>
    %248 = arith.cmpi slt, %247, %7 : vector<8x1xi32>
    %249 = vector.shape_cast %248 : vector<8x1xi1> to vector<8x1xi1>
    %250 = vector.broadcast %249 : vector<8x1xi1> to vector<8x128xi1>
    %251 = arith.select %250, %246, %210 : vector<8x128xi1>, vector<8x128xf32>
    %252 = vector.shape_cast %248 : vector<8x1xi1> to vector<8x1xi1>
    %253 = vector.broadcast %252 : vector<8x1xi1> to vector<8x128xi1>
    %254 = arith.select %253, %244, %213 : vector<8x128xi1>, vector<8x128xf32>
    %c6_i32 = arith.constant 6 : i32
    %c8_i32_57 = arith.constant 8 : i32
    %255 = arith.muli %c6_i32, %c8_i32_57 : i32
    %256 = tpu.assume_multiple %255, 8 : i32
    %257 = arith.index_cast %256 : i32 to index
    %c0_58 = arith.constant 0 : index
    %258 = vector.load %arg6[%257, %c0_58] : memref<128x512xf32, #tpu.memory_space<vmem>>, vector<8x512xf32>
    %259 = arith.truncf %251 : vector<8x128xf32> to vector<8x128xbf16>
    %c0_59 = arith.constant 0 : index
    %c0_60 = arith.constant 0 : index
    %260 = vector.load %arg3[%c0_59, %c0_60] : memref<128x512xbf16, #tpu.memory_space<vmem>>, vector<128x512xbf16>
    %cst_61 = arith.constant dense<0.000000e+00> : vector<8x512xf32>
    %261 = tpu.matmul %259, %260, %cst_61 {dimension_numbers = #tpu.dot_dimension_numbers<[1], [0], [0], [1], [0, 0, 1, 1], [], []>} : vector<8x128xbf16>, vector<128x512xbf16>, vector<8x512xf32> -> vector<8x512xf32>
    %262 = arith.addf %258, %261 : vector<8x512xf32>
    %263 = vector.extract_strided_slice %262 {offsets = [0, 0], sizes = [8, 128], strides = [1, 1]} : vector<8x512xf32> to vector<8x128xf32>
    %264 = arith.negf %263 : vector<8x128xf32>
    %265 = math.exp %264 : vector<8x128xf32>
    %cst_62 = arith.constant 1.000000e+00 : f32
    %266 = vector.broadcast %cst_62 : f32 to vector<8x128xf32>
    %267 = arith.addf %266, %265 : vector<8x128xf32>
    %268 = arith.divf %266, %267 : vector<8x128xf32>
    %269 = vector.extract_strided_slice %262 {offsets = [0, 128], sizes = [8, 128], strides = [1, 1]} : vector<8x512xf32> to vector<8x128xf32>
    %270 = arith.negf %269 : vector<8x128xf32>
    %271 = math.exp %270 : vector<8x128xf32>
    %cst_63 = arith.constant 1.000000e+00 : f32
    %272 = vector.broadcast %cst_63 : f32 to vector<8x128xf32>
    %273 = arith.addf %272, %271 : vector<8x128xf32>
    %274 = arith.divf %272, %273 : vector<8x128xf32>
    %275 = vector.extract_strided_slice %262 {offsets = [0, 256], sizes = [8, 128], strides = [1, 1]} : vector<8x512xf32> to vector<8x128xf32>
    %276 = math.tanh %275 : vector<8x128xf32>
    %277 = vector.extract_strided_slice %262 {offsets = [0, 384], sizes = [8, 128], strides = [1, 1]} : vector<8x512xf32> to vector<8x128xf32>
    %278 = arith.negf %277 : vector<8x128xf32>
    %279 = math.exp %278 : vector<8x128xf32>
    %cst_64 = arith.constant 1.000000e+00 : f32
    %280 = vector.broadcast %cst_64 : f32 to vector<8x128xf32>
    %281 = arith.addf %280, %279 : vector<8x128xf32>
    %282 = arith.divf %280, %281 : vector<8x128xf32>
    %283 = arith.mulf %274, %254 : vector<8x128xf32>
    %284 = arith.mulf %268, %276 : vector<8x128xf32>
    %285 = arith.addf %283, %284 : vector<8x128xf32>
    %286 = math.tanh %285 : vector<8x128xf32>
    %287 = arith.mulf %282, %286 : vector<8x128xf32>
    %288 = vector.broadcast %c6_i32 : i32 to vector<8x1xi32>
    %289 = arith.cmpi slt, %288, %7 : vector<8x1xi32>
    %290 = vector.shape_cast %289 : vector<8x1xi1> to vector<8x1xi1>
    %291 = vector.broadcast %290 : vector<8x1xi1> to vector<8x128xi1>
    %292 = arith.select %291, %287, %251 : vector<8x128xi1>, vector<8x128xf32>
    %293 = vector.shape_cast %289 : vector<8x1xi1> to vector<8x1xi1>
    %294 = vector.broadcast %293 : vector<8x1xi1> to vector<8x128xi1>
    %295 = arith.select %294, %285, %254 : vector<8x128xi1>, vector<8x128xf32>
    %c7_i32 = arith.constant 7 : i32
    %c8_i32_65 = arith.constant 8 : i32
    %296 = arith.muli %c7_i32, %c8_i32_65 : i32
    %297 = tpu.assume_multiple %296, 8 : i32
    %298 = arith.index_cast %297 : i32 to index
    %c0_66 = arith.constant 0 : index
    %299 = vector.load %arg6[%298, %c0_66] : memref<128x512xf32, #tpu.memory_space<vmem>>, vector<8x512xf32>
    %300 = arith.truncf %292 : vector<8x128xf32> to vector<8x128xbf16>
    %c0_67 = arith.constant 0 : index
    %c0_68 = arith.constant 0 : index
    %301 = vector.load %arg3[%c0_67, %c0_68] : memref<128x512xbf16, #tpu.memory_space<vmem>>, vector<128x512xbf16>
    %cst_69 = arith.constant dense<0.000000e+00> : vector<8x512xf32>
    %302 = tpu.matmul %300, %301, %cst_69 {dimension_numbers = #tpu.dot_dimension_numbers<[1], [0], [0], [1], [0, 0, 1, 1], [], []>} : vector<8x128xbf16>, vector<128x512xbf16>, vector<8x512xf32> -> vector<8x512xf32>
    %303 = arith.addf %299, %302 : vector<8x512xf32>
    %304 = vector.extract_strided_slice %303 {offsets = [0, 0], sizes = [8, 128], strides = [1, 1]} : vector<8x512xf32> to vector<8x128xf32>
    %305 = arith.negf %304 : vector<8x128xf32>
    %306 = math.exp %305 : vector<8x128xf32>
    %cst_70 = arith.constant 1.000000e+00 : f32
    %307 = vector.broadcast %cst_70 : f32 to vector<8x128xf32>
    %308 = arith.addf %307, %306 : vector<8x128xf32>
    %309 = arith.divf %307, %308 : vector<8x128xf32>
    %310 = vector.extract_strided_slice %303 {offsets = [0, 128], sizes = [8, 128], strides = [1, 1]} : vector<8x512xf32> to vector<8x128xf32>
    %311 = arith.negf %310 : vector<8x128xf32>
    %312 = math.exp %311 : vector<8x128xf32>
    %cst_71 = arith.constant 1.000000e+00 : f32
    %313 = vector.broadcast %cst_71 : f32 to vector<8x128xf32>
    %314 = arith.addf %313, %312 : vector<8x128xf32>
    %315 = arith.divf %313, %314 : vector<8x128xf32>
    %316 = vector.extract_strided_slice %303 {offsets = [0, 256], sizes = [8, 128], strides = [1, 1]} : vector<8x512xf32> to vector<8x128xf32>
    %317 = math.tanh %316 : vector<8x128xf32>
    %318 = vector.extract_strided_slice %303 {offsets = [0, 384], sizes = [8, 128], strides = [1, 1]} : vector<8x512xf32> to vector<8x128xf32>
    %319 = arith.negf %318 : vector<8x128xf32>
    %320 = math.exp %319 : vector<8x128xf32>
    %cst_72 = arith.constant 1.000000e+00 : f32
    %321 = vector.broadcast %cst_72 : f32 to vector<8x128xf32>
    %322 = arith.addf %321, %320 : vector<8x128xf32>
    %323 = arith.divf %321, %322 : vector<8x128xf32>
    %324 = arith.mulf %315, %295 : vector<8x128xf32>
    %325 = arith.mulf %309, %317 : vector<8x128xf32>
    %326 = arith.addf %324, %325 : vector<8x128xf32>
    %327 = math.tanh %326 : vector<8x128xf32>
    %328 = arith.mulf %323, %327 : vector<8x128xf32>
    %329 = vector.broadcast %c7_i32 : i32 to vector<8x1xi32>
    %330 = arith.cmpi slt, %329, %7 : vector<8x1xi32>
    %331 = vector.shape_cast %330 : vector<8x1xi1> to vector<8x1xi1>
    %332 = vector.broadcast %331 : vector<8x1xi1> to vector<8x128xi1>
    %333 = arith.select %332, %328, %292 : vector<8x128xi1>, vector<8x128xf32>
    %334 = vector.shape_cast %330 : vector<8x1xi1> to vector<8x1xi1>
    %335 = vector.broadcast %334 : vector<8x1xi1> to vector<8x128xi1>
    %336 = arith.select %335, %326, %295 : vector<8x128xi1>, vector<8x128xf32>
    %c8_i32_73 = arith.constant 8 : i32
    %c8_i32_74 = arith.constant 8 : i32
    %337 = arith.muli %c8_i32_73, %c8_i32_74 : i32
    %338 = tpu.assume_multiple %337, 8 : i32
    %339 = arith.index_cast %338 : i32 to index
    %c0_75 = arith.constant 0 : index
    %340 = vector.load %arg6[%339, %c0_75] : memref<128x512xf32, #tpu.memory_space<vmem>>, vector<8x512xf32>
    %341 = arith.truncf %333 : vector<8x128xf32> to vector<8x128xbf16>
    %c0_76 = arith.constant 0 : index
    %c0_77 = arith.constant 0 : index
    %342 = vector.load %arg3[%c0_76, %c0_77] : memref<128x512xbf16, #tpu.memory_space<vmem>>, vector<128x512xbf16>
    %cst_78 = arith.constant dense<0.000000e+00> : vector<8x512xf32>
    %343 = tpu.matmul %341, %342, %cst_78 {dimension_numbers = #tpu.dot_dimension_numbers<[1], [0], [0], [1], [0, 0, 1, 1], [], []>} : vector<8x128xbf16>, vector<128x512xbf16>, vector<8x512xf32> -> vector<8x512xf32>
    %344 = arith.addf %340, %343 : vector<8x512xf32>
    %345 = vector.extract_strided_slice %344 {offsets = [0, 0], sizes = [8, 128], strides = [1, 1]} : vector<8x512xf32> to vector<8x128xf32>
    %346 = arith.negf %345 : vector<8x128xf32>
    %347 = math.exp %346 : vector<8x128xf32>
    %cst_79 = arith.constant 1.000000e+00 : f32
    %348 = vector.broadcast %cst_79 : f32 to vector<8x128xf32>
    %349 = arith.addf %348, %347 : vector<8x128xf32>
    %350 = arith.divf %348, %349 : vector<8x128xf32>
    %351 = vector.extract_strided_slice %344 {offsets = [0, 128], sizes = [8, 128], strides = [1, 1]} : vector<8x512xf32> to vector<8x128xf32>
    %352 = arith.negf %351 : vector<8x128xf32>
    %353 = math.exp %352 : vector<8x128xf32>
    %cst_80 = arith.constant 1.000000e+00 : f32
    %354 = vector.broadcast %cst_80 : f32 to vector<8x128xf32>
    %355 = arith.addf %354, %353 : vector<8x128xf32>
    %356 = arith.divf %354, %355 : vector<8x128xf32>
    %357 = vector.extract_strided_slice %344 {offsets = [0, 256], sizes = [8, 128], strides = [1, 1]} : vector<8x512xf32> to vector<8x128xf32>
    %358 = math.tanh %357 : vector<8x128xf32>
    %359 = vector.extract_strided_slice %344 {offsets = [0, 384], sizes = [8, 128], strides = [1, 1]} : vector<8x512xf32> to vector<8x128xf32>
    %360 = arith.negf %359 : vector<8x128xf32>
    %361 = math.exp %360 : vector<8x128xf32>
    %cst_81 = arith.constant 1.000000e+00 : f32
    %362 = vector.broadcast %cst_81 : f32 to vector<8x128xf32>
    %363 = arith.addf %362, %361 : vector<8x128xf32>
    %364 = arith.divf %362, %363 : vector<8x128xf32>
    %365 = arith.mulf %356, %336 : vector<8x128xf32>
    %366 = arith.mulf %350, %358 : vector<8x128xf32>
    %367 = arith.addf %365, %366 : vector<8x128xf32>
    %368 = math.tanh %367 : vector<8x128xf32>
    %369 = arith.mulf %364, %368 : vector<8x128xf32>
    %370 = vector.broadcast %c8_i32_73 : i32 to vector<8x1xi32>
    %371 = arith.cmpi slt, %370, %7 : vector<8x1xi32>
    %372 = vector.shape_cast %371 : vector<8x1xi1> to vector<8x1xi1>
    %373 = vector.broadcast %372 : vector<8x1xi1> to vector<8x128xi1>
    %374 = arith.select %373, %369, %333 : vector<8x128xi1>, vector<8x128xf32>
    %375 = vector.shape_cast %371 : vector<8x1xi1> to vector<8x1xi1>
    %376 = vector.broadcast %375 : vector<8x1xi1> to vector<8x128xi1>
    %377 = arith.select %376, %367, %336 : vector<8x128xi1>, vector<8x128xf32>
    %c9_i32 = arith.constant 9 : i32
    %c8_i32_82 = arith.constant 8 : i32
    %378 = arith.muli %c9_i32, %c8_i32_82 : i32
    %379 = tpu.assume_multiple %378, 8 : i32
    %380 = arith.index_cast %379 : i32 to index
    %c0_83 = arith.constant 0 : index
    %381 = vector.load %arg6[%380, %c0_83] : memref<128x512xf32, #tpu.memory_space<vmem>>, vector<8x512xf32>
    %382 = arith.truncf %374 : vector<8x128xf32> to vector<8x128xbf16>
    %c0_84 = arith.constant 0 : index
    %c0_85 = arith.constant 0 : index
    %383 = vector.load %arg3[%c0_84, %c0_85] : memref<128x512xbf16, #tpu.memory_space<vmem>>, vector<128x512xbf16>
    %cst_86 = arith.constant dense<0.000000e+00> : vector<8x512xf32>
    %384 = tpu.matmul %382, %383, %cst_86 {dimension_numbers = #tpu.dot_dimension_numbers<[1], [0], [0], [1], [0, 0, 1, 1], [], []>} : vector<8x128xbf16>, vector<128x512xbf16>, vector<8x512xf32> -> vector<8x512xf32>
    %385 = arith.addf %381, %384 : vector<8x512xf32>
    %386 = vector.extract_strided_slice %385 {offsets = [0, 0], sizes = [8, 128], strides = [1, 1]} : vector<8x512xf32> to vector<8x128xf32>
    %387 = arith.negf %386 : vector<8x128xf32>
    %388 = math.exp %387 : vector<8x128xf32>
    %cst_87 = arith.constant 1.000000e+00 : f32
    %389 = vector.broadcast %cst_87 : f32 to vector<8x128xf32>
    %390 = arith.addf %389, %388 : vector<8x128xf32>
    %391 = arith.divf %389, %390 : vector<8x128xf32>
    %392 = vector.extract_strided_slice %385 {offsets = [0, 128], sizes = [8, 128], strides = [1, 1]} : vector<8x512xf32> to vector<8x128xf32>
    %393 = arith.negf %392 : vector<8x128xf32>
    %394 = math.exp %393 : vector<8x128xf32>
    %cst_88 = arith.constant 1.000000e+00 : f32
    %395 = vector.broadcast %cst_88 : f32 to vector<8x128xf32>
    %396 = arith.addf %395, %394 : vector<8x128xf32>
    %397 = arith.divf %395, %396 : vector<8x128xf32>
    %398 = vector.extract_strided_slice %385 {offsets = [0, 256], sizes = [8, 128], strides = [1, 1]} : vector<8x512xf32> to vector<8x128xf32>
    %399 = math.tanh %398 : vector<8x128xf32>
    %400 = vector.extract_strided_slice %385 {offsets = [0, 384], sizes = [8, 128], strides = [1, 1]} : vector<8x512xf32> to vector<8x128xf32>
    %401 = arith.negf %400 : vector<8x128xf32>
    %402 = math.exp %401 : vector<8x128xf32>
    %cst_89 = arith.constant 1.000000e+00 : f32
    %403 = vector.broadcast %cst_89 : f32 to vector<8x128xf32>
    %404 = arith.addf %403, %402 : vector<8x128xf32>
    %405 = arith.divf %403, %404 : vector<8x128xf32>
    %406 = arith.mulf %397, %377 : vector<8x128xf32>
    %407 = arith.mulf %391, %399 : vector<8x128xf32>
    %408 = arith.addf %406, %407 : vector<8x128xf32>
    %409 = math.tanh %408 : vector<8x128xf32>
    %410 = arith.mulf %405, %409 : vector<8x128xf32>
    %411 = vector.broadcast %c9_i32 : i32 to vector<8x1xi32>
    %412 = arith.cmpi slt, %411, %7 : vector<8x1xi32>
    %413 = vector.shape_cast %412 : vector<8x1xi1> to vector<8x1xi1>
    %414 = vector.broadcast %413 : vector<8x1xi1> to vector<8x128xi1>
    %415 = arith.select %414, %410, %374 : vector<8x128xi1>, vector<8x128xf32>
    %416 = vector.shape_cast %412 : vector<8x1xi1> to vector<8x1xi1>
    %417 = vector.broadcast %416 : vector<8x1xi1> to vector<8x128xi1>
    %418 = arith.select %417, %408, %377 : vector<8x128xi1>, vector<8x128xf32>
    %c10_i32 = arith.constant 10 : i32
    %c8_i32_90 = arith.constant 8 : i32
    %419 = arith.muli %c10_i32, %c8_i32_90 : i32
    %420 = tpu.assume_multiple %419, 8 : i32
    %421 = arith.index_cast %420 : i32 to index
    %c0_91 = arith.constant 0 : index
    %422 = vector.load %arg6[%421, %c0_91] : memref<128x512xf32, #tpu.memory_space<vmem>>, vector<8x512xf32>
    %423 = arith.truncf %415 : vector<8x128xf32> to vector<8x128xbf16>
    %c0_92 = arith.constant 0 : index
    %c0_93 = arith.constant 0 : index
    %424 = vector.load %arg3[%c0_92, %c0_93] : memref<128x512xbf16, #tpu.memory_space<vmem>>, vector<128x512xbf16>
    %cst_94 = arith.constant dense<0.000000e+00> : vector<8x512xf32>
    %425 = tpu.matmul %423, %424, %cst_94 {dimension_numbers = #tpu.dot_dimension_numbers<[1], [0], [0], [1], [0, 0, 1, 1], [], []>} : vector<8x128xbf16>, vector<128x512xbf16>, vector<8x512xf32> -> vector<8x512xf32>
    %426 = arith.addf %422, %425 : vector<8x512xf32>
    %427 = vector.extract_strided_slice %426 {offsets = [0, 0], sizes = [8, 128], strides = [1, 1]} : vector<8x512xf32> to vector<8x128xf32>
    %428 = arith.negf %427 : vector<8x128xf32>
    %429 = math.exp %428 : vector<8x128xf32>
    %cst_95 = arith.constant 1.000000e+00 : f32
    %430 = vector.broadcast %cst_95 : f32 to vector<8x128xf32>
    %431 = arith.addf %430, %429 : vector<8x128xf32>
    %432 = arith.divf %430, %431 : vector<8x128xf32>
    %433 = vector.extract_strided_slice %426 {offsets = [0, 128], sizes = [8, 128], strides = [1, 1]} : vector<8x512xf32> to vector<8x128xf32>
    %434 = arith.negf %433 : vector<8x128xf32>
    %435 = math.exp %434 : vector<8x128xf32>
    %cst_96 = arith.constant 1.000000e+00 : f32
    %436 = vector.broadcast %cst_96 : f32 to vector<8x128xf32>
    %437 = arith.addf %436, %435 : vector<8x128xf32>
    %438 = arith.divf %436, %437 : vector<8x128xf32>
    %439 = vector.extract_strided_slice %426 {offsets = [0, 256], sizes = [8, 128], strides = [1, 1]} : vector<8x512xf32> to vector<8x128xf32>
    %440 = math.tanh %439 : vector<8x128xf32>
    %441 = vector.extract_strided_slice %426 {offsets = [0, 384], sizes = [8, 128], strides = [1, 1]} : vector<8x512xf32> to vector<8x128xf32>
    %442 = arith.negf %441 : vector<8x128xf32>
    %443 = math.exp %442 : vector<8x128xf32>
    %cst_97 = arith.constant 1.000000e+00 : f32
    %444 = vector.broadcast %cst_97 : f32 to vector<8x128xf32>
    %445 = arith.addf %444, %443 : vector<8x128xf32>
    %446 = arith.divf %444, %445 : vector<8x128xf32>
    %447 = arith.mulf %438, %418 : vector<8x128xf32>
    %448 = arith.mulf %432, %440 : vector<8x128xf32>
    %449 = arith.addf %447, %448 : vector<8x128xf32>
    %450 = math.tanh %449 : vector<8x128xf32>
    %451 = arith.mulf %446, %450 : vector<8x128xf32>
    %452 = vector.broadcast %c10_i32 : i32 to vector<8x1xi32>
    %453 = arith.cmpi slt, %452, %7 : vector<8x1xi32>
    %454 = vector.shape_cast %453 : vector<8x1xi1> to vector<8x1xi1>
    %455 = vector.broadcast %454 : vector<8x1xi1> to vector<8x128xi1>
    %456 = arith.select %455, %451, %415 : vector<8x128xi1>, vector<8x128xf32>
    %457 = vector.shape_cast %453 : vector<8x1xi1> to vector<8x1xi1>
    %458 = vector.broadcast %457 : vector<8x1xi1> to vector<8x128xi1>
    %459 = arith.select %458, %449, %418 : vector<8x128xi1>, vector<8x128xf32>
    %c11_i32 = arith.constant 11 : i32
    %c8_i32_98 = arith.constant 8 : i32
    %460 = arith.muli %c11_i32, %c8_i32_98 : i32
    %461 = tpu.assume_multiple %460, 8 : i32
    %462 = arith.index_cast %461 : i32 to index
    %c0_99 = arith.constant 0 : index
    %463 = vector.load %arg6[%462, %c0_99] : memref<128x512xf32, #tpu.memory_space<vmem>>, vector<8x512xf32>
    %464 = arith.truncf %456 : vector<8x128xf32> to vector<8x128xbf16>
    %c0_100 = arith.constant 0 : index
    %c0_101 = arith.constant 0 : index
    %465 = vector.load %arg3[%c0_100, %c0_101] : memref<128x512xbf16, #tpu.memory_space<vmem>>, vector<128x512xbf16>
    %cst_102 = arith.constant dense<0.000000e+00> : vector<8x512xf32>
    %466 = tpu.matmul %464, %465, %cst_102 {dimension_numbers = #tpu.dot_dimension_numbers<[1], [0], [0], [1], [0, 0, 1, 1], [], []>} : vector<8x128xbf16>, vector<128x512xbf16>, vector<8x512xf32> -> vector<8x512xf32>
    %467 = arith.addf %463, %466 : vector<8x512xf32>
    %468 = vector.extract_strided_slice %467 {offsets = [0, 0], sizes = [8, 128], strides = [1, 1]} : vector<8x512xf32> to vector<8x128xf32>
    %469 = arith.negf %468 : vector<8x128xf32>
    %470 = math.exp %469 : vector<8x128xf32>
    %cst_103 = arith.constant 1.000000e+00 : f32
    %471 = vector.broadcast %cst_103 : f32 to vector<8x128xf32>
    %472 = arith.addf %471, %470 : vector<8x128xf32>
    %473 = arith.divf %471, %472 : vector<8x128xf32>
    %474 = vector.extract_strided_slice %467 {offsets = [0, 128], sizes = [8, 128], strides = [1, 1]} : vector<8x512xf32> to vector<8x128xf32>
    %475 = arith.negf %474 : vector<8x128xf32>
    %476 = math.exp %475 : vector<8x128xf32>
    %cst_104 = arith.constant 1.000000e+00 : f32
    %477 = vector.broadcast %cst_104 : f32 to vector<8x128xf32>
    %478 = arith.addf %477, %476 : vector<8x128xf32>
    %479 = arith.divf %477, %478 : vector<8x128xf32>
    %480 = vector.extract_strided_slice %467 {offsets = [0, 256], sizes = [8, 128], strides = [1, 1]} : vector<8x512xf32> to vector<8x128xf32>
    %481 = math.tanh %480 : vector<8x128xf32>
    %482 = vector.extract_strided_slice %467 {offsets = [0, 384], sizes = [8, 128], strides = [1, 1]} : vector<8x512xf32> to vector<8x128xf32>
    %483 = arith.negf %482 : vector<8x128xf32>
    %484 = math.exp %483 : vector<8x128xf32>
    %cst_105 = arith.constant 1.000000e+00 : f32
    %485 = vector.broadcast %cst_105 : f32 to vector<8x128xf32>
    %486 = arith.addf %485, %484 : vector<8x128xf32>
    %487 = arith.divf %485, %486 : vector<8x128xf32>
    %488 = arith.mulf %479, %459 : vector<8x128xf32>
    %489 = arith.mulf %473, %481 : vector<8x128xf32>
    %490 = arith.addf %488, %489 : vector<8x128xf32>
    %491 = math.tanh %490 : vector<8x128xf32>
    %492 = arith.mulf %487, %491 : vector<8x128xf32>
    %493 = vector.broadcast %c11_i32 : i32 to vector<8x1xi32>
    %494 = arith.cmpi slt, %493, %7 : vector<8x1xi32>
    %495 = vector.shape_cast %494 : vector<8x1xi1> to vector<8x1xi1>
    %496 = vector.broadcast %495 : vector<8x1xi1> to vector<8x128xi1>
    %497 = arith.select %496, %492, %456 : vector<8x128xi1>, vector<8x128xf32>
    %498 = vector.shape_cast %494 : vector<8x1xi1> to vector<8x1xi1>
    %499 = vector.broadcast %498 : vector<8x1xi1> to vector<8x128xi1>
    %500 = arith.select %499, %490, %459 : vector<8x128xi1>, vector<8x128xf32>
    %c12_i32 = arith.constant 12 : i32
    %c8_i32_106 = arith.constant 8 : i32
    %501 = arith.muli %c12_i32, %c8_i32_106 : i32
    %502 = tpu.assume_multiple %501, 8 : i32
    %503 = arith.index_cast %502 : i32 to index
    %c0_107 = arith.constant 0 : index
    %504 = vector.load %arg6[%503, %c0_107] : memref<128x512xf32, #tpu.memory_space<vmem>>, vector<8x512xf32>
    %505 = arith.truncf %497 : vector<8x128xf32> to vector<8x128xbf16>
    %c0_108 = arith.constant 0 : index
    %c0_109 = arith.constant 0 : index
    %506 = vector.load %arg3[%c0_108, %c0_109] : memref<128x512xbf16, #tpu.memory_space<vmem>>, vector<128x512xbf16>
    %cst_110 = arith.constant dense<0.000000e+00> : vector<8x512xf32>
    %507 = tpu.matmul %505, %506, %cst_110 {dimension_numbers = #tpu.dot_dimension_numbers<[1], [0], [0], [1], [0, 0, 1, 1], [], []>} : vector<8x128xbf16>, vector<128x512xbf16>, vector<8x512xf32> -> vector<8x512xf32>
    %508 = arith.addf %504, %507 : vector<8x512xf32>
    %509 = vector.extract_strided_slice %508 {offsets = [0, 0], sizes = [8, 128], strides = [1, 1]} : vector<8x512xf32> to vector<8x128xf32>
    %510 = arith.negf %509 : vector<8x128xf32>
    %511 = math.exp %510 : vector<8x128xf32>
    %cst_111 = arith.constant 1.000000e+00 : f32
    %512 = vector.broadcast %cst_111 : f32 to vector<8x128xf32>
    %513 = arith.addf %512, %511 : vector<8x128xf32>
    %514 = arith.divf %512, %513 : vector<8x128xf32>
    %515 = vector.extract_strided_slice %508 {offsets = [0, 128], sizes = [8, 128], strides = [1, 1]} : vector<8x512xf32> to vector<8x128xf32>
    %516 = arith.negf %515 : vector<8x128xf32>
    %517 = math.exp %516 : vector<8x128xf32>
    %cst_112 = arith.constant 1.000000e+00 : f32
    %518 = vector.broadcast %cst_112 : f32 to vector<8x128xf32>
    %519 = arith.addf %518, %517 : vector<8x128xf32>
    %520 = arith.divf %518, %519 : vector<8x128xf32>
    %521 = vector.extract_strided_slice %508 {offsets = [0, 256], sizes = [8, 128], strides = [1, 1]} : vector<8x512xf32> to vector<8x128xf32>
    %522 = math.tanh %521 : vector<8x128xf32>
    %523 = vector.extract_strided_slice %508 {offsets = [0, 384], sizes = [8, 128], strides = [1, 1]} : vector<8x512xf32> to vector<8x128xf32>
    %524 = arith.negf %523 : vector<8x128xf32>
    %525 = math.exp %524 : vector<8x128xf32>
    %cst_113 = arith.constant 1.000000e+00 : f32
    %526 = vector.broadcast %cst_113 : f32 to vector<8x128xf32>
    %527 = arith.addf %526, %525 : vector<8x128xf32>
    %528 = arith.divf %526, %527 : vector<8x128xf32>
    %529 = arith.mulf %520, %500 : vector<8x128xf32>
    %530 = arith.mulf %514, %522 : vector<8x128xf32>
    %531 = arith.addf %529, %530 : vector<8x128xf32>
    %532 = math.tanh %531 : vector<8x128xf32>
    %533 = arith.mulf %528, %532 : vector<8x128xf32>
    %534 = vector.broadcast %c12_i32 : i32 to vector<8x1xi32>
    %535 = arith.cmpi slt, %534, %7 : vector<8x1xi32>
    %536 = vector.shape_cast %535 : vector<8x1xi1> to vector<8x1xi1>
    %537 = vector.broadcast %536 : vector<8x1xi1> to vector<8x128xi1>
    %538 = arith.select %537, %533, %497 : vector<8x128xi1>, vector<8x128xf32>
    %539 = vector.shape_cast %535 : vector<8x1xi1> to vector<8x1xi1>
    %540 = vector.broadcast %539 : vector<8x1xi1> to vector<8x128xi1>
    %541 = arith.select %540, %531, %500 : vector<8x128xi1>, vector<8x128xf32>
    %c13_i32 = arith.constant 13 : i32
    %c8_i32_114 = arith.constant 8 : i32
    %542 = arith.muli %c13_i32, %c8_i32_114 : i32
    %543 = tpu.assume_multiple %542, 8 : i32
    %544 = arith.index_cast %543 : i32 to index
    %c0_115 = arith.constant 0 : index
    %545 = vector.load %arg6[%544, %c0_115] : memref<128x512xf32, #tpu.memory_space<vmem>>, vector<8x512xf32>
    %546 = arith.truncf %538 : vector<8x128xf32> to vector<8x128xbf16>
    %c0_116 = arith.constant 0 : index
    %c0_117 = arith.constant 0 : index
    %547 = vector.load %arg3[%c0_116, %c0_117] : memref<128x512xbf16, #tpu.memory_space<vmem>>, vector<128x512xbf16>
    %cst_118 = arith.constant dense<0.000000e+00> : vector<8x512xf32>
    %548 = tpu.matmul %546, %547, %cst_118 {dimension_numbers = #tpu.dot_dimension_numbers<[1], [0], [0], [1], [0, 0, 1, 1], [], []>} : vector<8x128xbf16>, vector<128x512xbf16>, vector<8x512xf32> -> vector<8x512xf32>
    %549 = arith.addf %545, %548 : vector<8x512xf32>
    %550 = vector.extract_strided_slice %549 {offsets = [0, 0], sizes = [8, 128], strides = [1, 1]} : vector<8x512xf32> to vector<8x128xf32>
    %551 = arith.negf %550 : vector<8x128xf32>
    %552 = math.exp %551 : vector<8x128xf32>
    %cst_119 = arith.constant 1.000000e+00 : f32
    %553 = vector.broadcast %cst_119 : f32 to vector<8x128xf32>
    %554 = arith.addf %553, %552 : vector<8x128xf32>
    %555 = arith.divf %553, %554 : vector<8x128xf32>
    %556 = vector.extract_strided_slice %549 {offsets = [0, 128], sizes = [8, 128], strides = [1, 1]} : vector<8x512xf32> to vector<8x128xf32>
    %557 = arith.negf %556 : vector<8x128xf32>
    %558 = math.exp %557 : vector<8x128xf32>
    %cst_120 = arith.constant 1.000000e+00 : f32
    %559 = vector.broadcast %cst_120 : f32 to vector<8x128xf32>
    %560 = arith.addf %559, %558 : vector<8x128xf32>
    %561 = arith.divf %559, %560 : vector<8x128xf32>
    %562 = vector.extract_strided_slice %549 {offsets = [0, 256], sizes = [8, 128], strides = [1, 1]} : vector<8x512xf32> to vector<8x128xf32>
    %563 = math.tanh %562 : vector<8x128xf32>
    %564 = vector.extract_strided_slice %549 {offsets = [0, 384], sizes = [8, 128], strides = [1, 1]} : vector<8x512xf32> to vector<8x128xf32>
    %565 = arith.negf %564 : vector<8x128xf32>
    %566 = math.exp %565 : vector<8x128xf32>
    %cst_121 = arith.constant 1.000000e+00 : f32
    %567 = vector.broadcast %cst_121 : f32 to vector<8x128xf32>
    %568 = arith.addf %567, %566 : vector<8x128xf32>
    %569 = arith.divf %567, %568 : vector<8x128xf32>
    %570 = arith.mulf %561, %541 : vector<8x128xf32>
    %571 = arith.mulf %555, %563 : vector<8x128xf32>
    %572 = arith.addf %570, %571 : vector<8x128xf32>
    %573 = math.tanh %572 : vector<8x128xf32>
    %574 = arith.mulf %569, %573 : vector<8x128xf32>
    %575 = vector.broadcast %c13_i32 : i32 to vector<8x1xi32>
    %576 = arith.cmpi slt, %575, %7 : vector<8x1xi32>
    %577 = vector.shape_cast %576 : vector<8x1xi1> to vector<8x1xi1>
    %578 = vector.broadcast %577 : vector<8x1xi1> to vector<8x128xi1>
    %579 = arith.select %578, %574, %538 : vector<8x128xi1>, vector<8x128xf32>
    %580 = vector.shape_cast %576 : vector<8x1xi1> to vector<8x1xi1>
    %581 = vector.broadcast %580 : vector<8x1xi1> to vector<8x128xi1>
    %582 = arith.select %581, %572, %541 : vector<8x128xi1>, vector<8x128xf32>
    %c14_i32 = arith.constant 14 : i32
    %c8_i32_122 = arith.constant 8 : i32
    %583 = arith.muli %c14_i32, %c8_i32_122 : i32
    %584 = tpu.assume_multiple %583, 8 : i32
    %585 = arith.index_cast %584 : i32 to index
    %c0_123 = arith.constant 0 : index
    %586 = vector.load %arg6[%585, %c0_123] : memref<128x512xf32, #tpu.memory_space<vmem>>, vector<8x512xf32>
    %587 = arith.truncf %579 : vector<8x128xf32> to vector<8x128xbf16>
    %c0_124 = arith.constant 0 : index
    %c0_125 = arith.constant 0 : index
    %588 = vector.load %arg3[%c0_124, %c0_125] : memref<128x512xbf16, #tpu.memory_space<vmem>>, vector<128x512xbf16>
    %cst_126 = arith.constant dense<0.000000e+00> : vector<8x512xf32>
    %589 = tpu.matmul %587, %588, %cst_126 {dimension_numbers = #tpu.dot_dimension_numbers<[1], [0], [0], [1], [0, 0, 1, 1], [], []>} : vector<8x128xbf16>, vector<128x512xbf16>, vector<8x512xf32> -> vector<8x512xf32>
    %590 = arith.addf %586, %589 : vector<8x512xf32>
    %591 = vector.extract_strided_slice %590 {offsets = [0, 0], sizes = [8, 128], strides = [1, 1]} : vector<8x512xf32> to vector<8x128xf32>
    %592 = arith.negf %591 : vector<8x128xf32>
    %593 = math.exp %592 : vector<8x128xf32>
    %cst_127 = arith.constant 1.000000e+00 : f32
    %594 = vector.broadcast %cst_127 : f32 to vector<8x128xf32>
    %595 = arith.addf %594, %593 : vector<8x128xf32>
    %596 = arith.divf %594, %595 : vector<8x128xf32>
    %597 = vector.extract_strided_slice %590 {offsets = [0, 128], sizes = [8, 128], strides = [1, 1]} : vector<8x512xf32> to vector<8x128xf32>
    %598 = arith.negf %597 : vector<8x128xf32>
    %599 = math.exp %598 : vector<8x128xf32>
    %cst_128 = arith.constant 1.000000e+00 : f32
    %600 = vector.broadcast %cst_128 : f32 to vector<8x128xf32>
    %601 = arith.addf %600, %599 : vector<8x128xf32>
    %602 = arith.divf %600, %601 : vector<8x128xf32>
    %603 = vector.extract_strided_slice %590 {offsets = [0, 256], sizes = [8, 128], strides = [1, 1]} : vector<8x512xf32> to vector<8x128xf32>
    %604 = math.tanh %603 : vector<8x128xf32>
    %605 = vector.extract_strided_slice %590 {offsets = [0, 384], sizes = [8, 128], strides = [1, 1]} : vector<8x512xf32> to vector<8x128xf32>
    %606 = arith.negf %605 : vector<8x128xf32>
    %607 = math.exp %606 : vector<8x128xf32>
    %cst_129 = arith.constant 1.000000e+00 : f32
    %608 = vector.broadcast %cst_129 : f32 to vector<8x128xf32>
    %609 = arith.addf %608, %607 : vector<8x128xf32>
    %610 = arith.divf %608, %609 : vector<8x128xf32>
    %611 = arith.mulf %602, %582 : vector<8x128xf32>
    %612 = arith.mulf %596, %604 : vector<8x128xf32>
    %613 = arith.addf %611, %612 : vector<8x128xf32>
    %614 = math.tanh %613 : vector<8x128xf32>
    %615 = arith.mulf %610, %614 : vector<8x128xf32>
    %616 = vector.broadcast %c14_i32 : i32 to vector<8x1xi32>
    %617 = arith.cmpi slt, %616, %7 : vector<8x1xi32>
    %618 = vector.shape_cast %617 : vector<8x1xi1> to vector<8x1xi1>
    %619 = vector.broadcast %618 : vector<8x1xi1> to vector<8x128xi1>
    %620 = arith.select %619, %615, %579 : vector<8x128xi1>, vector<8x128xf32>
    %621 = vector.shape_cast %617 : vector<8x1xi1> to vector<8x1xi1>
    %622 = vector.broadcast %621 : vector<8x1xi1> to vector<8x128xi1>
    %623 = arith.select %622, %613, %582 : vector<8x128xi1>, vector<8x128xf32>
    %c15_i32 = arith.constant 15 : i32
    %c8_i32_130 = arith.constant 8 : i32
    %624 = arith.muli %c15_i32, %c8_i32_130 : i32
    %625 = tpu.assume_multiple %624, 8 : i32
    %626 = arith.index_cast %625 : i32 to index
    %c0_131 = arith.constant 0 : index
    %627 = vector.load %arg6[%626, %c0_131] : memref<128x512xf32, #tpu.memory_space<vmem>>, vector<8x512xf32>
    %628 = arith.truncf %620 : vector<8x128xf32> to vector<8x128xbf16>
    %c0_132 = arith.constant 0 : index
    %c0_133 = arith.constant 0 : index
    %629 = vector.load %arg3[%c0_132, %c0_133] : memref<128x512xbf16, #tpu.memory_space<vmem>>, vector<128x512xbf16>
    %cst_134 = arith.constant dense<0.000000e+00> : vector<8x512xf32>
    %630 = tpu.matmul %628, %629, %cst_134 {dimension_numbers = #tpu.dot_dimension_numbers<[1], [0], [0], [1], [0, 0, 1, 1], [], []>} : vector<8x128xbf16>, vector<128x512xbf16>, vector<8x512xf32> -> vector<8x512xf32>
    %631 = arith.addf %627, %630 : vector<8x512xf32>
    %632 = vector.extract_strided_slice %631 {offsets = [0, 0], sizes = [8, 128], strides = [1, 1]} : vector<8x512xf32> to vector<8x128xf32>
    %633 = arith.negf %632 : vector<8x128xf32>
    %634 = math.exp %633 : vector<8x128xf32>
    %cst_135 = arith.constant 1.000000e+00 : f32
    %635 = vector.broadcast %cst_135 : f32 to vector<8x128xf32>
    %636 = arith.addf %635, %634 : vector<8x128xf32>
    %637 = arith.divf %635, %636 : vector<8x128xf32>
    %638 = vector.extract_strided_slice %631 {offsets = [0, 128], sizes = [8, 128], strides = [1, 1]} : vector<8x512xf32> to vector<8x128xf32>
    %639 = arith.negf %638 : vector<8x128xf32>
    %640 = math.exp %639 : vector<8x128xf32>
    %cst_136 = arith.constant 1.000000e+00 : f32
    %641 = vector.broadcast %cst_136 : f32 to vector<8x128xf32>
    %642 = arith.addf %641, %640 : vector<8x128xf32>
    %643 = arith.divf %641, %642 : vector<8x128xf32>
    %644 = vector.extract_strided_slice %631 {offsets = [0, 256], sizes = [8, 128], strides = [1, 1]} : vector<8x512xf32> to vector<8x128xf32>
    %645 = math.tanh %644 : vector<8x128xf32>
    %646 = vector.extract_strided_slice %631 {offsets = [0, 384], sizes = [8, 128], strides = [1, 1]} : vector<8x512xf32> to vector<8x128xf32>
    %647 = arith.negf %646 : vector<8x128xf32>
    %648 = math.exp %647 : vector<8x128xf32>
    %cst_137 = arith.constant 1.000000e+00 : f32
    %649 = vector.broadcast %cst_137 : f32 to vector<8x128xf32>
    %650 = arith.addf %649, %648 : vector<8x128xf32>
    %651 = arith.divf %649, %650 : vector<8x128xf32>
    %652 = arith.mulf %643, %623 : vector<8x128xf32>
    %653 = arith.mulf %637, %645 : vector<8x128xf32>
    %654 = arith.addf %652, %653 : vector<8x128xf32>
    %655 = math.tanh %654 : vector<8x128xf32>
    %656 = arith.mulf %651, %655 : vector<8x128xf32>
    %657 = vector.broadcast %c15_i32 : i32 to vector<8x1xi32>
    %658 = arith.cmpi slt, %657, %7 : vector<8x1xi32>
    %659 = vector.shape_cast %658 : vector<8x1xi1> to vector<8x1xi1>
    %660 = vector.broadcast %659 : vector<8x1xi1> to vector<8x128xi1>
    %661 = arith.select %660, %656, %620 : vector<8x128xi1>, vector<8x128xf32>
    %662 = vector.shape_cast %658 : vector<8x1xi1> to vector<8x1xi1>
    %663 = vector.broadcast %662 : vector<8x1xi1> to vector<8x128xi1>
    %664 = arith.select %663, %654, %623 : vector<8x128xi1>, vector<8x128xf32>
    %c16_i32 = arith.constant 16 : i32
    %c0_138 = arith.constant 0 : index
    %c0_139 = arith.constant 0 : index
    %665 = vector.load %arg5[%c0_138, %c0_139] : memref<8x128xf32, #tpu.memory_space<vmem>>, vector<8x128xf32>
    tpu.vector_store %arg5[%c0_138, %c0_139], %661 {strides = array<i32>} : memref<8x128xf32, #tpu.memory_space<vmem>>, vector<8x128xf32>,
    return
  }
}

</mosaic_0001>

<bundles_post_ra>
// kernel: tpu_custom_call.1
= control target key start
LH: loop header
LB: loop body
LE: loop exit
PB: predicated region body
PF: predicated region fallthrough
CT: control target
= control target key end

     0   :  { %10 = vsyncpa [#allocation4], 0  ;;  %s4692_s0 = inlined_call_operand.vmem [shape: bf16[128,64], index: 0, kind: input, shape index: {}]   ;;  %s4693_s1 = inlined_call_operand.vmem [shape: s32[8,1], index: 1, kind: input, shape index: {}]   ;;  %s4694_s2 = inlined_call_operand.hbm [shape: bf16[64,512], index: 2, kind: input, shape index: {}]   ;;  %s4695_s3 = inlined_call_operand.hbm [shape: bf16[128,512], index: 3, kind: input, shape index: {}]   ;;  %s4696_s4 = inlined_call_operand.vmem [shape: f32[1,512], index: 4, kind: input, shape index: {}]   ;;  %s4697_s5 = inlined_call_operand.hbm [shape: f32[8,128], index: 5, kind: output, shape index: {}]  }
   0x1   :  { %11 = vsyncpa [#allocation7], 0 }
   0x2   :  { %12 = vsyncpa [#allocation5], 0  ;;  %s3384_s18 = smov [#allocation3]   ;;  %s3312_s22 = scalar_lea.hbm %s4694_s2, 2048 }
   0x3   :  { %s22_s19 = sshll.u32 %s3384_s18, 4  ;;  %p3313_p0 = scmp.ne.s32.totalorder %s4694_s2, %s3312_s22  ;;  %s23_s19 = int_to_ptr.vmem [resolvable:$true] %s22_s19 }
   0x4   :  { %p3316_p1 = scmp.lt.u32.totalorder %s3312_s22, %s4694_s2 }
   0x6   :  { %p3318_p2 = pnand %p3316_p1, %p3313_p0 }
   0x8   :  { %3321 = shalt.err (!%p3318_p2)
}
   0x9   :  { %s3322_s27 = scalar_lea.vmem %s23_s19, 2048  ;;  %p3327_p4 = scmp.lt.s32.totalorder %s23_s19, %s23_s19 }
   0xa   :  { %p3323_p3 = scmp.ne.s32.totalorder %s23_s19, %s3322_s27  ;;  %p3328_p5 = scmp.lt.s32.totalorder %s3322_s27, %s3322_s27 }
   0xc   :  { %p3329_p6 = por %p3328_p5, %p3327_p4 }
   0xe   :  { %p3330_p7 = pnand %p3329_p6, %p3323_p3 }
  0x10   :  { %3333 = shalt.err (!%p3330_p7)
}
  0x11   :  { %s3385_s28 = smov 256   ;;  %s3386_s29 = smov 16  }
  0x12   :  { %28 = dma.hbm_to_vmem [thread:$0]  %s4694_s2, 2048, %s23_s19, [#allocation4], %s3385_s28, %s3385_s28, %s3386_s29  }
  0x13   :  { %s3387_s7 = smov [#allocation6]   ;;  %s3334_s11 = scalar_lea.hbm %s4695_s3, 4096 }
  0x14   :  { %s34_s8 = sshll.u32 %s3387_s7, 4  ;;  %p3335_p8 = scmp.ne.s32.totalorder %s4695_s3, %s3334_s11  ;;  %s35_s8 = int_to_ptr.vmem [resolvable:$true] %s34_s8 }
  0x15   :  { %p3338_p9 = scmp.lt.u32.totalorder %s3334_s11, %s4695_s3 }
  0x17   :  { %p3340_p10 = pnand %p3338_p9, %p3335_p8 }
  0x19   :  { %3343 = shalt.err (!%p3340_p10)
}
  0x1a   :  { %s3344_s16 = scalar_lea.vmem %s35_s8, 4096  ;;  %p3349_p12 = scmp.lt.s32.totalorder %s35_s8, %s35_s8 }
  0x1b   :  { %p3345_p11 = scmp.ne.s32.totalorder %s35_s8, %s3344_s16  ;;  %p3350_p13 = scmp.lt.s32.totalorder %s3344_s16, %s3344_s16 }
  0x1d   :  { %p3351_p0 = por %p3350_p13, %p3349_p12 }
  0x1f   :  { %p3352_p1 = pnand %p3351_p0, %p3345_p11 }
  0x21   :  { %3355 = shalt.err (!%p3352_p1)
}
  0x22   :  { %40 = dma.hbm_to_vmem [thread:$0]  %s4695_s3, 4096, %s35_s8, [#allocation7], %s3385_s28, %s3385_s28, %s3386_s29  }
  0x23   :  { %3378 = dma.done.wait [#allocation4], 2048  }
  0x24   :  { %3379 = vsyncadd [#allocation4], 4294965248 }
  0x25   :  { %3380 = dma.done.wait [#allocation7], 4096  }
  0x26   :  { %3381 = vsyncadd [#allocation7], 4294963200  ;;  %v4698_v0 = vmov 0   ;;  %v2912_v1 = vld [vmem:[#allocation3 + $0x4] ss:$16 sps:$4 sm:$0xff]   ;;  %vm224_vm0 = vcmask 523264  }
  0x27   :  { %281 = vmatprep.mubr.bf16.mxu0 %v4698_v0  ;;  %394 = vmatprep.mubr.bf16.mxu1 %v4698_v0  ;;  %v2914_v2 = vld [vmem:[#allocation3 + $0xc] ss:$16 sps:$4 sm:$0xff]   ;;  %v2916_v3 = vld [vmem:[#allocation3] ss:$16 sps:$4 sm:$0xff]   ;;  %v2917_v4 = vld [vmem:[#allocation3 + $0x8] ss:$16 sps:$4 sm:$0xff]  }
  0x28   :  { %2910 = vset.pattern.permute.xlu0 %v4698_v0  ;;  %2911 = vset.pattern.permute.xlu1 %v4698_v0  ;;  %v2918_v5 = vld [vmem:[#allocation3 + $0x24] ss:$16 sps:$4 sm:$0xff]   ;;  %v2920_v6 = vld [vmem:[#allocation3 + $0x2c] ss:$16 sps:$4 sm:$0xff]   ;;  %v2922_v7 = vld [vmem:[#allocation3 + $0x20] ss:$16 sps:$4 sm:$0xff]  }
  0x29   :  { %249 = vmatprep.subr.bf16.mxu0 %v2912_v1  ;;  %362 = vmatprep.subr.bf16.mxu1 %v2914_v2  ;;  %v2923_v8 = vld [vmem:[#allocation3 + $0x28] ss:$16 sps:$4 sm:$0xff]   ;;  %v2924_v9 = vld [vmem:[#allocation3 + $0x44] ss:$16 sps:$4 sm:$0xff]   ;;  %v2926_v10 = vld [vmem:[#allocation3 + $0x4c] ss:$16 sps:$4 sm:$0xff]  }
  0x2a   :  { %250 = vmatpush1.bf16.msra.mxu0 %v2916_v3  ;;  %363 = vmatpush1.bf16.msra.mxu1 %v2917_v4  ;;  %v2928_v11 = vld [vmem:[#allocation3 + $0x40] ss:$16 sps:$4 sm:$0xff]   ;;  %v2929_v12 = vld [vmem:[#allocation3 + $0x48] ss:$16 sps:$4 sm:$0xff]   ;;  %v2930_v13 = vld [vmem:[#allocation3 + $0x64] ss:$16 sps:$4 sm:$0xff]   ;;  %v84_v3 = vlaneseq }
  0x2b   :  { %251 = vmatprep.subr.bf16.mxu0 %v2918_v5  ;;  %364 = vmatprep.subr.bf16.mxu1 %v2920_v6  ;;  %v2932_v14 = vld [vmem:[#allocation3 + $0x6c] ss:$16 sps:$4 sm:$0xff]   ;;  %v2934_v15 = vld [vmem:[#allocation3 + $0x60] ss:$16 sps:$4 sm:$0xff]   ;;  %v2935_v16 = vld [vmem:[#allocation3 + $0x68] ss:$16 sps:$4 sm:$0xff]  }
  0x2c   :  { %v3448_v17 = vld [vmem:[#allocation6 + $0x4] ss:$16 sps:$4 sm:$0xff]   ;;  %v3453_v19 = vld [vmem:[#allocation6] ss:$16 sps:$4 sm:$0xff]   ;;  %v3455_v20 = vld [vmem:[#allocation6 + $0xc] ss:$16 sps:$4 sm:$0xff]  }
  0x2d   :  { %v2936_v18 = vld [vmem:[%s4692_s0] sm:$0xff]   ;;  %v3461_v22 = vld [vmem:[#allocation6 + $0x8] ss:$16 sps:$4 sm:$0xff]   ;;  %v3465_v23 = vld [vmem:[#allocation6 + $0x2c] ss:$16 sps:$4 sm:$0xff]   ;;  %v85_v4 = vshrl.u32 %v84_v3, 7 }
  0x2e   :  { %252 = vmatpush1.bf16.msra.mxu0 %v2922_v7  ;;  %365 = vmatpush1.bf16.msra.mxu1 %v2923_v8  ;;  %v3458_v21 = vld [vmem:[#allocation6 + $0x24] ss:$16 sps:$4 sm:$0xff]   ;;  %v3469_v24 = vld [vmem:[#allocation6 + $0x20] ss:$16 sps:$4 sm:$0xff]   ;;  %v3476_v26 = vld [vmem:[#allocation6 + $0x28] ss:$16 sps:$4 sm:$0xff]  }
  0x2f   :  { %253 = vmatprep.subr.bf16.mxu0 %v2924_v9  ;;  %366 = vmatprep.subr.bf16.mxu1 %v2926_v10  ;;  %v3473_v25 = vld [vmem:[#allocation6 + $0x44] ss:$16 sps:$4 sm:$0xff]   ;;  %v2940_v27 = vld [vmem:[%s4692_s0 + $0x8] sm:$0xff]   ;;  %v3483_v28 = vld [vmem:[#allocation6 + $0x40] ss:$16 sps:$4 sm:$0xff]   ;;  %v94_v5 = vsub.s32 2, %v85_v4 }
  0x30   :  { %v3486_v29 = vld [vmem:[#allocation6 + $0x64] ss:$16 sps:$4 sm:$0xff]   ;;  %v3488_v30 = vld [vmem:[#allocation6 + $0x4c] ss:$16 sps:$4 sm:$0xff]   ;;  %v3491_v31 = vld [vmem:[#allocation6 + $0x48] ss:$16 sps:$4 sm:$0xff]  }
  0x31   :  { %v3495_v32 = vld [vmem:[#allocation6 + $0x6c] ss:$16 sps:$4 sm:$0xff]   ;;  %v3500_v33 = vld [vmem:[#allocation6 + $0x60] ss:$16 sps:$4 sm:$0xff]   ;;  %v3503_v34 = vld [vmem:[#allocation6 + $0x84] ss:$16 sps:$4 sm:$0xff]  }
  0x32   :  { %254 = vmatpush1.bf16.msra.mxu0 %v2928_v11  ;;  %367 = vmatpush1.bf16.msra.mxu1 %v2929_v12  ;;  %v3507_v35 = vld [vmem:[#allocation6 + $0x68] ss:$16 sps:$4 sm:$0xff]   ;;  %v2946_v36 = vld [vmem:[%s4692_s0 + $0x10] sm:$0xff]   ;;  %v3516_v38 = vld [vmem:[#allocation6 + $0x8c] ss:$16 sps:$4 sm:$0xff]   ;;  %v98_v6 = vsub.s32 3, %v85_v4 }
  0x33   :  { %255 = vmatprep.subr.bf16.mxu0 %v2930_v13  ;;  %368 = vmatprep.subr.bf16.mxu1 %v2932_v14  ;;  %v3514_v37 = vld [vmem:[#allocation6 + $0x80] ss:$16 sps:$4 sm:$0xff]   ;;  %v3519_v39 = vld [vmem:[#allocation6 + $0xa4] ss:$16 sps:$4 sm:$0xff]   ;;  %v3522_v40 = vld [vmem:[#allocation6 + $0x88] ss:$16 sps:$4 sm:$0xff]  }
  0x34   :  { %v3526_v41 = vld [vmem:[#allocation6 + $0xac] ss:$16 sps:$4 sm:$0xff]   ;;  %v3531_v42 = vld [vmem:[#allocation6 + $0xa0] ss:$16 sps:$4 sm:$0xff]   ;;  %v3535_v43 = vld [vmem:[#allocation6 + $0xc4] ss:$16 sps:$4 sm:$0xff]  }
  0x35   :  { %v3538_v44 = vld [vmem:[#allocation6 + $0xa8] ss:$16 sps:$4 sm:$0xff]   ;;  %v3547_v46 = vld [vmem:[%s4693_s1] sm:$0xff]  ;;  %v3552_v48 = vld [vmem:[#allocation6 + $0xcc] ss:$16 sps:$4 sm:$0xff]   ;;  %v86_v7 = vsub.s32 0, %v85_v4 }
  0x36   :  { %256 = vmatpush1.bf16.msra.mxu0 %v2934_v15  ;;  %369 = vmatpush1.bf16.msra.mxu1 %v2935_v16  ;;  %v2953_v45 = vld [vmem:[%s4692_s0 + $0x18] sm:$0xff]   ;;  %v3550_v47 = vld [vmem:[#allocation6 + $0xc0] ss:$16 sps:$4 sm:$0xff]   ;;  %vm849_vm1 = vcmp.gt.s32.totalorder %v3547_v46, 0  ;;  %v3557_v49 = vld [vmem:[#allocation6 + $0xe4] ss:$16 sps:$4 sm:$0xff]  }
  0x37   :  { %739 = vmatprep.subr.bf16.mxu0 %v3448_v17  ;;  %780 = vmatprep.subr.bf16.mxu1 %v3455_v20  ;;  %v3559_v50 = vld [vmem:[#allocation6 + $0xc8] ss:$16 sps:$4 sm:$0xff]   ;;  %v3563_v51 = vld [vmem:[#allocation6 + $0xec] ss:$16 sps:$4 sm:$0xff]   ;;  %v850_v52 = vsel %vm849_vm1, 1, %v4698_v0  ;;  %v2960_v55 = vld [vmem:[%s4692_s0 + $0x20] sm:$0xff]  }
  0x38   :  { %v3570_v53 = vld [vmem:[#allocation6 + $0xe0] ss:$16 sps:$4 sm:$0xff]   ;;  %v3574_v54 = vld [vmem:[#allocation6 + $0xe8] ss:$16 sps:$4 sm:$0xff]   ;;  %852 = vperm.xlu0 %2910, %v850_v52   ;;  %vm975_vm2 = vcmp.gt.s32.totalorder %v3547_v46, 1  ;;  %vm1353_vm3 = vcmp.gt.s32.totalorder %v3547_v46, 4 }
  0x39   :  { %2802 = vmatmul.mubr.msk.bf16.vlgmr.msra.gmra.mrb[0].mxu0 %vm224_vm0, %v2936_v18  ;;  %2810 = vmatmul.mubr.msk.bf16.vlgmr.msra.gmra.mrb[0].mxu1 %vm224_vm0, %v2936_v18  ;;  %v976_v56 = vsel %vm975_vm2, 1, %v4698_v0  ;;  %v1354_v57 = vsel %vm1353_vm3, 1, %v4698_v0  ;;  %v2967_v58 = vld [vmem:[%s4692_s0 + $0x28] sm:$0xff]   ;;  %vm1605_vm4 = vcmp.gt.s32.totalorder %v3547_v46, 6  ;;  %vm1857_vm5 = vcmp.gt.s32.totalorder %v3547_v46, 8  ;;  %v2974_v61 = vld [vmem:[%s4692_s0 + $0x30] sm:$0xff]  }
  0x3a   :  { %740 = vmatpush1.bf16.msra.mxu0 %v3453_v19  ;;  %291 = vmatprep.mubr.bf16.mxu0 %v4698_v0  ;;  %v1606_v59 = vsel %vm1605_vm4, 1, %v4698_v0  ;;  %v1858_v60 = vsel %vm1857_vm5, 1, %v4698_v0  ;;  %vm2109_vm6 = vcmp.gt.s32.totalorder %v3547_v46, 10  ;;  %vm2361_vm7 = vcmp.gt.s32.totalorder %v3547_v46, 12  ;;  %v2982_v1 = vld [vmem:[%s4692_s0 + $0x38] sm:$0xff]  }
  0x3b   :  { %404 = vmatprep.mubr.bf16.mxu1 %v4698_v0  ;;  %741 = vmatprep.subr.bf16.mxu0 %v3458_v21  ;;  %v2110_v62 = vsel %vm2109_vm6, 1, %v4698_v0  ;;  %v2362_v63 = vsel %vm2361_vm7, 1, %v4698_v0  ;;  %vm2613_vm8 = vcmp.gt.s32.totalorder %v3547_v46, 14  ;;  %v82_v8 = vld [vmem:[%s4696_s4] sm:$0xf]  ;;  %v90_v9 = vsub.s32 1, %v85_v4 }
  0x3c   :  { %781 = vmatpush1.bf16.msra.mxu1 %v3461_v22  ;;  %978 = vperm.xlu0 %2910, %v976_v56   ;;  %v2614_v2 = vsel %vm2613_vm8, 1, %v4698_v0  ;;  %v3662_v10 = vrot.slane %v82_v8, %v94_v5  ;;  %v3668_v13 = vrot.slane %v82_v8, %v98_v6  ;;  %v3670_v14 = vrot.slane %v82_v8, %v86_v7  ;;  %s3389_s4 = smov [#allocation8]  }
  0x3d   :  { %782 = vmatprep.subr.bf16.mxu1 %v3465_v23  ;;  %v3676_v18 = vrot.slane %v82_v8, %v90_v9  ;;  %vm1101_vm11 = vcmp.gt.s32.totalorder %v3547_v46, 2  ;;  %vm1227_vm12 = vcmp.gt.s32.totalorder %v3547_v46, 3  ;;  %vm1479_vm13 = vcmp.gt.s32.totalorder %v3547_v46, 5  ;;  %s2753_s10 = sshll.u32 %s3389_s4, 4  ;;  %s2754_s10 = int_to_ptr.vmem [resolvable:$true] %s2753_s10 }
  0x3e   :  { %742 = vmatpush1.bf16.msra.mxu0 %v3469_v24  ;;  %vm1731_vm14 = vcmp.gt.s32.totalorder %v3547_v46, 7  ;;  %vm1983_vm15 = vcmp.gt.s32.totalorder %v3547_v46, 9  ;;  %vm2487_vm1 = vcmp.gt.s32.totalorder %v3547_v46, 13  ;;  %vm2739_vm2 = vcmp.gt.s32.totalorder %v3547_v46, 15  ;;  %s3356_s11 = scalar_lea.vmem %s2754_s10, 128  ;;  %p3361_p3 = scmp.lt.s32.totalorder %s2754_s10, %s2754_s10 }
  0x3f   :  { %743 = vmatprep.subr.bf16.mxu0 %v3473_v25  ;;  %p3357_p2 = scmp.ne.s32.totalorder %s2754_s10, %s3356_s11  ;;  %p3362_p4 = scmp.lt.s32.totalorder %s3356_s11, %s3356_s11 }
  0x40   :  { %783 = vmatpush1.bf16.msra.mxu1 %v3476_v26  ;;  %1356 = vperm.xlu0 %2910, %v1354_v57  }
  0x41   :  { %2803 = vmatmul.mubr.msk.bf16.gmra.mrb[4].mxu0 %vm224_vm0, %v2940_v27  ;;  %2811 = vmatmul.mubr.msk.bf16.gmra.mrb[4].mxu1 %vm224_vm0, %v2940_v27  ;;  %p3363_p5 = por %p3362_p4, %p3361_p3 }
  0x42   :  { %301 = vmatprep.mubr.bf16.mxu0 %v4698_v0  ;;  %414 = vmatprep.mubr.bf16.mxu1 %v4698_v0 }
  0x43   :  { %744 = vmatpush1.bf16.msra.mxu0 %v3483_v28  ;;  %784 = vmatprep.subr.bf16.mxu1 %v3488_v30  ;;  %p3364_p6 = pnand %p3363_p5, %p3357_p2 }
  0x44   :  { %745 = vmatprep.subr.bf16.mxu0 %v3486_v29  ;;  %785 = vmatpush1.bf16.msra.mxu1 %v3491_v31 }
  0x45   :  { %786 = vmatprep.subr.bf16.mxu1 %v3495_v32  ;;  %1608 = vperm.xlu0 %2910, %v1606_v59  }
  0x47   :  { %746 = vmatpush1.bf16.msra.mxu0 %v3500_v33 }
  0x48   :  { %747 = vmatprep.subr.bf16.mxu0 %v3503_v34  ;;  %787 = vmatpush1.bf16.msra.mxu1 %v3507_v35 }
  0x49   :  { %2804 = vmatmul.mubr.msk.bf16.gmra.mrb[8].mxu0 %vm224_vm0, %v2946_v36  ;;  %2812 = vmatmul.mubr.msk.bf16.gmra.mrb[8].mxu1 %vm224_vm0, %v2946_v36 }
  0x4a   :  { %311 = vmatprep.mubr.bf16.mxu0 %v4698_v0  ;;  %424 = vmatprep.mubr.bf16.mxu1 %v4698_v0 }
  0x4b   :  { %748 = vmatpush1.bf16.msra.mxu0 %v3514_v37  ;;  %788 = vmatprep.subr.bf16.mxu1 %v3516_v38 }
  0x4c   :  { %749 = vmatprep.subr.bf16.mxu0 %v3519_v39  ;;  %789 = vmatpush1.bf16.msra.mxu1 %v3522_v40 }
  0x4d   :  { %790 = vmatprep.subr.bf16.mxu1 %v3526_v41  ;;  %1860 = vperm.xlu0 %2910, %v1858_v60  }
  0x4f   :  { %750 = vmatpush1.bf16.msra.mxu0 %v3531_v42 }
  0x50   :  { %751 = vmatprep.subr.bf16.mxu0 %v3535_v43  ;;  %791 = vmatpush1.bf16.msra.mxu1 %v3538_v44 }
  0x51   :  { %2805 = vmatmul.mubr.msk.bf16.gmra.mrb[12].mxu0 %vm224_vm0, %v2953_v45  ;;  %2813 = vmatmul.mubr.msk.bf16.gmra.mrb[12].mxu1 %vm224_vm0, %v2953_v45 }
  0x52   :  { %321 = vmatprep.mubr.bf16.mxu0 %v4698_v0  ;;  %434 = vmatprep.mubr.bf16.mxu1 %v4698_v0 }
  0x53   :  { %752 = vmatpush1.bf16.msra.mxu0 %v3550_v47  ;;  %792 = vmatprep.subr.bf16.mxu1 %v3552_v48 }
  0x54   :  { %753 = vmatprep.subr.bf16.mxu0 %v3557_v49  ;;  %793 = vmatpush1.bf16.msra.mxu1 %v3559_v50 }
  0x55   :  { %794 = vmatprep.subr.bf16.mxu1 %v3563_v51  ;;  %2112 = vperm.xlu0 %2910, %v2110_v62  }
  0x57   :  { %754 = vmatpush1.bf16.msra.mxu0 %v3570_v53 }
  0x58   :  { %795 = vmatpush1.bf16.msra.mxu1 %v3574_v54  ;;  %865 = vmatprep.subr.bf16.mxu0 %v3448_v17 }
  0x59   :  { %2806 = vmatmul.mubr.msk.bf16.gmra.mrb[16].mxu0 %vm224_vm0, %v2960_v55  ;;  %2814 = vmatmul.mubr.msk.bf16.gmra.mrb[16].mxu1 %vm224_vm0, %v2960_v55 }
  0x5a   :  { %331 = vmatprep.mubr.bf16.mxu0 %v4698_v0  ;;  %444 = vmatprep.mubr.bf16.mxu1 %v4698_v0 }
  0x5b   :  { %906 = vmatprep.subr.bf16.mxu1 %v3455_v20  ;;  %2364 = vperm.xlu0 %2910, %v2362_v63  }
  0x5f   :  { %2616 = vperm.xlu0 %2910, %v2614_v2  }
  0x61   :  { %2807 = vmatmul.mubr.msk.bf16.gmra.mrb[20].mxu0 %vm224_vm0, %v2967_v58  ;;  %2815 = vmatmul.mubr.msk.bf16.gmra.mrb[20].mxu1 %vm224_vm0, %v2967_v58 }
  0x62   :  { %341 = vmatprep.mubr.bf16.mxu0 %v4698_v0  ;;  %454 = vmatprep.mubr.bf16.mxu1 %v4698_v0 }
  0x69   :  { %2808 = vmatmul.mubr.msk.bf16.gmra.mrb[24].mxu0 %vm224_vm0, %v2974_v61  ;;  %2816 = vmatmul.mubr.msk.bf16.gmra.mrb[24].mxu1 %vm224_vm0, %v2974_v61 }
  0x6a   :  { %351 = vmatprep.mubr.bf16.mxu0 %v4698_v0  ;;  %464 = vmatprep.mubr.bf16.mxu1 %v4698_v0 }
  0x71   :  { %2809 = vmatmul.mubr.msk.bf16.gmra.mrb[28].mxu0 %vm224_vm0, %v2982_v1  ;;  %2817 = vmatmul.mubr.msk.bf16.gmra.mrb[28].mxu1 %vm224_vm0, %v2982_v1  ;;  %vm2235_vm0 = vcmp.gt.s32.totalorder %v3547_v46, 11 }
  0x72   :  { %771 = vmatprep.mubr.bf16.mxu0 %v4698_v0  ;;  %812 = vmatprep.mubr.bf16.mxu1 %v4698_v0 }
  0x79   :  { %772 = vmatmul.mubr.bf16.vlgmr.msra.gmra.mrb[32].mxu0 %v4698_v0  ;;  %813 = vmatmul.mubr.bf16.vlgmr.msra.gmra.mrb[32].mxu1 %v4698_v0 }
  0x7a   :  { %866 = vmatpush1.bf16.msra.mxu0 %v3453_v19  ;;  %907 = vmatpush1.bf16.msra.mxu1 %v3461_v22 }
  0x7b   :  { %867 = vmatprep.subr.bf16.mxu0 %v3458_v21  ;;  %908 = vmatprep.subr.bf16.mxu1 %v3465_v23 }
  0x7c   :  { %897 = vmatprep.mubr.bf16.mxu0 %v4698_v0  ;;  %938 = vmatprep.mubr.bf16.mxu1 %v4698_v0 }
  0x7e   :  { %868 = vmatpush1.bf16.msra.mxu0 %v3469_v24  ;;  %909 = vmatpush1.bf16.msra.mxu1 %v3476_v26 }
  0x7f   :  { %869 = vmatprep.subr.bf16.mxu0 %v3473_v25  ;;  %910 = vmatprep.subr.bf16.mxu1 %v3488_v30 }
  0x82   :  { %870 = vmatpush1.bf16.msra.mxu0 %v3483_v28  ;;  %911 = vmatpush1.bf16.msra.mxu1 %v3491_v31 }
  0x83   :  { %871 = vmatprep.subr.bf16.mxu0 %v3486_v29  ;;  %912 = vmatprep.subr.bf16.mxu1 %v3495_v32 }
  0x86   :  { %872 = vmatpush1.bf16.msra.mxu0 %v3500_v33  ;;  %913 = vmatpush1.bf16.msra.mxu1 %v3507_v35 }
  0x87   :  { %873 = vmatprep.subr.bf16.mxu0 %v3503_v34  ;;  %914 = vmatprep.subr.bf16.mxu1 %v3516_v38 }
  0x8a   :  { %874 = vmatpush1.bf16.msra.mxu0 %v3514_v37  ;;  %915 = vmatpush1.bf16.msra.mxu1 %v3522_v40 }
  0x8b   :  { %875 = vmatprep.subr.bf16.mxu0 %v3519_v39  ;;  %916 = vmatprep.subr.bf16.mxu1 %v3526_v41 }
  0x8e   :  { %876 = vmatpush1.bf16.msra.mxu0 %v3531_v42  ;;  %917 = vmatpush1.bf16.msra.mxu1 %v3538_v44 }
  0x8f   :  { %877 = vmatprep.subr.bf16.mxu0 %v3535_v43  ;;  %918 = vmatprep.subr.bf16.mxu1 %v3552_v48 }
  0x92   :  { %878 = vmatpush1.bf16.msra.mxu0 %v3550_v47  ;;  %919 = vmatpush1.bf16.msra.mxu1 %v3559_v50 }
  0x93   :  { %879 = vmatprep.subr.bf16.mxu0 %v3557_v49  ;;  %920 = vmatprep.subr.bf16.mxu1 %v3563_v51 }
  0x96   :  { %880 = vmatpush1.bf16.msra.mxu0 %v3570_v53  ;;  %921 = vmatpush1.bf16.msra.mxu1 %v3574_v54 }
  0x97   :  { %991 = vmatprep.subr.bf16.mxu0 %v3448_v17  ;;  %1032 = vmatprep.subr.bf16.mxu1 %v3455_v20 }
 0x10c   :  { %v3664_v11 = vpop.f32.mrb[0].mxu0  ;;  %v3666_v12 = vpop.f32.mrb[0].mxu1 }
 0x10d   :  { %v3672_v15 = vpop.f32.mrb[1].mxu0  ;;  %v3674_v16 = vpop.f32.mrb[1].mxu1 }
 0x10e   :  { %v287_v27 = vpop.f32.mrb[2].mxu0  ;;  %v400_v36 = vpop.f32.mrb[2].mxu1 }
 0x10f   :  { %v3679_v45 = vadd.f32 %v287_v27, %v3670_v14  ;;  %v289_v52 = vpop.f32.mrb[3].mxu0  ;;  %v3682_v55 = vadd.f32 %v400_v36, %v3662_v10  ;;  %v402_v56 = vpop.f32.mrb[3].mxu1 }
 0x110   :  { %v3685_v57 = vadd.f32 %v289_v52, %v3676_v18  ;;  %v3688_v58 = vadd.f32 %v402_v56, %v3668_v13 }
 0x114   :  { %v293_v59 = vpop.f32.mrb[4].mxu0  ;;  %v406_v60 = vpop.f32.mrb[4].mxu1 }
 0x115   :  { %v3691_v61 = vadd.f32 %v293_v59, %v3670_v14  ;;  %v295_v62 = vpop.f32.mrb[5].mxu0  ;;  %v3694_v63 = vadd.f32 %v406_v60, %v3662_v10  ;;  %v408_v1 = vpop.f32.mrb[5].mxu1 }
 0x116   :  { %v3697_v2 = vadd.f32 %v295_v62, %v3676_v18  ;;  %v297_v3 = vpop.f32.mrb[6].mxu0  ;;  %v3700_v4 = vadd.f32 %v408_v1, %v3668_v13  ;;  %v410_v5 = vpop.f32.mrb[6].mxu1 }
 0x117   :  { %v3703_v6 = vadd.f32 %v297_v3, %v3670_v14  ;;  %v299_v7 = vpop.f32.mrb[7].mxu0  ;;  %v3706_v8 = vadd.f32 %v410_v5, %v3662_v10  ;;  %v412_v9 = vpop.f32.mrb[7].mxu1 }
 0x118   :  { %v3709_v27 = vadd.f32 %v299_v7, %v3676_v18  ;;  %v3712_v36 = vadd.f32 %v412_v9, %v3668_v13 }
 0x119   :  { %4700 = vst [vmem:[#allocation12_spill] sm:$0xff] %v3703_v6  ;;  %4701 = vst [vmem:[#allocation13_spill] sm:$0xff] %v3706_v8 }
 0x11a   :  { %4702 = vst [vmem:[#allocation14_spill] sm:$0xff] %v3709_v27  ;;  %4703 = vst [vmem:[#allocation15_spill] sm:$0xff] %v3712_v36 }
 0x11c   :  { %v303_v52 = vpop.f32.mrb[8].mxu0  ;;  %v416_v56 = vpop.f32.mrb[8].mxu1 }
 0x11d   :  { %v3715_v59 = vadd.f32 %v303_v52, %v3670_v14  ;;  %v305_v60 = vpop.f32.mrb[9].mxu0  ;;  %v3718_v62 = vadd.f32 %v416_v56, %v3662_v10  ;;  %v418_v1 = vpop.f32.mrb[9].mxu1 }
 0x11e   :  { %v3721_v3 = vadd.f32 %v305_v60, %v3676_v18  ;;  %v307_v5 = vpop.f32.mrb[10].mxu0  ;;  %v3724_v7 = vadd.f32 %v418_v1, %v3668_v13  ;;  %v420_v0 = vpop.f32.mrb[10].mxu1 }
 0x11f   :  { %4704 = vst [vmem:[#allocation16_spill] sm:$0xff] %v3715_v59  ;;  %4705 = vst [vmem:[#allocation17_spill] sm:$0xff] %v3718_v62  ;;  %v3727_v9 = vadd.f32 %v307_v5, %v3670_v14  ;;  %v309_v36 = vpop.f32.mrb[11].mxu0  ;;  %v3730_v52 = vadd.f32 %v420_v0, %v3662_v10  ;;  %v422_v59 = vpop.f32.mrb[11].mxu1 }
 0x120   :  { %4706 = vst [vmem:[#allocation18_spill] sm:$0xff] %v3721_v3  ;;  %4707 = vst [vmem:[#allocation19_spill] sm:$0xff] %v3724_v7  ;;  %v3733_v56 = vadd.f32 %v309_v36, %v3676_v18  ;;  %v3736_v62 = vadd.f32 %v422_v59, %v3668_v13 }
 0x121   :  { %4708 = vst [vmem:[#allocation20_spill] sm:$0xff] %v3727_v9  ;;  %4709 = vst [vmem:[#allocation21_spill] sm:$0xff] %v3730_v52 }
 0x122   :  { %4710 = vst [vmem:[#allocation22_spill] sm:$0xff] %v3733_v56  ;;  %4711 = vst [vmem:[#allocation23_spill] sm:$0xff] %v3736_v62 }
 0x124   :  { %v313_v60 = vpop.f32.mrb[12].mxu0  ;;  %v426_v3 = vpop.f32.mrb[12].mxu1 }
 0x125   :  { %v3739_v1 = vadd.f32 %v313_v60, %v3670_v14  ;;  %v315_v7 = vpop.f32.mrb[13].mxu0  ;;  %v3742_v5 = vadd.f32 %v426_v3, %v3662_v10  ;;  %v428_v9 = vpop.f32.mrb[13].mxu1 }
 0x126   :  { %v3745_v0 = vadd.f32 %v315_v7, %v3676_v18  ;;  %v317_v52 = vpop.f32.mrb[14].mxu0  ;;  %v3748_v36 = vadd.f32 %v428_v9, %v3668_v13  ;;  %v430_v56 = vpop.f32.mrb[14].mxu1 }
 0x127   :  { %4712 = vst [vmem:[#allocation24_spill] sm:$0xff] %v3739_v1  ;;  %4713 = vst [vmem:[#allocation25_spill] sm:$0xff] %v3742_v5  ;;  %v3751_v59 = vadd.f32 %v317_v52, %v3670_v14  ;;  %v319_v62 = vpop.f32.mrb[15].mxu0  ;;  %v3754_v60 = vadd.f32 %v430_v56, %v3662_v10  ;;  %v432_v1 = vpop.f32.mrb[15].mxu1 }
 0x128   :  { %4714 = vst [vmem:[#allocation26_spill] sm:$0xff] %v3745_v0  ;;  %4715 = vst [vmem:[#allocation27_spill] sm:$0xff] %v3748_v36  ;;  %v3757_v3 = vadd.f32 %v319_v62, %v3676_v18  ;;  %v3760_v5 = vadd.f32 %v432_v1, %v3668_v13 }
 0x129   :  { %4716 = vst [vmem:[#allocation28_spill] sm:$0xff] %v3751_v59  ;;  %4717 = vst [vmem:[#allocation29_spill] sm:$0xff] %v3754_v60 }
 0x12a   :  { %4718 = vst [vmem:[#allocation30_spill] sm:$0xff] %v3757_v3  ;;  %4719 = vst [vmem:[#allocation31_spill] sm:$0xff] %v3760_v5 }
 0x12c   :  { %v323_v7 = vpop.f32.mrb[16].mxu0  ;;  %v436_v0 = vpop.f32.mrb[16].mxu1 }
 0x12d   :  { %v3763_v9 = vadd.f32 %v323_v7, %v3670_v14  ;;  %v325_v36 = vpop.f32.mrb[17].mxu0  ;;  %v3766_v52 = vadd.f32 %v436_v0, %v3662_v10  ;;  %v438_v59 = vpop.f32.mrb[17].mxu1 }
 0x12e   :  { %v3769_v56 = vadd.f32 %v325_v36, %v3676_v18  ;;  %v327_v60 = vpop.f32.mrb[18].mxu0  ;;  %v3772_v62 = vadd.f32 %v438_v59, %v3668_v13  ;;  %v440_v3 = vpop.f32.mrb[18].mxu1 }
 0x12f   :  { %4720 = vst [vmem:[#allocation32_spill] sm:$0xff] %v3763_v9  ;;  %4721 = vst [vmem:[#allocation33_spill] sm:$0xff] %v3766_v52  ;;  %v3775_v1 = vadd.f32 %v327_v60, %v3670_v14  ;;  %v329_v5 = vpop.f32.mrb[19].mxu0  ;;  %v3778_v7 = vadd.f32 %v440_v3, %v3662_v10  ;;  %v442_v9 = vpop.f32.mrb[19].mxu1 }
 0x130   :  { %4722 = vst [vmem:[#allocation34_spill] sm:$0xff] %v3769_v56  ;;  %4723 = vst [vmem:[#allocation35_spill] sm:$0xff] %v3772_v62  ;;  %v3781_v0 = vadd.f32 %v329_v5, %v3676_v18  ;;  %v3784_v52 = vadd.f32 %v442_v9, %v3668_v13 }
 0x131   :  { %4724 = vst [vmem:[#allocation36_spill] sm:$0xff] %v3775_v1  ;;  %4725 = vst [vmem:[#allocation37_spill] sm:$0xff] %v3778_v7 }
 0x132   :  { %4726 = vst [vmem:[#allocation38_spill] sm:$0xff] %v3781_v0  ;;  %4727 = vst [vmem:[#allocation39_spill] sm:$0xff] %v3784_v52 }
 0x134   :  { %v333_v36 = vpop.f32.mrb[20].mxu0  ;;  %v446_v56 = vpop.f32.mrb[20].mxu1 }
 0x135   :  { %v3787_v59 = vadd.f32 %v333_v36, %v3670_v14  ;;  %v335_v62 = vpop.f32.mrb[21].mxu0  ;;  %v3790_v60 = vadd.f32 %v446_v56, %v3662_v10  ;;  %v448_v1 = vpop.f32.mrb[21].mxu1 }
 0x136   :  { %v3793_v3 = vadd.f32 %v335_v62, %v3676_v18  ;;  %v337_v7 = vpop.f32.mrb[22].mxu0  ;;  %v3796_v5 = vadd.f32 %v448_v1, %v3668_v13  ;;  %v450_v0 = vpop.f32.mrb[22].mxu1 }
 0x137   :  { %4728 = vst [vmem:[#allocation40_spill] sm:$0xff] %v3787_v59  ;;  %4729 = vst [vmem:[#allocation41_spill] sm:$0xff] %v3790_v60  ;;  %v3799_v9 = vadd.f32 %v337_v7, %v3670_v14  ;;  %v339_v52 = vpop.f32.mrb[23].mxu0  ;;  %v3802_v36 = vadd.f32 %v450_v0, %v3662_v10  ;;  %v452_v59 = vpop.f32.mrb[23].mxu1 }
 0x138   :  { %4730 = vst [vmem:[#allocation42_spill] sm:$0xff] %v3793_v3  ;;  %4731 = vst [vmem:[#allocation43_spill] sm:$0xff] %v3796_v5  ;;  %v3805_v56 = vadd.f32 %v339_v52, %v3676_v18  ;;  %v3808_v60 = vadd.f32 %v452_v59, %v3668_v13 }
 0x139   :  { %4732 = vst [vmem:[#allocation44_spill] sm:$0xff] %v3799_v9  ;;  %4733 = vst [vmem:[#allocation45_spill] sm:$0xff] %v3802_v36 }
 0x13a   :  { %4734 = vst [vmem:[#allocation46_spill] sm:$0xff] %v3805_v56  ;;  %4735 = vst [vmem:[#allocation47_spill] sm:$0xff] %v3808_v60 }
 0x13c   :  { %v343_v62 = vpop.f32.mrb[24].mxu0  ;;  %v456_v3 = vpop.f32.mrb[24].mxu1 }
 0x13d   :  { %v3811_v1 = vadd.f32 %v343_v62, %v3670_v14  ;;  %v345_v5 = vpop.f32.mrb[25].mxu0  ;;  %v3814_v7 = vadd.f32 %v456_v3, %v3662_v10  ;;  %v458_v9 = vpop.f32.mrb[25].mxu1 }
 0x13e   :  { %v3817_v0 = vadd.f32 %v345_v5, %v3676_v18  ;;  %v347_v36 = vpop.f32.mrb[26].mxu0  ;;  %v3820_v52 = vadd.f32 %v458_v9, %v3668_v13  ;;  %v460_v56 = vpop.f32.mrb[26].mxu1 }
 0x13f   :  { %4736 = vst [vmem:[#allocation48_spill] sm:$0xff] %v3811_v1  ;;  %4737 = vst [vmem:[#allocation49_spill] sm:$0xff] %v3814_v7  ;;  %v3823_v59 = vadd.f32 %v347_v36, %v3670_v14  ;;  %v349_v60 = vpop.f32.mrb[27].mxu0  ;;  %v3826_v62 = vadd.f32 %v460_v56, %v3662_v10  ;;  %v462_v1 = vpop.f32.mrb[27].mxu1 }
 0x140   :  { %4738 = vst [vmem:[#allocation50_spill] sm:$0xff] %v3817_v0  ;;  %4739 = vst [vmem:[#allocation51_spill] sm:$0xff] %v3820_v52  ;;  %v3829_v3 = vadd.f32 %v349_v60, %v3676_v18  ;;  %v3832_v7 = vadd.f32 %v462_v1, %v3668_v13 }
 0x141   :  { %4740 = vst [vmem:[#allocation52_spill] sm:$0xff] %v3823_v59  ;;  %4741 = vst [vmem:[#allocation53_spill] sm:$0xff] %v3826_v62 }
 0x142   :  { %4742 = vst [vmem:[#allocation54_spill] sm:$0xff] %v3829_v3  ;;  %4743 = vst [vmem:[#allocation55_spill] sm:$0xff] %v3832_v7 }
 0x144   :  { %v353_v5 = vpop.f32.mrb[28].mxu0  ;;  %v466_v0 = vpop.f32.mrb[28].mxu1 }
 0x145   :  { %v3835_v9 = vadd.f32 %v353_v5, %v3670_v14  ;;  %v355_v52 = vpop.f32.mrb[29].mxu0  ;;  %v3838_v36 = vadd.f32 %v466_v0, %v3662_v10  ;;  %v468_v59 = vpop.f32.mrb[29].mxu1 }
 0x146   :  { %v3841_v56 = vadd.f32 %v355_v52, %v3676_v18  ;;  %v357_v62 = vpop.f32.mrb[30].mxu0  ;;  %v3844_v60 = vadd.f32 %v468_v59, %v3668_v13  ;;  %v470_v3 = vpop.f32.mrb[30].mxu1  ;;  %v284_v52 = vadd.f32 %v3664_v11, %v3670_v14  ;;  %v397_v59 = vadd.f32 %v3666_v12, %v3662_v10 }
 0x147   :  { %4744 = vst [vmem:[#allocation56_spill] sm:$0xff] %v3835_v9  ;;  %4745 = vst [vmem:[#allocation57_spill] sm:$0xff] %v3838_v36  ;;  %v3847_v1 = vadd.f32 %v357_v62, %v3670_v14  ;;  %v359_v7 = vpop.f32.mrb[31].mxu0  ;;  %v3850_v5 = vadd.f32 %v470_v3, %v3662_v10  ;;  %v472_v9 = vpop.f32.mrb[31].mxu1  ;;  %v286_v62 = vadd.f32 %v3672_v15, %v3676_v18 }
 0x148   :  { %4746 = vst [vmem:[#allocation58_spill] sm:$0xff] %v3841_v56  ;;  %4747 = vst [vmem:[#allocation59_spill] sm:$0xff] %v3844_v60  ;;  %v3853_v0 = vadd.f32 %v359_v7, %v3676_v18  ;;  %v3856_v36 = vadd.f32 %v472_v9, %v3668_v13  ;;  %v399_v3 = vadd.f32 %v3674_v16, %v3668_v13 }
 0x149   :  { %4748 = vst [vmem:[#allocation60_spill] sm:$0xff] %v3847_v1  ;;  %4749 = vst [vmem:[#allocation61_spill] sm:$0xff] %v3850_v5 }
 0x14a   :  { %4750 = vst [vmem:[#allocation62_spill] sm:$0xff] %v3853_v0  ;;  %4751 = vst [vmem:[#allocation63_spill] sm:$0xff] %v3856_v36 }
 0x14c   :  { %v773_v5 = vpop.f32.mrb[32].mxu0  ;;  %v814_v1 = vpop.f32.mrb[32].mxu1 }
 0x14d   :  { %v821_v60 = vadd.f32 %v773_v5, %v284_v52  ;;  %v823_v7 = vadd.f32 %v814_v1, %v397_v59  ;;  %v775_v0 = vpop.f32.mrb[33].mxu0  ;;  %v816_v56 = vpop.f32.mrb[33].mxu1 }
 0x14e   :  { %v822_v9 = vadd.f32 %v775_v0, %v286_v62  ;;  %v824_v36 = vadd.f32 %v816_v56, %v399_v3  ;;  %v777_v27 = vpop.f32.mrb[34].mxu0  ;;  %v818_v8 = vpop.f32.mrb[34].mxu1 }
 0x14f   :  { %v2850_v11 = vmul.f32 -1.442695, %v821_v60  ;;  %v778_v14 = vpop.f32.mrb[35].mxu0  ;;  %v819_v6 = vpop.f32.mrb[35].mxu1 }
 0x150   :  { %v2851_v10 = vmul.f32 -1.442695, %v822_v9  ;;  %v2852_v12 = vmul.f32 -1.442695, %v824_v36  ;;  %v3869_v59 = vpop.permute.xlu0 %852 }
 0x151   :  { %2992 = vpow2.f32 %v2850_v11  ;;  %vm854_vm9 = vcmp.eq.s32.totalorder %v3869_v59, 1 }
 0x152   :  { %2994 = vpow2.f32 %v2851_v10  ;;  %vm2853_vm10 = vmpackc.low %vm854_vm9, %vm854_vm9 }
 0x153   :  { %2996 = vpow2.f32 %v2852_v12 }
 0x154   :  { %2998 = vtanh.f32 %v823_v7  ;;  %v4752_v7 = vmov 0  }
 0x155   :  { %v1102_v9 = vsel %vm1101_vm11, 1, %v4752_v7  ;;  %v1228_v11 = vsel %vm1227_vm12, 1, %v4752_v7  ;;  %v1480_v14 = vsel %vm1479_vm13, 1, %v4752_v7  ;;  %v2236_v10 = vsel %vm2235_vm0, 1, %v4752_v7 }
 0x156   :  { %1104 = vperm.xlu1 %2911, %v1102_v9   ;;  %v2488_v12 = vsel %vm2487_vm1, 1, %v4752_v7 }
 0x15a   :  { %1230 = vperm.xlu1 %2911, %v1228_v11  }
 0x15b   :  { %v2993_v15 = vpop.eup %2992 }
 0x15c   :  { %v2995_v18 = vpop.eup %2994  ;;  %v828_v13 = vadd.f32 1.0, %v2993_v15  ;;  %v2740_v15 = vsel %vm2739_vm2, 1, %v4752_v7 }
 0x15d   :  { %v834_v16 = vadd.f32 1.0, %v2995_v18  ;;  %v2997_v1 = vpop.eup %2996 }
 0x15e   :  { %3000 = vrcp.f32 %v828_v13  ;;  %v2999_v5 = vpop.eup %2998  ;;  %v841_v8 = vadd.f32 1.0, %v2997_v1  ;;  %1482 = vperm.xlu1 %2911, %v1480_v14  }
 0x15f   :  { %3002 = vrcp.f32 %v834_v16 }
 0x160   :  { %3004 = vrcp.f32 %v841_v8 }
 0x168   :  { %v3001_v56 = vpop.eup %3000 }
 0x169   :  { %v3003_v27 = vpop.eup %3002  ;;  %v845_v60 = vmul.f32 %v3001_v56, %v2999_v5 }
 0x16a   :  { %v844_v0 = vmul.f32 0.0, %v3003_v27  ;;  %v3005_v36 = vpop.eup %3004 }
 0x16c   :  { %v3866_v6 = vadd.f32 %v845_v60, %v844_v0 }
 0x16e   :  { %3006 = vtanh.f32 %v3866_v6 }
 0x178   :  { %v3007_v52 = vpop.eup %3006 }
 0x179   :  { %v3871_v62 = vmul.f32 %v3007_v52, %v3005_v36 }
 0x17b   :  { %v2854_v3 = vpack.c.bf16 %v3871_v62, %v3871_v62 }
 0x17d   :  { %2855 = vmatmul.mubr.msk.bf16.vlgmr.msra.gmra.mrb[36].mxu0 %vm2853_vm10, %v2854_v3  ;;  %2858 = vmatmul.mubr.msk.bf16.vlgmr.msra.gmra.mrb[36].mxu1 %vm2853_vm10, %v2854_v3 }
 0x17e   :  { %992 = vmatpush1.bf16.msra.mxu0 %v3453_v19  ;;  %1033 = vmatpush1.bf16.msra.mxu1 %v3461_v22 }
 0x17f   :  { %993 = vmatprep.subr.bf16.mxu0 %v3458_v21  ;;  %1034 = vmatprep.subr.bf16.mxu1 %v3465_v23 }
 0x180   :  { %1023 = vmatprep.mubr.bf16.mxu0 %v4752_v7  ;;  %1064 = vmatprep.mubr.bf16.mxu1 %v4752_v7 }
 0x182   :  { %994 = vmatpush1.bf16.msra.mxu0 %v3469_v24  ;;  %1035 = vmatpush1.bf16.msra.mxu1 %v3476_v26 }
 0x183   :  { %995 = vmatprep.subr.bf16.mxu0 %v3473_v25  ;;  %1036 = vmatprep.subr.bf16.mxu1 %v3488_v30 }
 0x186   :  { %996 = vmatpush1.bf16.msra.mxu0 %v3483_v28  ;;  %1037 = vmatpush1.bf16.msra.mxu1 %v3491_v31 }
 0x187   :  { %997 = vmatprep.subr.bf16.mxu0 %v3486_v29  ;;  %1038 = vmatprep.subr.bf16.mxu1 %v3495_v32 }
 0x18a   :  { %998 = vmatpush1.bf16.msra.mxu0 %v3500_v33  ;;  %1039 = vmatpush1.bf16.msra.mxu1 %v3507_v35 }
 0x18b   :  { %999 = vmatprep.subr.bf16.mxu0 %v3503_v34  ;;  %1040 = vmatprep.subr.bf16.mxu1 %v3516_v38 }
 0x18e   :  { %1000 = vmatpush1.bf16.msra.mxu0 %v3514_v37  ;;  %1041 = vmatpush1.bf16.msra.mxu1 %v3522_v40 }
 0x18f   :  { %1001 = vmatprep.subr.bf16.mxu0 %v3519_v39  ;;  %1042 = vmatprep.subr.bf16.mxu1 %v3526_v41 }
 0x192   :  { %1002 = vmatpush1.bf16.msra.mxu0 %v3531_v42  ;;  %1043 = vmatpush1.bf16.msra.mxu1 %v3538_v44 }
 0x193   :  { %1003 = vmatprep.subr.bf16.mxu0 %v3535_v43  ;;  %1044 = vmatprep.subr.bf16.mxu1 %v3552_v48 }
 0x196   :  { %1004 = vmatpush1.bf16.msra.mxu0 %v3550_v47  ;;  %1045 = vmatpush1.bf16.msra.mxu1 %v3559_v50 }
 0x197   :  { %1005 = vmatprep.subr.bf16.mxu0 %v3557_v49  ;;  %1046 = vmatprep.subr.bf16.mxu1 %v3563_v51 }
 0x19a   :  { %1006 = vmatpush1.bf16.msra.mxu0 %v3570_v53  ;;  %1047 = vmatpush1.bf16.msra.mxu1 %v3574_v54 }
 0x19b   :  { %1117 = vmatprep.subr.bf16.mxu0 %v3448_v17  ;;  %1158 = vmatprep.subr.bf16.mxu1 %v3455_v20  ;;  %v1732_v17 = vsel %vm1731_vm14, 1, %v4752_v7  ;;  %v1984_v20 = vsel %vm1983_vm15, 1, %v4752_v7 }
 0x19c   :  { %1734 = vperm.xlu1 %2911, %v1732_v17  }
 0x1a0   :  { %1986 = vperm.xlu1 %2911, %v1984_v20  }
 0x1a4   :  { %2238 = vperm.xlu1 %2911, %v2236_v10   ;;  %v856_v10 = vsel %vm854_vm9, %v3866_v6, 0.0 }
 0x1a8   :  { %2490 = vperm.xlu1 %2911, %v2488_v12  }
 0x1ac   :  { %2742 = vperm.xlu1 %2911, %v2740_v15  }
 0x250   :  { %v899_v18 = vpop.f32.mrb[36].mxu0  ;;  %v940_v13 = vpop.f32.mrb[36].mxu1 }
 0x251   :  { %v947_v16 = vadd.f32 %v899_v18, %v3679_v45  ;;  %v949_v1 = vadd.f32 %v940_v13, %v3682_v55  ;;  %v901_v5 = vpop.f32.mrb[37].mxu0  ;;  %v942_v56 = vpop.f32.mrb[37].mxu1 }
 0x252   :  { %v948_v27 = vadd.f32 %v901_v5, %v3685_v57  ;;  %v950_v8 = vadd.f32 %v942_v56, %v3688_v58  ;;  %v903_v60 = vpop.f32.mrb[38].mxu0  ;;  %v944_v0 = vpop.f32.mrb[38].mxu1 }
 0x253   :  { %v2859_v36 = vmul.f32 -1.442695, %v947_v16  ;;  %v904_v46 = vpop.f32.mrb[39].mxu0  ;;  %v945_v52 = vpop.f32.mrb[39].mxu1 }
 0x254   :  { %v2860_v3 = vmul.f32 -1.442695, %v948_v27  ;;  %v2861_v9 = vmul.f32 -1.442695, %v950_v8  ;;  %v979_v13 = vpop.permute.xlu0 %978  ;;  %v855_v8 = vsel %vm854_vm9, %v3871_v62, 0.0 }
 0x255   :  { %3008 = vpow2.f32 %v2859_v36  ;;  %vm980_vm3 = vcmp.eq.s32.totalorder %v979_v13, 1  ;;  %v1105_v36 = vpop.permute.xlu1 %1104  ;;  %v4022_v13 = vld [vmem:[#allocation6 + $0x40] ss:$16 sps:$4 sm:$0xff]  }
 0x256   :  { %3010 = vpow2.f32 %v2860_v3  ;;  %vm1106_vm4 = vcmp.eq.s32.totalorder %v1105_v36, 1 }
 0x257   :  { %3012 = vpow2.f32 %v2861_v9 }
 0x258   :  { %3014 = vtanh.f32 %v949_v1 }
 0x25f   :  { %v3009_v11 = vpop.eup %3008 }
 0x260   :  { %v3011_v14 = vpop.eup %3010  ;;  %v954_v45 = vadd.f32 1.0, %v3009_v11 }
 0x261   :  { %v960_v55 = vadd.f32 1.0, %v3011_v14  ;;  %v3013_v57 = vpop.eup %3012 }
 0x262   :  { %3016 = vrcp.f32 %v954_v45  ;;  %v3015_v17 = vpop.eup %3014  ;;  %v967_v15 = vadd.f32 1.0, %v3013_v57  ;;  %v3996_v57 = vld [vmem:[#allocation6] ss:$16 sps:$4 sm:$0xff]  }
 0x263   :  { %3018 = vrcp.f32 %v960_v55 }
 0x264   :  { %3020 = vrcp.f32 %v967_v15  ;;  %v4016_v15 = vld [vmem:[#allocation6 + $0x44] ss:$16 sps:$4 sm:$0xff]  }
 0x26c   :  { %v3017_v58 = vpop.eup %3016 }
 0x26d   :  { %v3019_v20 = vpop.eup %3018  ;;  %v971_v12 = vmul.f32 %v3017_v58, %v3015_v17  ;;  %v3999_v17 = vld [vmem:[#allocation6 + $0x8] ss:$16 sps:$4 sm:$0xff]   ;;  %v4002_v58 = vld [vmem:[#allocation6 + $0x24] ss:$16 sps:$4 sm:$0xff]  }
 0x26e   :  { %v970_v18 = vmul.f32 %v3019_v20, %v856_v10  ;;  %v3021_v5 = vpop.eup %3020  ;;  %v4005_v20 = vld [vmem:[#allocation6 + $0x2c] ss:$16 sps:$4 sm:$0xff]  }
 0x270   :  { %v972_v16 = vadd.f32 %v971_v12, %v970_v18  ;;  %v4013_v12 = vld [vmem:[#allocation6 + $0x28] ss:$16 sps:$4 sm:$0xff]   ;;  %v4019_v18 = vld [vmem:[#allocation6 + $0x4c] ss:$16 sps:$4 sm:$0xff]  }
 0x272   :  { %3022 = vtanh.f32 %v972_v16  ;;  %v3936_v1 = vsel %vm980_vm3, %v972_v16, %v856_v10  ;;  %v4010_v10 = vld [vmem:[#allocation6 + $0x20] ss:$16 sps:$4 sm:$0xff]   ;;  %v4025_v16 = vld [vmem:[#allocation6 + $0x48] ss:$16 sps:$4 sm:$0xff]  }
 0x27c   :  { %v3023_v56 = vpop.eup %3022 }
 0x27d   :  { %v974_v27 = vmul.f32 %v3023_v56, %v3021_v5  ;;  %v4031_v5 = vld [vmem:[#allocation6 + $0x6c] ss:$16 sps:$4 sm:$0xff]   ;;  %v4034_v56 = vld [vmem:[#allocation6 + $0x60] ss:$16 sps:$4 sm:$0xff]  }
 0x27f   :  { %v3941_v60 = vsel %vm980_vm3, %v974_v27, %v855_v8  ;;  %v4037_v27 = vld [vmem:[#allocation6 + $0x68] ss:$16 sps:$4 sm:$0xff]   ;;  %v4040_v8 = vld [vmem:[#allocation6 + $0x84] ss:$16 sps:$4 sm:$0xff]  }
 0x280   :  { %v990_v6 = vpack.c.bf16 %v3941_v60, %v3941_v60 }
 0x282   :  { %1024 = vmatmul.mubr.bf16.vlgmr.msra.gmra.mrb[40].mxu0 %v990_v6  ;;  %1065 = vmatmul.mubr.bf16.vlgmr.msra.gmra.mrb[40].mxu1 %v990_v6  ;;  %v4046_v6 = vld [vmem:[#allocation6 + $0x80] ss:$16 sps:$4 sm:$0xff]  }
 0x283   :  { %1118 = vmatpush1.bf16.msra.mxu0 %v3453_v19  ;;  %1159 = vmatpush1.bf16.msra.mxu1 %v3461_v22  ;;  %v3977_v19 = vld [vmem:[#allocation6 + $0x4] ss:$16 sps:$4 sm:$0xff]  }
 0x284   :  { %1119 = vmatprep.subr.bf16.mxu0 %v3458_v21  ;;  %1160 = vmatprep.subr.bf16.mxu1 %v3465_v23  ;;  %v3980_v21 = vld [vmem:[#allocation6 + $0xc] ss:$16 sps:$4 sm:$0xff]  }
 0x285   :  { %1149 = vmatprep.mubr.bf16.mxu0 %v4752_v7  ;;  %1190 = vmatprep.mubr.bf16.mxu1 %v4752_v7 }
 0x287   :  { %1120 = vmatpush1.bf16.msra.mxu0 %v3469_v24  ;;  %1161 = vmatpush1.bf16.msra.mxu1 %v3476_v26 }
 0x288   :  { %1121 = vmatprep.subr.bf16.mxu0 %v3473_v25  ;;  %1162 = vmatprep.subr.bf16.mxu1 %v3488_v30 }
 0x28b   :  { %1122 = vmatpush1.bf16.msra.mxu0 %v3483_v28  ;;  %1163 = vmatpush1.bf16.msra.mxu1 %v3491_v31 }
 0x28c   :  { %1123 = vmatprep.subr.bf16.mxu0 %v3486_v29  ;;  %1164 = vmatprep.subr.bf16.mxu1 %v3495_v32 }
 0x28f   :  { %1124 = vmatpush1.bf16.msra.mxu0 %v3500_v33  ;;  %1165 = vmatpush1.bf16.msra.mxu1 %v3507_v35 }
 0x290   :  { %1125 = vmatprep.subr.bf16.mxu0 %v3503_v34  ;;  %1166 = vmatprep.subr.bf16.mxu1 %v3516_v38 }
 0x293   :  { %1126 = vmatpush1.bf16.msra.mxu0 %v3514_v37  ;;  %1167 = vmatpush1.bf16.msra.mxu1 %v3522_v40 }
 0x294   :  { %1127 = vmatprep.subr.bf16.mxu0 %v3519_v39  ;;  %1168 = vmatprep.subr.bf16.mxu1 %v3526_v41 }
 0x297   :  { %1128 = vmatpush1.bf16.msra.mxu0 %v3531_v42  ;;  %1169 = vmatpush1.bf16.msra.mxu1 %v3538_v44 }
 0x298   :  { %1129 = vmatprep.subr.bf16.mxu0 %v3535_v43  ;;  %1170 = vmatprep.subr.bf16.mxu1 %v3552_v48 }
 0x29b   :  { %1130 = vmatpush1.bf16.msra.mxu0 %v3550_v47  ;;  %1171 = vmatpush1.bf16.msra.mxu1 %v3559_v50 }
 0x29c   :  { %1131 = vmatprep.subr.bf16.mxu0 %v3557_v49  ;;  %1172 = vmatprep.subr.bf16.mxu1 %v3563_v51 }
 0x29f   :  { %1132 = vmatpush1.bf16.msra.mxu0 %v3570_v53  ;;  %1173 = vmatpush1.bf16.msra.mxu1 %v3574_v54 }
 0x2a0   :  { %1243 = vmatprep.subr.bf16.mxu0 %v3977_v19  ;;  %1284 = vmatprep.subr.bf16.mxu1 %v3980_v21 }
 0x355   :  { %v1025_v22 = vpop.f32.mrb[40].mxu0  ;;  %v1066_v23 = vpop.f32.mrb[40].mxu1 }
 0x356   :  { %v1073_v24 = vadd.f32 %v1025_v22, %v3691_v61  ;;  %v1075_v25 = vadd.f32 %v1066_v23, %v3694_v63  ;;  %v1027_v26 = vpop.f32.mrb[41].mxu0  ;;  %v1068_v28 = vpop.f32.mrb[41].mxu1  ;;  %v4049_v22 = vld [vmem:[#allocation6 + $0x88] ss:$16 sps:$4 sm:$0xff]   ;;  %v4052_v23 = vld [vmem:[#allocation6 + $0xa4] ss:$16 sps:$4 sm:$0xff]  }
 0x357   :  { %v1074_v29 = vadd.f32 %v1027_v26, %v3697_v2  ;;  %v1076_v30 = vadd.f32 %v1068_v28, %v3700_v4  ;;  %v1029_v31 = vpop.f32.mrb[42].mxu0  ;;  %v1070_v32 = vpop.f32.mrb[42].mxu1  ;;  %v4755_v28 = vld [vmem:[#allocation14_spill] sm:$0xff] }
 0x358   :  { %v2862_v33 = vmul.f32 -1.442695, %v1073_v24  ;;  %v1030_v34 = vpop.f32.mrb[43].mxu0  ;;  %v1071_v35 = vpop.f32.mrb[43].mxu1  ;;  %v4055_v24 = vld [vmem:[#allocation6 + $0xac] ss:$16 sps:$4 sm:$0xff]  }
 0x359   :  { %v2863_v37 = vmul.f32 -1.442695, %v1074_v29  ;;  %v2864_v38 = vmul.f32 -1.442695, %v1076_v30  ;;  %v4756_v29 = vld [vmem:[#allocation15_spill] sm:$0xff] }
 0x35a   :  { %3024 = vpow2.f32 %v2862_v33 }
 0x35b   :  { %3026 = vpow2.f32 %v2863_v37 }
 0x35c   :  { %3028 = vpow2.f32 %v2864_v38 }
 0x35d   :  { %3030 = vtanh.f32 %v1075_v25  ;;  %v4754_v25 = vld [vmem:[#allocation13_spill] sm:$0xff] }
 0x364   :  { %v3025_v39 = vpop.eup %3024 }
 0x365   :  { %v3027_v40 = vpop.eup %3026  ;;  %v1080_v41 = vadd.f32 1.0, %v3025_v39 }
 0x366   :  { %v1086_v61 = vadd.f32 1.0, %v3027_v40  ;;  %v3029_v63 = vpop.eup %3028 }
 0x367   :  { %3032 = vrcp.f32 %v1080_v41  ;;  %v3031_v2 = vpop.eup %3030  ;;  %v1093_v62 = vadd.f32 1.0, %v3029_v63 }
 0x368   :  { %3034 = vrcp.f32 %v1086_v61 }
 0x369   :  { %3036 = vrcp.f32 %v1093_v62  ;;  %v1231_v62 = vpop.permute.xlu1 %1230 }
 0x36a   :  { %vm1232_vm5 = vcmp.eq.s32.totalorder %v1231_v62, 1 }
 0x371   :  { %v3033_v4 = vpop.eup %3032 }
 0x372   :  { %v3035_v59 = vpop.eup %3034  ;;  %v1097_v0 = vmul.f32 %v3033_v4, %v3031_v2 }
 0x373   :  { %v1096_v46 = vmul.f32 %v3035_v59, %v3936_v1  ;;  %v3037_v9 = vpop.eup %3036 }
 0x375   :  { %v1098_v52 = vadd.f32 %v1097_v0, %v1096_v46 }
 0x377   :  { %3038 = vtanh.f32 %v1098_v52  ;;  %v3989_v3 = vsel %vm1106_vm4, %v1098_v52, %v3936_v1  ;;  %v4028_v1 = vld [vmem:[#allocation6 + $0x64] ss:$16 sps:$4 sm:$0xff]  }
 0x381   :  { %v3039_v11 = vpop.eup %3038 }
 0x382   :  { %v1100_v14 = vmul.f32 %v3039_v11, %v3037_v9 }
 0x384   :  { %v3992_v45 = vsel %vm1106_vm4, %v1100_v14, %v3941_v60  ;;  %v4043_v60 = vld [vmem:[#allocation6 + $0x8c] ss:$16 sps:$4 sm:$0xff]  }
 0x385   :  { %v1116_v55 = vpack.c.bf16 %v3992_v45, %v3992_v45 }
 0x387   :  { %1150 = vmatmul.mubr.bf16.vlgmr.msra.gmra.mrb[44].mxu0 %v1116_v55  ;;  %1191 = vmatmul.mubr.bf16.vlgmr.msra.gmra.mrb[44].mxu1 %v1116_v55  ;;  %v4111_v55 = vld [vmem:[#allocation6 + $0xc4] ss:$16 sps:$4 sm:$0xff]  }
 0x388   :  { %1244 = vmatpush1.bf16.msra.mxu0 %v3996_v57  ;;  %1285 = vmatpush1.bf16.msra.mxu1 %v3999_v17 }
 0x389   :  { %1245 = vmatprep.subr.bf16.mxu0 %v4002_v58  ;;  %1286 = vmatprep.subr.bf16.mxu1 %v4005_v20 }
 0x38a   :  { %1275 = vmatprep.mubr.bf16.mxu0 %v4752_v7  ;;  %1316 = vmatprep.mubr.bf16.mxu1 %v4752_v7 }
 0x38c   :  { %1246 = vmatpush1.bf16.msra.mxu0 %v4010_v10  ;;  %1287 = vmatpush1.bf16.msra.mxu1 %v4013_v12 }
 0x38d   :  { %1247 = vmatprep.subr.bf16.mxu0 %v4016_v15  ;;  %1288 = vmatprep.subr.bf16.mxu1 %v4019_v18 }
 0x390   :  { %1248 = vmatpush1.bf16.msra.mxu0 %v4022_v13  ;;  %1289 = vmatpush1.bf16.msra.mxu1 %v4025_v16 }
 0x391   :  { %1249 = vmatprep.subr.bf16.mxu0 %v4028_v1  ;;  %1290 = vmatprep.subr.bf16.mxu1 %v4031_v5 }
 0x394   :  { %1250 = vmatpush1.bf16.msra.mxu0 %v4034_v56  ;;  %1291 = vmatpush1.bf16.msra.mxu1 %v4037_v27 }
 0x395   :  { %1251 = vmatprep.subr.bf16.mxu0 %v4040_v8  ;;  %1292 = vmatprep.subr.bf16.mxu1 %v4043_v60 }
 0x398   :  { %1252 = vmatpush1.bf16.msra.mxu0 %v4046_v6  ;;  %1293 = vmatpush1.bf16.msra.mxu1 %v4049_v22 }
 0x399   :  { %1253 = vmatprep.subr.bf16.mxu0 %v4052_v23  ;;  %1294 = vmatprep.subr.bf16.mxu1 %v4055_v24 }
 0x39c   :  { %1254 = vmatpush1.bf16.msra.mxu0 %v3531_v42  ;;  %1295 = vmatpush1.bf16.msra.mxu1 %v3538_v44  ;;  %v4753_v44 = vld [vmem:[#allocation12_spill] sm:$0xff] }
 0x39d   :  { %1255 = vmatprep.subr.bf16.mxu0 %v3535_v43  ;;  %1296 = vmatprep.subr.bf16.mxu1 %v3552_v48 }
 0x3a0   :  { %1256 = vmatpush1.bf16.msra.mxu0 %v3550_v47  ;;  %1297 = vmatpush1.bf16.msra.mxu1 %v3559_v50 }
 0x3a1   :  { %1257 = vmatprep.subr.bf16.mxu0 %v3557_v49  ;;  %1298 = vmatprep.subr.bf16.mxu1 %v3563_v51 }
 0x3a4   :  { %1258 = vmatpush1.bf16.msra.mxu0 %v3570_v53  ;;  %1299 = vmatpush1.bf16.msra.mxu1 %v3574_v54 }
 0x3a5   :  { %1369 = vmatprep.subr.bf16.mxu0 %v3977_v19  ;;  %1410 = vmatprep.subr.bf16.mxu1 %v3980_v21 }
 0x45a   :  { %v1151_v42 = vpop.f32.mrb[44].mxu0  ;;  %v1192_v43 = vpop.f32.mrb[44].mxu1 }
 0x45b   :  { %v1199_v48 = vadd.f32 %v1151_v42, %v4753_v44  ;;  %v1201_v47 = vadd.f32 %v1192_v43, %v4754_v25  ;;  %v1153_v26 = vpop.f32.mrb[45].mxu0  ;;  %v1194_v50 = vpop.f32.mrb[45].mxu1  ;;  %v4114_v42 = vld [vmem:[#allocation6 + $0xcc] ss:$16 sps:$4 sm:$0xff]   ;;  %v4117_v43 = vld [vmem:[#allocation6 + $0xc0] ss:$16 sps:$4 sm:$0xff]  }
 0x45c   :  { %v1200_v49 = vadd.f32 %v1153_v26, %v4755_v28  ;;  %v1202_v51 = vadd.f32 %v1194_v50, %v4756_v29  ;;  %v1155_v30 = vpop.f32.mrb[46].mxu0  ;;  %v1196_v53 = vpop.f32.mrb[46].mxu1  ;;  %v4120_v44 = vld [vmem:[#allocation6 + $0xc8] ss:$16 sps:$4 sm:$0xff]   ;;  %v4126_v25 = vld [vmem:[#allocation6 + $0xec] ss:$16 sps:$4 sm:$0xff]  }
 0x45d   :  { %v2865_v31 = vmul.f32 -1.442695, %v1199_v48  ;;  %v1156_v54 = vpop.f32.mrb[47].mxu0  ;;  %v1197_v32 = vpop.f32.mrb[47].mxu1  ;;  %v4123_v48 = vld [vmem:[#allocation6 + $0xe4] ss:$16 sps:$4 sm:$0xff]  }
 0x45e   :  { %v2866_v33 = vmul.f32 -1.442695, %v1200_v49  ;;  %v2867_v34 = vmul.f32 -1.442695, %v1202_v51  ;;  %v4132_v26 = vld [vmem:[#allocation6 + $0xe8] ss:$16 sps:$4 sm:$0xff]  }
 0x45f   :  { %3040 = vpow2.f32 %v2865_v31  ;;  %v4757_v49 = vld [vmem:[#allocation16_spill] sm:$0xff]  ;;  %v4758_v51 = vld [vmem:[#allocation17_spill] sm:$0xff]  ;;  %v4759_v54 = vld [vmem:[#allocation18_spill] sm:$0xff] }
 0x460   :  { %3042 = vpow2.f32 %v2866_v33  ;;  %v4760_v33 = vld [vmem:[#allocation19_spill] sm:$0xff] }
 0x461   :  { %3044 = vpow2.f32 %v2867_v34 }
 0x462   :  { %3046 = vtanh.f32 %v1201_v47  ;;  %v4129_v47 = vld [vmem:[#allocation6 + $0xe0] ss:$16 sps:$4 sm:$0xff]  }
 0x469   :  { %v3041_v35 = vpop.eup %3040 }
 0x46a   :  { %v3043_v37 = vpop.eup %3042  ;;  %v1206_v38 = vadd.f32 1.0, %v3041_v35 }
 0x46b   :  { %v1212_v39 = vadd.f32 1.0, %v3043_v37  ;;  %v3045_v40 = vpop.eup %3044 }
 0x46c   :  { %3048 = vrcp.f32 %v1206_v38  ;;  %v3047_v41 = vpop.eup %3046  ;;  %v1219_v4 = vadd.f32 1.0, %v3045_v40 }
 0x46d   :  { %3050 = vrcp.f32 %v1212_v39 }
 0x46e   :  { %3052 = vrcp.f32 %v1219_v4 }
 0x476   :  { %v3049_v61 = vpop.eup %3048 }
 0x477   :  { %v3051_v63 = vpop.eup %3050  ;;  %v1223_v2 = vmul.f32 %v3049_v61, %v3047_v41 }
 0x478   :  { %v1222_v59 = vmul.f32 %v3051_v63, %v3989_v3  ;;  %v3053_v46 = vpop.eup %3052 }
 0x47a   :  { %v1224_v0 = vadd.f32 %v1223_v2, %v1222_v59 }
 0x47c   :  { %3054 = vtanh.f32 %v1224_v0  ;;  %v4076_v36 = vsel %vm1232_vm5, %v1224_v0, %v3989_v3  ;;  %v4105_v3 = vld [vmem:[#allocation6 + $0xa0] ss:$16 sps:$4 sm:$0xff]  }
 0x486   :  { %v3055_v52 = vpop.eup %3054 }
 0x487   :  { %v1226_v9 = vmul.f32 %v3055_v52, %v3053_v46 }
 0x489   :  { %v4079_v11 = vsel %vm1232_vm5, %v1226_v9, %v3992_v45  ;;  %v4108_v45 = vld [vmem:[#allocation6 + $0xa8] ss:$16 sps:$4 sm:$0xff]  }
 0x48a   :  { %v1242_v14 = vpack.c.bf16 %v4079_v11, %v4079_v11 }
 0x48c   :  { %1276 = vmatmul.mubr.bf16.vlgmr.msra.gmra.mrb[48].mxu0 %v1242_v14  ;;  %1317 = vmatmul.mubr.bf16.vlgmr.msra.gmra.mrb[48].mxu1 %v1242_v14 }
 0x48d   :  { %1370 = vmatpush1.bf16.msra.mxu0 %v3996_v57  ;;  %1411 = vmatpush1.bf16.msra.mxu1 %v3999_v17 }
 0x48e   :  { %1371 = vmatprep.subr.bf16.mxu0 %v4002_v58  ;;  %1412 = vmatprep.subr.bf16.mxu1 %v4005_v20 }
 0x48f   :  { %1401 = vmatprep.mubr.bf16.mxu0 %v4752_v7  ;;  %1442 = vmatprep.mubr.bf16.mxu1 %v4752_v7 }
 0x491   :  { %1372 = vmatpush1.bf16.msra.mxu0 %v4010_v10  ;;  %1413 = vmatpush1.bf16.msra.mxu1 %v4013_v12 }
 0x492   :  { %1373 = vmatprep.subr.bf16.mxu0 %v4016_v15  ;;  %1414 = vmatprep.subr.bf16.mxu1 %v4019_v18 }
 0x495   :  { %1374 = vmatpush1.bf16.msra.mxu0 %v4022_v13  ;;  %1415 = vmatpush1.bf16.msra.mxu1 %v4025_v16 }
 0x496   :  { %1375 = vmatprep.subr.bf16.mxu0 %v4028_v1  ;;  %1416 = vmatprep.subr.bf16.mxu1 %v4031_v5 }
 0x499   :  { %1376 = vmatpush1.bf16.msra.mxu0 %v4034_v56  ;;  %1417 = vmatpush1.bf16.msra.mxu1 %v4037_v27 }
 0x49a   :  { %1377 = vmatprep.subr.bf16.mxu0 %v4040_v8  ;;  %1418 = vmatprep.subr.bf16.mxu1 %v4043_v60 }
 0x49d   :  { %1378 = vmatpush1.bf16.msra.mxu0 %v4046_v6  ;;  %1419 = vmatpush1.bf16.msra.mxu1 %v4049_v22 }
 0x49e   :  { %1379 = vmatprep.subr.bf16.mxu0 %v4052_v23  ;;  %1420 = vmatprep.subr.bf16.mxu1 %v4055_v24 }
 0x4a1   :  { %1380 = vmatpush1.bf16.msra.mxu0 %v4105_v3  ;;  %1421 = vmatpush1.bf16.msra.mxu1 %v4108_v45 }
 0x4a2   :  { %1381 = vmatprep.subr.bf16.mxu0 %v4111_v55  ;;  %1422 = vmatprep.subr.bf16.mxu1 %v4114_v42 }
 0x4a5   :  { %1382 = vmatpush1.bf16.msra.mxu0 %v4117_v43  ;;  %1423 = vmatpush1.bf16.msra.mxu1 %v4120_v44 }
 0x4a6   :  { %1383 = vmatprep.subr.bf16.mxu0 %v4123_v48  ;;  %1424 = vmatprep.subr.bf16.mxu1 %v4126_v25 }
 0x4a9   :  { %1384 = vmatpush1.bf16.msra.mxu0 %v4129_v47  ;;  %1425 = vmatpush1.bf16.msra.mxu1 %v4132_v26 }
 0x4aa   :  { %1495 = vmatprep.subr.bf16.mxu0 %v3977_v19  ;;  %1536 = vmatprep.subr.bf16.mxu1 %v3980_v21 }
 0x55f   :  { %v1277_v50 = vpop.f32.mrb[48].mxu0  ;;  %v1318_v28 = vpop.f32.mrb[48].mxu1 }
 0x560   :  { %v1325_v29 = vadd.f32 %v1277_v50, %v4757_v49  ;;  %v1327_v30 = vadd.f32 %v1318_v28, %v4758_v51  ;;  %v1279_v53 = vpop.f32.mrb[49].mxu0  ;;  %v1320_v31 = vpop.f32.mrb[49].mxu1 }
 0x561   :  { %v1326_v32 = vadd.f32 %v1279_v53, %v4759_v54  ;;  %v1328_v34 = vadd.f32 %v1320_v31, %v4760_v33  ;;  %v1281_v35 = vpop.f32.mrb[50].mxu0  ;;  %v1322_v37 = vpop.f32.mrb[50].mxu1 }
 0x562   :  { %v2868_v38 = vmul.f32 -1.442695, %v1325_v29  ;;  %v1282_v39 = vpop.f32.mrb[51].mxu0  ;;  %v1323_v40 = vpop.f32.mrb[51].mxu1 }
 0x563   :  { %v2869_v41 = vmul.f32 -1.442695, %v1326_v32  ;;  %v2870_v61 = vmul.f32 -1.442695, %v1328_v34  ;;  %v1357_v28 = vpop.permute.xlu0 %1356  ;;  %v4761_v32 = vld [vmem:[#allocation20_spill] sm:$0xff]  ;;  %v4762_v34 = vld [vmem:[#allocation21_spill] sm:$0xff] }
 0x564   :  { %3056 = vpow2.f32 %v2868_v38  ;;  %vm1358_vm6 = vcmp.eq.s32.totalorder %v1357_v28, 1  ;;  %v4763_v39 = vld [vmem:[#allocation22_spill] sm:$0xff] }
 0x565   :  { %3058 = vpow2.f32 %v2869_v41  ;;  %v4764_v41 = vld [vmem:[#allocation23_spill] sm:$0xff] }
 0x566   :  { %3060 = vpow2.f32 %v2870_v61 }
 0x567   :  { %3062 = vtanh.f32 %v1327_v30 }
 0x56e   :  { %v3057_v63 = vpop.eup %3056 }
 0x56f   :  { %v3059_v2 = vpop.eup %3058  ;;  %v1332_v4 = vadd.f32 1.0, %v3057_v63 }
 0x570   :  { %v1338_v59 = vadd.f32 1.0, %v3059_v2  ;;  %v3061_v62 = vpop.eup %3060 }
 0x571   :  { %3064 = vrcp.f32 %v1332_v4  ;;  %v3063_v0 = vpop.eup %3062  ;;  %v1345_v14 = vadd.f32 1.0, %v3061_v62 }
 0x572   :  { %3066 = vrcp.f32 %v1338_v59 }
 0x573   :  { %3068 = vrcp.f32 %v1345_v14 }
 0x57b   :  { %v3065_v46 = vpop.eup %3064 }
 0x57c   :  { %v3067_v52 = vpop.eup %3066  ;;  %v1349_v9 = vmul.f32 %v3065_v46, %v3063_v0 }
 0x57d   :  { %v1348_v50 = vmul.f32 %v3067_v52, %v4076_v36  ;;  %v3069_v51 = vpop.eup %3068 }
 0x57f   :  { %v1350_v49 = vadd.f32 %v1349_v9, %v1348_v50 }
 0x581   :  { %3070 = vtanh.f32 %v1350_v49  ;;  %v4143_v29 = vsel %vm1358_vm6, %v1350_v49, %v4076_v36 }
 0x58b   :  { %v3071_v30 = vpop.eup %3070 }
 0x58c   :  { %v1352_v53 = vmul.f32 %v3071_v30, %v3069_v51 }
 0x58e   :  { %v4146_v31 = vsel %vm1358_vm6, %v1352_v53, %v4079_v11 }
 0x58f   :  { %v1368_v54 = vpack.c.bf16 %v4146_v31, %v4146_v31 }
 0x591   :  { %1402 = vmatmul.mubr.bf16.vlgmr.msra.gmra.mrb[52].mxu0 %v1368_v54  ;;  %1443 = vmatmul.mubr.bf16.vlgmr.msra.gmra.mrb[52].mxu1 %v1368_v54 }
 0x592   :  { %1496 = vmatpush1.bf16.msra.mxu0 %v3996_v57  ;;  %1537 = vmatpush1.bf16.msra.mxu1 %v3999_v17 }
 0x593   :  { %1497 = vmatprep.subr.bf16.mxu0 %v4002_v58  ;;  %1538 = vmatprep.subr.bf16.mxu1 %v4005_v20 }
 0x594   :  { %1527 = vmatprep.mubr.bf16.mxu0 %v4752_v7  ;;  %1568 = vmatprep.mubr.bf16.mxu1 %v4752_v7 }
 0x596   :  { %1498 = vmatpush1.bf16.msra.mxu0 %v4010_v10  ;;  %1539 = vmatpush1.bf16.msra.mxu1 %v4013_v12 }
 0x597   :  { %1499 = vmatprep.subr.bf16.mxu0 %v4016_v15  ;;  %1540 = vmatprep.subr.bf16.mxu1 %v4019_v18 }
 0x59a   :  { %1500 = vmatpush1.bf16.msra.mxu0 %v4022_v13  ;;  %1541 = vmatpush1.bf16.msra.mxu1 %v4025_v16 }
 0x59b   :  { %1501 = vmatprep.subr.bf16.mxu0 %v4028_v1  ;;  %1542 = vmatprep.subr.bf16.mxu1 %v4031_v5 }
 0x59e   :  { %1502 = vmatpush1.bf16.msra.mxu0 %v4034_v56  ;;  %1543 = vmatpush1.bf16.msra.mxu1 %v4037_v27 }
 0x59f   :  { %1503 = vmatprep.subr.bf16.mxu0 %v4040_v8  ;;  %1544 = vmatprep.subr.bf16.mxu1 %v4043_v60 }
 0x5a2   :  { %1504 = vmatpush1.bf16.msra.mxu0 %v4046_v6  ;;  %1545 = vmatpush1.bf16.msra.mxu1 %v4049_v22 }
 0x5a3   :  { %1505 = vmatprep.subr.bf16.mxu0 %v4052_v23  ;;  %1546 = vmatprep.subr.bf16.mxu1 %v4055_v24 }
 0x5a6   :  { %1506 = vmatpush1.bf16.msra.mxu0 %v4105_v3  ;;  %1547 = vmatpush1.bf16.msra.mxu1 %v4108_v45 }
 0x5a7   :  { %1507 = vmatprep.subr.bf16.mxu0 %v4111_v55  ;;  %1548 = vmatprep.subr.bf16.mxu1 %v4114_v42 }
 0x5aa   :  { %1508 = vmatpush1.bf16.msra.mxu0 %v4117_v43  ;;  %1549 = vmatpush1.bf16.msra.mxu1 %v4120_v44 }
 0x5ab   :  { %1509 = vmatprep.subr.bf16.mxu0 %v4123_v48  ;;  %1550 = vmatprep.subr.bf16.mxu1 %v4126_v25 }
 0x5ae   :  { %1510 = vmatpush1.bf16.msra.mxu0 %v4129_v47  ;;  %1551 = vmatpush1.bf16.msra.mxu1 %v4132_v26 }
 0x5af   :  { %1621 = vmatprep.subr.bf16.mxu0 %v3977_v19  ;;  %1662 = vmatprep.subr.bf16.mxu1 %v3980_v21 }
 0x664   :  { %v1403_v36 = vpop.f32.mrb[52].mxu0  ;;  %v1444_v11 = vpop.f32.mrb[52].mxu1 }
 0x665   :  { %v1451_v33 = vadd.f32 %v1403_v36, %v4761_v32  ;;  %v1453_v35 = vadd.f32 %v1444_v11, %v4762_v34  ;;  %v1405_v37 = vpop.f32.mrb[53].mxu0  ;;  %v1446_v38 = vpop.f32.mrb[53].mxu1 }
 0x666   :  { %v1452_v40 = vadd.f32 %v1405_v37, %v4763_v39  ;;  %v1454_v61 = vadd.f32 %v1446_v38, %v4764_v41  ;;  %v1407_v63 = vpop.f32.mrb[54].mxu0  ;;  %v1448_v2 = vpop.f32.mrb[54].mxu1 }
 0x667   :  { %v2871_v4 = vmul.f32 -1.442695, %v1451_v33  ;;  %v1408_v59 = vpop.f32.mrb[55].mxu0  ;;  %v1449_v62 = vpop.f32.mrb[55].mxu1 }
 0x668   :  { %v2872_v0 = vmul.f32 -1.442695, %v1452_v40  ;;  %v2873_v46 = vmul.f32 -1.442695, %v1454_v61  ;;  %v1483_v11 = vpop.permute.xlu1 %1482  ;;  %v4765_v40 = vld [vmem:[#allocation24_spill] sm:$0xff]  ;;  %v4766_v61 = vld [vmem:[#allocation25_spill] sm:$0xff] }
 0x669   :  { %3072 = vpow2.f32 %v2871_v4  ;;  %vm1484_vm7 = vcmp.eq.s32.totalorder %v1483_v11, 1  ;;  %v4767_v59 = vld [vmem:[#allocation26_spill] sm:$0xff] }
 0x66a   :  { %3074 = vpow2.f32 %v2872_v0  ;;  %v4768_v0 = vld [vmem:[#allocation27_spill] sm:$0xff] }
 0x66b   :  { %3076 = vpow2.f32 %v2873_v46 }
 0x66c   :  { %3078 = vtanh.f32 %v1453_v35 }
 0x673   :  { %v3073_v52 = vpop.eup %3072 }
 0x674   :  { %v3075_v9 = vpop.eup %3074  ;;  %v1458_v14 = vadd.f32 1.0, %v3073_v52 }
 0x675   :  { %v1464_v50 = vadd.f32 1.0, %v3075_v9  ;;  %v3077_v28 = vpop.eup %3076 }
 0x676   :  { %3080 = vrcp.f32 %v1458_v14  ;;  %v3079_v49 = vpop.eup %3078  ;;  %v1471_v54 = vadd.f32 1.0, %v3077_v28 }
 0x677   :  { %3082 = vrcp.f32 %v1464_v50 }
 0x678   :  { %3084 = vrcp.f32 %v1471_v54 }
 0x680   :  { %v3081_v51 = vpop.eup %3080 }
 0x681   :  { %v3083_v30 = vpop.eup %3082  ;;  %v1475_v53 = vmul.f32 %v3081_v51, %v3079_v49 }
 0x682   :  { %v1474_v36 = vmul.f32 %v3083_v30, %v4143_v29  ;;  %v3085_v34 = vpop.eup %3084 }
 0x684   :  { %v1476_v32 = vadd.f32 %v1475_v53, %v1474_v36 }
 0x686   :  { %3086 = vtanh.f32 %v1476_v32  ;;  %v4190_v33 = vsel %vm1484_vm7, %v1476_v32, %v4143_v29 }
 0x690   :  { %v3087_v35 = vpop.eup %3086 }
 0x691   :  { %v1478_v37 = vmul.f32 %v3087_v35, %v3085_v34 }
 0x693   :  { %v4193_v38 = vsel %vm1484_vm7, %v1478_v37, %v4146_v31 }
 0x694   :  { %v1494_v39 = vpack.c.bf16 %v4193_v38, %v4193_v38 }
 0x696   :  { %1528 = vmatmul.mubr.bf16.vlgmr.msra.gmra.mrb[56].mxu0 %v1494_v39  ;;  %1569 = vmatmul.mubr.bf16.vlgmr.msra.gmra.mrb[56].mxu1 %v1494_v39 }
 0x697   :  { %1622 = vmatpush1.bf16.msra.mxu0 %v3996_v57  ;;  %1663 = vmatpush1.bf16.msra.mxu1 %v3999_v17 }
 0x698   :  { %1623 = vmatprep.subr.bf16.mxu0 %v4002_v58  ;;  %1664 = vmatprep.subr.bf16.mxu1 %v4005_v20 }
 0x699   :  { %1653 = vmatprep.mubr.bf16.mxu0 %v4752_v7  ;;  %1694 = vmatprep.mubr.bf16.mxu1 %v4752_v7 }
 0x69b   :  { %1624 = vmatpush1.bf16.msra.mxu0 %v4010_v10  ;;  %1665 = vmatpush1.bf16.msra.mxu1 %v4013_v12 }
 0x69c   :  { %1625 = vmatprep.subr.bf16.mxu0 %v4016_v15  ;;  %1666 = vmatprep.subr.bf16.mxu1 %v4019_v18 }
 0x69f   :  { %1626 = vmatpush1.bf16.msra.mxu0 %v4022_v13  ;;  %1667 = vmatpush1.bf16.msra.mxu1 %v4025_v16 }
 0x6a0   :  { %1627 = vmatprep.subr.bf16.mxu0 %v4028_v1  ;;  %1668 = vmatprep.subr.bf16.mxu1 %v4031_v5 }
 0x6a3   :  { %1628 = vmatpush1.bf16.msra.mxu0 %v4034_v56  ;;  %1669 = vmatpush1.bf16.msra.mxu1 %v4037_v27 }
 0x6a4   :  { %1629 = vmatprep.subr.bf16.mxu0 %v4040_v8  ;;  %1670 = vmatprep.subr.bf16.mxu1 %v4043_v60 }
 0x6a7   :  { %1630 = vmatpush1.bf16.msra.mxu0 %v4046_v6  ;;  %1671 = vmatpush1.bf16.msra.mxu1 %v4049_v22 }
 0x6a8   :  { %1631 = vmatprep.subr.bf16.mxu0 %v4052_v23  ;;  %1672 = vmatprep.subr.bf16.mxu1 %v4055_v24 }
 0x6ab   :  { %1632 = vmatpush1.bf16.msra.mxu0 %v4105_v3  ;;  %1673 = vmatpush1.bf16.msra.mxu1 %v4108_v45 }
 0x6ac   :  { %1633 = vmatprep.subr.bf16.mxu0 %v4111_v55  ;;  %1674 = vmatprep.subr.bf16.mxu1 %v4114_v42 }
 0x6af   :  { %1634 = vmatpush1.bf16.msra.mxu0 %v4117_v43  ;;  %1675 = vmatpush1.bf16.msra.mxu1 %v4120_v44 }
 0x6b0   :  { %1635 = vmatprep.subr.bf16.mxu0 %v4123_v48  ;;  %1676 = vmatprep.subr.bf16.mxu1 %v4126_v25 }
 0x6b3   :  { %1636 = vmatpush1.bf16.msra.mxu0 %v4129_v47  ;;  %1677 = vmatpush1.bf16.msra.mxu1 %v4132_v26 }
 0x6b4   :  { %1747 = vmatprep.subr.bf16.mxu0 %v3977_v19  ;;  %1788 = vmatprep.subr.bf16.mxu1 %v3980_v21 }
 0x769   :  { %v1529_v29 = vpop.f32.mrb[56].mxu0  ;;  %v1570_v31 = vpop.f32.mrb[56].mxu1 }
 0x76a   :  { %v1577_v41 = vadd.f32 %v1529_v29, %v4765_v40  ;;  %v1579_v63 = vadd.f32 %v1570_v31, %v4766_v61  ;;  %v1531_v2 = vpop.f32.mrb[57].mxu0  ;;  %v1572_v4 = vpop.f32.mrb[57].mxu1 }
 0x76b   :  { %v1578_v62 = vadd.f32 %v1531_v2, %v4767_v59  ;;  %v1580_v46 = vadd.f32 %v1572_v4, %v4768_v0  ;;  %v1533_v52 = vpop.f32.mrb[58].mxu0  ;;  %v1574_v9 = vpop.f32.mrb[58].mxu1 }
 0x76c   :  { %v2874_v14 = vmul.f32 -1.442695, %v1577_v41  ;;  %v1534_v50 = vpop.f32.mrb[59].mxu0  ;;  %v1575_v28 = vpop.f32.mrb[59].mxu1 }
 0x76d   :  { %v2875_v49 = vmul.f32 -1.442695, %v1578_v62  ;;  %v2876_v51 = vmul.f32 -1.442695, %v1580_v46  ;;  %v1609_v31 = vpop.permute.xlu0 %1608  ;;  %v4769_v62 = vld [vmem:[#allocation28_spill] sm:$0xff]  ;;  %v4770_v46 = vld [vmem:[#allocation29_spill] sm:$0xff] }
 0x76e   :  { %3088 = vpow2.f32 %v2874_v14  ;;  %vm1610_vm8 = vcmp.eq.s32.totalorder %v1609_v31, 1  ;;  %v4771_v50 = vld [vmem:[#allocation30_spill] sm:$0xff] }
 0x76f   :  { %3090 = vpow2.f32 %v2875_v49  ;;  %v4772_v49 = vld [vmem:[#allocation31_spill] sm:$0xff] }
 0x770   :  { %3092 = vpow2.f32 %v2876_v51 }
 0x771   :  { %3094 = vtanh.f32 %v1579_v63 }
 0x778   :  { %v3089_v30 = vpop.eup %3088 }
 0x779   :  { %v3091_v53 = vpop.eup %3090  ;;  %v1584_v54 = vadd.f32 1.0, %v3089_v30 }
 0x77a   :  { %v1590_v36 = vadd.f32 1.0, %v3091_v53  ;;  %v3093_v11 = vpop.eup %3092 }
 0x77b   :  { %3096 = vrcp.f32 %v1584_v54  ;;  %v3095_v32 = vpop.eup %3094  ;;  %v1597_v39 = vadd.f32 1.0, %v3093_v11 }
 0x77c   :  { %3098 = vrcp.f32 %v1590_v36 }
 0x77d   :  { %3100 = vrcp.f32 %v1597_v39 }
 0x785   :  { %v3097_v34 = vpop.eup %3096 }
 0x786   :  { %v3099_v35 = vpop.eup %3098  ;;  %v1601_v37 = vmul.f32 %v3097_v34, %v3095_v32 }
 0x787   :  { %v1600_v29 = vmul.f32 %v3099_v35, %v4190_v33  ;;  %v3101_v61 = vpop.eup %3100 }
 0x789   :  { %v1602_v40 = vadd.f32 %v1601_v37, %v1600_v29 }
 0x78b   :  { %3102 = vtanh.f32 %v1602_v40  ;;  %v4237_v41 = vsel %vm1610_vm8, %v1602_v40, %v4190_v33 }
 0x795   :  { %v3103_v63 = vpop.eup %3102 }
 0x796   :  { %v1604_v2 = vmul.f32 %v3103_v63, %v3101_v61 }
 0x798   :  { %v4240_v4 = vsel %vm1610_vm8, %v1604_v2, %v4193_v38 }
 0x799   :  { %v1620_v59 = vpack.c.bf16 %v4240_v4, %v4240_v4 }
 0x79b   :  { %1654 = vmatmul.mubr.bf16.vlgmr.msra.gmra.mrb[60].mxu0 %v1620_v59  ;;  %1695 = vmatmul.mubr.bf16.vlgmr.msra.gmra.mrb[60].mxu1 %v1620_v59 }
 0x79c   :  { %1748 = vmatpush1.bf16.msra.mxu0 %v3996_v57  ;;  %1789 = vmatpush1.bf16.msra.mxu1 %v3999_v17 }
 0x79d   :  { %1749 = vmatprep.subr.bf16.mxu0 %v4002_v58  ;;  %1790 = vmatprep.subr.bf16.mxu1 %v4005_v20 }
 0x79e   :  { %1779 = vmatprep.mubr.bf16.mxu0 %v4752_v7  ;;  %1820 = vmatprep.mubr.bf16.mxu1 %v4752_v7 }
 0x7a0   :  { %1750 = vmatpush1.bf16.msra.mxu0 %v4010_v10  ;;  %1791 = vmatpush1.bf16.msra.mxu1 %v4013_v12 }
 0x7a1   :  { %1751 = vmatprep.subr.bf16.mxu0 %v4016_v15  ;;  %1792 = vmatprep.subr.bf16.mxu1 %v4019_v18 }
 0x7a4   :  { %1752 = vmatpush1.bf16.msra.mxu0 %v4022_v13  ;;  %1793 = vmatpush1.bf16.msra.mxu1 %v4025_v16 }
 0x7a5   :  { %1753 = vmatprep.subr.bf16.mxu0 %v4028_v1  ;;  %1794 = vmatprep.subr.bf16.mxu1 %v4031_v5 }
 0x7a8   :  { %1754 = vmatpush1.bf16.msra.mxu0 %v4034_v56  ;;  %1795 = vmatpush1.bf16.msra.mxu1 %v4037_v27 }
 0x7a9   :  { %1755 = vmatprep.subr.bf16.mxu0 %v4040_v8  ;;  %1796 = vmatprep.subr.bf16.mxu1 %v4043_v60 }
 0x7ac   :  { %1756 = vmatpush1.bf16.msra.mxu0 %v4046_v6  ;;  %1797 = vmatpush1.bf16.msra.mxu1 %v4049_v22 }
 0x7ad   :  { %1757 = vmatprep.subr.bf16.mxu0 %v4052_v23  ;;  %1798 = vmatprep.subr.bf16.mxu1 %v4055_v24 }
 0x7b0   :  { %1758 = vmatpush1.bf16.msra.mxu0 %v4105_v3  ;;  %1799 = vmatpush1.bf16.msra.mxu1 %v4108_v45 }
 0x7b1   :  { %1759 = vmatprep.subr.bf16.mxu0 %v4111_v55  ;;  %1800 = vmatprep.subr.bf16.mxu1 %v4114_v42 }
 0x7b4   :  { %1760 = vmatpush1.bf16.msra.mxu0 %v4117_v43  ;;  %1801 = vmatpush1.bf16.msra.mxu1 %v4120_v44 }
 0x7b5   :  { %1761 = vmatprep.subr.bf16.mxu0 %v4123_v48  ;;  %1802 = vmatprep.subr.bf16.mxu1 %v4126_v25 }
 0x7b8   :  { %1762 = vmatpush1.bf16.msra.mxu0 %v4129_v47  ;;  %1803 = vmatpush1.bf16.msra.mxu1 %v4132_v26 }
 0x7b9   :  { %1873 = vmatprep.subr.bf16.mxu0 %v3977_v19  ;;  %1914 = vmatprep.subr.bf16.mxu1 %v3980_v21 }
 0x86e   :  { %v1655_v33 = vpop.f32.mrb[60].mxu0  ;;  %v1696_v38 = vpop.f32.mrb[60].mxu1 }
 0x86f   :  { %v1703_v0 = vadd.f32 %v1655_v33, %v4769_v62  ;;  %v1705_v52 = vadd.f32 %v1696_v38, %v4770_v46  ;;  %v1657_v9 = vpop.f32.mrb[61].mxu0  ;;  %v1698_v14 = vpop.f32.mrb[61].mxu1 }
 0x870   :  { %v1704_v28 = vadd.f32 %v1657_v9, %v4771_v50  ;;  %v1706_v51 = vadd.f32 %v1698_v14, %v4772_v49  ;;  %v1659_v30 = vpop.f32.mrb[62].mxu0  ;;  %v1700_v53 = vpop.f32.mrb[62].mxu1 }
 0x871   :  { %v2877_v54 = vmul.f32 -1.442695, %v1703_v0  ;;  %v1660_v36 = vpop.f32.mrb[63].mxu0  ;;  %v1701_v11 = vpop.f32.mrb[63].mxu1 }
 0x872   :  { %v2878_v32 = vmul.f32 -1.442695, %v1704_v28  ;;  %v2879_v34 = vmul.f32 -1.442695, %v1706_v51  ;;  %v1735_v38 = vpop.permute.xlu1 %1734  ;;  %v4773_v28 = vld [vmem:[#allocation32_spill] sm:$0xff]  ;;  %v4774_v51 = vld [vmem:[#allocation33_spill] sm:$0xff] }
 0x873   :  { %3104 = vpow2.f32 %v2877_v54  ;;  %vm1736_vm9 = vcmp.eq.s32.totalorder %v1735_v38, 1  ;;  %v4775_v36 = vld [vmem:[#allocation34_spill] sm:$0xff] }
 0x874   :  { %3106 = vpow2.f32 %v2878_v32  ;;  %v4776_v32 = vld [vmem:[#allocation35_spill] sm:$0xff] }
 0x875   :  { %3108 = vpow2.f32 %v2879_v34 }
 0x876   :  { %3110 = vtanh.f32 %v1705_v52 }
 0x87d   :  { %v3105_v35 = vpop.eup %3104 }
 0x87e   :  { %v3107_v37 = vpop.eup %3106  ;;  %v1710_v39 = vadd.f32 1.0, %v3105_v35 }
 0x87f   :  { %v1716_v29 = vadd.f32 1.0, %v3107_v37  ;;  %v3109_v31 = vpop.eup %3108 }
 0x880   :  { %3112 = vrcp.f32 %v1710_v39  ;;  %v3111_v40 = vpop.eup %3110  ;;  %v1723_v59 = vadd.f32 1.0, %v3109_v31 }
 0x881   :  { %3114 = vrcp.f32 %v1716_v29 }
 0x882   :  { %3116 = vrcp.f32 %v1723_v59 }
 0x88a   :  { %v3113_v61 = vpop.eup %3112 }
 0x88b   :  { %v3115_v63 = vpop.eup %3114  ;;  %v1727_v2 = vmul.f32 %v3113_v61, %v3111_v40 }
 0x88c   :  { %v1726_v33 = vmul.f32 %v3115_v63, %v4237_v41  ;;  %v3117_v46 = vpop.eup %3116 }
 0x88e   :  { %v1728_v62 = vadd.f32 %v1727_v2, %v1726_v33 }
 0x890   :  { %3118 = vtanh.f32 %v1728_v62  ;;  %v4284_v0 = vsel %vm1736_vm9, %v1728_v62, %v4237_v41 }
 0x89a   :  { %v3119_v52 = vpop.eup %3118 }
 0x89b   :  { %v1730_v9 = vmul.f32 %v3119_v52, %v3117_v46 }
 0x89d   :  { %v4287_v14 = vsel %vm1736_vm9, %v1730_v9, %v4240_v4 }
 0x89e   :  { %v1746_v50 = vpack.c.bf16 %v4287_v14, %v4287_v14 }
 0x8a0   :  { %1780 = vmatmul.mubr.bf16.vlgmr.msra.gmra.mrb[64].mxu0 %v1746_v50  ;;  %1821 = vmatmul.mubr.bf16.vlgmr.msra.gmra.mrb[64].mxu1 %v1746_v50  ;;  %v1861_v50 = vpop.permute.xlu0 %1860 }
 0x8a1   :  { %1874 = vmatpush1.bf16.msra.mxu0 %v3996_v57  ;;  %1915 = vmatpush1.bf16.msra.mxu1 %v3999_v17  ;;  %vm1862_vm10 = vcmp.eq.s32.totalorder %v1861_v50, 1  ;;  %v4406_v50 = vld [vmem:[#allocation6 + $0x28] ss:$16 sps:$4 sm:$0xff]  }
 0x8a2   :  { %1875 = vmatprep.subr.bf16.mxu0 %v4002_v58  ;;  %1916 = vmatprep.subr.bf16.mxu1 %v4005_v20 }
 0x8a3   :  { %1905 = vmatprep.mubr.bf16.mxu0 %v4752_v7  ;;  %1946 = vmatprep.mubr.bf16.mxu1 %v4752_v7 }
 0x8a5   :  { %1876 = vmatpush1.bf16.msra.mxu0 %v4010_v10  ;;  %1917 = vmatpush1.bf16.msra.mxu1 %v4013_v12 }
 0x8a6   :  { %1877 = vmatprep.subr.bf16.mxu0 %v4016_v15  ;;  %1918 = vmatprep.subr.bf16.mxu1 %v4019_v18 }
 0x8a9   :  { %1878 = vmatpush1.bf16.msra.mxu0 %v4022_v13  ;;  %1919 = vmatpush1.bf16.msra.mxu1 %v4025_v16 }
 0x8aa   :  { %1879 = vmatprep.subr.bf16.mxu0 %v4028_v1  ;;  %1920 = vmatprep.subr.bf16.mxu1 %v4031_v5 }
 0x8ad   :  { %1880 = vmatpush1.bf16.msra.mxu0 %v4034_v56  ;;  %1921 = vmatpush1.bf16.msra.mxu1 %v4037_v27 }
 0x8ae   :  { %1881 = vmatprep.subr.bf16.mxu0 %v4040_v8  ;;  %1922 = vmatprep.subr.bf16.mxu1 %v4043_v60 }
 0x8b1   :  { %1882 = vmatpush1.bf16.msra.mxu0 %v4046_v6  ;;  %1923 = vmatpush1.bf16.msra.mxu1 %v4049_v22 }
 0x8b2   :  { %1883 = vmatprep.subr.bf16.mxu0 %v4052_v23  ;;  %1924 = vmatprep.subr.bf16.mxu1 %v4055_v24 }
 0x8b5   :  { %1884 = vmatpush1.bf16.msra.mxu0 %v4105_v3  ;;  %1925 = vmatpush1.bf16.msra.mxu1 %v4108_v45 }
 0x8b6   :  { %1885 = vmatprep.subr.bf16.mxu0 %v4111_v55  ;;  %1926 = vmatprep.subr.bf16.mxu1 %v4114_v42 }
 0x8b9   :  { %1886 = vmatpush1.bf16.msra.mxu0 %v4117_v43  ;;  %1927 = vmatpush1.bf16.msra.mxu1 %v4120_v44 }
 0x8ba   :  { %1887 = vmatprep.subr.bf16.mxu0 %v4123_v48  ;;  %1928 = vmatprep.subr.bf16.mxu1 %v4126_v25 }
 0x8bd   :  { %1888 = vmatpush1.bf16.msra.mxu0 %v4129_v47  ;;  %1929 = vmatpush1.bf16.msra.mxu1 %v4132_v26 }
 0x8be   :  { %1999 = vmatprep.subr.bf16.mxu0 %v3977_v19  ;;  %2040 = vmatprep.subr.bf16.mxu1 %v3980_v21 }
 0x973   :  { %v1781_v41 = vpop.f32.mrb[64].mxu0  ;;  %v1822_v4 = vpop.f32.mrb[64].mxu1 }
 0x974   :  { %v1829_v49 = vadd.f32 %v1781_v41, %v4773_v28  ;;  %v1831_v30 = vadd.f32 %v1822_v4, %v4774_v51  ;;  %v1783_v53 = vpop.f32.mrb[65].mxu0  ;;  %v1824_v54 = vpop.f32.mrb[65].mxu1 }
 0x975   :  { %v1830_v11 = vadd.f32 %v1783_v53, %v4775_v36  ;;  %v1832_v34 = vadd.f32 %v1824_v54, %v4776_v32  ;;  %v1785_v35 = vpop.f32.mrb[66].mxu0  ;;  %v1826_v37 = vpop.f32.mrb[66].mxu1 }
 0x976   :  { %v2880_v39 = vmul.f32 -1.442695, %v1829_v49  ;;  %v1786_v29 = vpop.f32.mrb[67].mxu0  ;;  %v1827_v31 = vpop.f32.mrb[67].mxu1 }
 0x977   :  { %v2881_v19 = vmul.f32 -1.442695, %v1830_v11  ;;  %v2882_v21 = vmul.f32 -1.442695, %v1832_v34 }
 0x978   :  { %3120 = vpow2.f32 %v2880_v39 }
 0x979   :  { %3122 = vpow2.f32 %v2881_v19  ;;  %v1987_v19 = vpop.permute.xlu1 %1986 }
 0x97a   :  { %3124 = vpow2.f32 %v2882_v21  ;;  %vm1988_vm11 = vcmp.eq.s32.totalorder %v1987_v19, 1 }
 0x97b   :  { %3126 = vtanh.f32 %v1831_v30 }
 0x982   :  { %v3121_v40 = vpop.eup %3120 }
 0x983   :  { %v3123_v61 = vpop.eup %3122  ;;  %v1836_v63 = vadd.f32 1.0, %v3121_v40 }
 0x984   :  { %v1842_v2 = vadd.f32 1.0, %v3123_v61  ;;  %v3125_v59 = vpop.eup %3124 }
 0x985   :  { %3128 = vrcp.f32 %v1836_v63  ;;  %v3127_v33 = vpop.eup %3126  ;;  %v1849_v52 = vadd.f32 1.0, %v3125_v59 }
 0x986   :  { %3130 = vrcp.f32 %v1842_v2 }
 0x987   :  { %3132 = vrcp.f32 %v1849_v52  ;;  %v4398_v52 = vld [vmem:[#allocation6 + $0x2c] ss:$16 sps:$4 sm:$0xff]  }
 0x98f   :  { %v3129_v38 = vpop.eup %3128 }
 0x990   :  { %v3131_v62 = vpop.eup %3130  ;;  %v1853_v46 = vmul.f32 %v3129_v38, %v3127_v33  ;;  %v4389_v38 = vld [vmem:[#allocation6] ss:$16 sps:$4 sm:$0xff]  }
 0x991   :  { %v1852_v9 = vmul.f32 %v3131_v62, %v4284_v0  ;;  %v3133_v28 = vpop.eup %3132  ;;  %v4392_v62 = vld [vmem:[#allocation6 + $0x8] ss:$16 sps:$4 sm:$0xff]  }
 0x993   :  { %v1854_v41 = vadd.f32 %v1853_v46, %v1852_v9  ;;  %v4395_v46 = vld [vmem:[#allocation6 + $0x24] ss:$16 sps:$4 sm:$0xff]   ;;  %v4403_v9 = vld [vmem:[#allocation6 + $0x20] ss:$16 sps:$4 sm:$0xff]  }
 0x995   :  { %3134 = vtanh.f32 %v1854_v41  ;;  %v4331_v4 = vsel %vm1862_vm10, %v1854_v41, %v4284_v0  ;;  %v4409_v41 = vld [vmem:[#allocation6 + $0x44] ss:$16 sps:$4 sm:$0xff]  }
 0x99f   :  { %v3135_v49 = vpop.eup %3134 }
 0x9a0   :  { %v1856_v51 = vmul.f32 %v3135_v49, %v3133_v28  ;;  %v4415_v28 = vld [vmem:[#allocation6 + $0x40] ss:$16 sps:$4 sm:$0xff]   ;;  %v4418_v49 = vld [vmem:[#allocation6 + $0x48] ss:$16 sps:$4 sm:$0xff]  }
 0x9a2   :  { %v4334_v30 = vsel %vm1862_vm10, %v1856_v51, %v4287_v14  ;;  %v4421_v51 = vld [vmem:[#allocation6 + $0x64] ss:$16 sps:$4 sm:$0xff]  }
 0x9a3   :  { %v1872_v53 = vpack.c.bf16 %v4334_v30, %v4334_v30 }
 0x9a5   :  { %1906 = vmatmul.mubr.bf16.vlgmr.msra.gmra.mrb[68].mxu0 %v1872_v53  ;;  %1947 = vmatmul.mubr.bf16.vlgmr.msra.gmra.mrb[68].mxu1 %v1872_v53  ;;  %v4427_v53 = vld [vmem:[#allocation6 + $0x60] ss:$16 sps:$4 sm:$0xff]  }
 0x9a6   :  { %2000 = vmatpush1.bf16.msra.mxu0 %v3996_v57  ;;  %2041 = vmatpush1.bf16.msra.mxu1 %v3999_v17  ;;  %v4370_v57 = vld [vmem:[#allocation6 + $0x4] ss:$16 sps:$4 sm:$0xff]   ;;  %v4373_v17 = vld [vmem:[#allocation6 + $0xc] ss:$16 sps:$4 sm:$0xff]  }
 0x9a7   :  { %2001 = vmatprep.subr.bf16.mxu0 %v4002_v58  ;;  %2042 = vmatprep.subr.bf16.mxu1 %v4005_v20 }
 0x9a8   :  { %2031 = vmatprep.mubr.bf16.mxu0 %v4752_v7  ;;  %2072 = vmatprep.mubr.bf16.mxu1 %v4752_v7 }
 0x9aa   :  { %2002 = vmatpush1.bf16.msra.mxu0 %v4010_v10  ;;  %2043 = vmatpush1.bf16.msra.mxu1 %v4013_v12  ;;  %v4777_v10 = vld [vmem:[#allocation36_spill] sm:$0xff] }
 0x9ab   :  { %2003 = vmatprep.subr.bf16.mxu0 %v4016_v15  ;;  %2044 = vmatprep.subr.bf16.mxu1 %v4019_v18  ;;  %v4778_v15 = vld [vmem:[#allocation37_spill] sm:$0xff] }
 0x9ae   :  { %2004 = vmatpush1.bf16.msra.mxu0 %v4022_v13  ;;  %2045 = vmatpush1.bf16.msra.mxu1 %v4025_v16 }
 0x9af   :  { %2005 = vmatprep.subr.bf16.mxu0 %v4028_v1  ;;  %2046 = vmatprep.subr.bf16.mxu1 %v4031_v5  ;;  %v4779_v1 = vld [vmem:[#allocation38_spill] sm:$0xff] }
 0x9b2   :  { %2006 = vmatpush1.bf16.msra.mxu0 %v4034_v56  ;;  %2047 = vmatpush1.bf16.msra.mxu1 %v4037_v27  ;;  %v4780_v56 = vld [vmem:[#allocation39_spill] sm:$0xff] }
 0x9b3   :  { %2007 = vmatprep.subr.bf16.mxu0 %v4040_v8  ;;  %2048 = vmatprep.subr.bf16.mxu1 %v4043_v60 }
 0x9b6   :  { %2008 = vmatpush1.bf16.msra.mxu0 %v4046_v6  ;;  %2049 = vmatpush1.bf16.msra.mxu1 %v4049_v22 }
 0x9b7   :  { %2009 = vmatprep.subr.bf16.mxu0 %v4052_v23  ;;  %2050 = vmatprep.subr.bf16.mxu1 %v4055_v24 }
 0x9ba   :  { %2010 = vmatpush1.bf16.msra.mxu0 %v4105_v3  ;;  %2051 = vmatpush1.bf16.msra.mxu1 %v4108_v45 }
 0x9bb   :  { %2011 = vmatprep.subr.bf16.mxu0 %v4111_v55  ;;  %2052 = vmatprep.subr.bf16.mxu1 %v4114_v42 }
 0x9be   :  { %2012 = vmatpush1.bf16.msra.mxu0 %v4117_v43  ;;  %2053 = vmatpush1.bf16.msra.mxu1 %v4120_v44 }
 0x9bf   :  { %2013 = vmatprep.subr.bf16.mxu0 %v4123_v48  ;;  %2054 = vmatprep.subr.bf16.mxu1 %v4126_v25 }
 0x9c2   :  { %2014 = vmatpush1.bf16.msra.mxu0 %v4129_v47  ;;  %2055 = vmatpush1.bf16.msra.mxu1 %v4132_v26 }
 0x9c3   :  { %2125 = vmatprep.subr.bf16.mxu0 %v4370_v57  ;;  %2166 = vmatprep.subr.bf16.mxu1 %v4373_v17 }
 0xa78   :  { %v1907_v58 = vpop.f32.mrb[68].mxu0  ;;  %v1948_v20 = vpop.f32.mrb[68].mxu1 }
 0xa79   :  { %v1955_v12 = vadd.f32 %v1907_v58, %v4777_v10  ;;  %v1957_v18 = vadd.f32 %v1948_v20, %v4778_v15  ;;  %v1909_v13 = vpop.f32.mrb[69].mxu0  ;;  %v1950_v16 = vpop.f32.mrb[69].mxu1  ;;  %v4430_v58 = vld [vmem:[#allocation6 + $0x68] ss:$16 sps:$4 sm:$0xff]   ;;  %v4433_v20 = vld [vmem:[#allocation6 + $0x84] ss:$16 sps:$4 sm:$0xff]  }
 0xa7a   :  { %v1956_v5 = vadd.f32 %v1909_v13, %v4779_v1  ;;  %v1958_v27 = vadd.f32 %v1950_v16, %v4780_v56  ;;  %v1911_v8 = vpop.f32.mrb[70].mxu0  ;;  %v1952_v60 = vpop.f32.mrb[70].mxu1  ;;  %v4436_v10 = vld [vmem:[#allocation6 + $0x8c] ss:$16 sps:$4 sm:$0xff]   ;;  %v4442_v15 = vld [vmem:[#allocation6 + $0x88] ss:$16 sps:$4 sm:$0xff]  }
 0xa7b   :  { %v2883_v6 = vmul.f32 -1.442695, %v1955_v12  ;;  %v1912_v22 = vpop.f32.mrb[71].mxu0  ;;  %v1953_v23 = vpop.f32.mrb[71].mxu1  ;;  %v4439_v12 = vld [vmem:[#allocation6 + $0x80] ss:$16 sps:$4 sm:$0xff]  }
 0xa7c   :  { %v2884_v24 = vmul.f32 -1.442695, %v1956_v5  ;;  %v2885_v0 = vmul.f32 -1.442695, %v1958_v27  ;;  %v4448_v13 = vld [vmem:[#allocation6 + $0xac] ss:$16 sps:$4 sm:$0xff]  }
 0xa7d   :  { %3136 = vpow2.f32 %v2883_v6  ;;  %v4782_v16 = vld [vmem:[#allocation41_spill] sm:$0xff]  ;;  %v4783_v5 = vld [vmem:[#allocation42_spill] sm:$0xff]  ;;  %v4784_v56 = vld [vmem:[#allocation43_spill] sm:$0xff] }
 0xa7e   :  { %3138 = vpow2.f32 %v2884_v24 }
 0xa7f   :  { %3140 = vpow2.f32 %v2885_v0 }
 0xa80   :  { %3142 = vtanh.f32 %v1957_v18  ;;  %v4445_v18 = vld [vmem:[#allocation6 + $0xa4] ss:$16 sps:$4 sm:$0xff]  }
 0xa87   :  { %v3137_v14 = vpop.eup %3136 }
 0xa88   :  { %v3139_v54 = vpop.eup %3138  ;;  %v1962_v36 = vadd.f32 1.0, %v3137_v14 }
 0xa89   :  { %v1968_v11 = vadd.f32 1.0, %v3139_v54  ;;  %v3141_v32 = vpop.eup %3140 }
 0xa8a   :  { %3144 = vrcp.f32 %v1962_v36  ;;  %v3143_v34 = vpop.eup %3142  ;;  %v1975_v29 = vadd.f32 1.0, %v3141_v32 }
 0xa8b   :  { %3146 = vrcp.f32 %v1968_v11 }
 0xa8c   :  { %3148 = vrcp.f32 %v1975_v29 }
 0xa94   :  { %v3145_v35 = vpop.eup %3144 }
 0xa95   :  { %v3147_v37 = vpop.eup %3146  ;;  %v1979_v39 = vmul.f32 %v3145_v35, %v3143_v34 }
 0xa96   :  { %v1978_v31 = vmul.f32 %v3147_v37, %v4331_v4  ;;  %v3149_v61 = vpop.eup %3148 }
 0xa98   :  { %v1980_v21 = vadd.f32 %v1979_v39, %v1978_v31  ;;  %v2113_v39 = vpop.permute.xlu0 %2112 }
 0xa99   :  { %vm2114_vm12 = vcmp.eq.s32.totalorder %v2113_v39, 1 }
 0xa9a   :  { %3150 = vtanh.f32 %v1980_v21  ;;  %v4382_v40 = vsel %vm1988_vm11, %v1980_v21, %v4331_v4  ;;  %v4412_v4 = vld [vmem:[#allocation6 + $0x4c] ss:$16 sps:$4 sm:$0xff]  }
 0xaa4   :  { %v3151_v63 = vpop.eup %3150 }
 0xaa5   :  { %v1982_v2 = vmul.f32 %v3151_v63, %v3149_v61 }
 0xaa7   :  { %v4385_v59 = vsel %vm1988_vm11, %v1982_v2, %v4334_v30  ;;  %v4424_v30 = vld [vmem:[#allocation6 + $0x6c] ss:$16 sps:$4 sm:$0xff]  }
 0xaa8   :  { %v1998_v33 = vpack.c.bf16 %v4385_v59, %v4385_v59 }
 0xaaa   :  { %2032 = vmatmul.mubr.bf16.vlgmr.msra.gmra.mrb[72].mxu0 %v1998_v33  ;;  %2073 = vmatmul.mubr.bf16.vlgmr.msra.gmra.mrb[72].mxu1 %v1998_v33  ;;  %v4504_v33 = vld [vmem:[#allocation6 + $0xc4] ss:$16 sps:$4 sm:$0xff]  }
 0xaab   :  { %2126 = vmatpush1.bf16.msra.mxu0 %v4389_v38  ;;  %2167 = vmatpush1.bf16.msra.mxu1 %v4392_v62 }
 0xaac   :  { %2127 = vmatprep.subr.bf16.mxu0 %v4395_v46  ;;  %2168 = vmatprep.subr.bf16.mxu1 %v4398_v52 }
 0xaad   :  { %2157 = vmatprep.mubr.bf16.mxu0 %v4752_v7  ;;  %2198 = vmatprep.mubr.bf16.mxu1 %v4752_v7 }
 0xaaf   :  { %2128 = vmatpush1.bf16.msra.mxu0 %v4403_v9  ;;  %2169 = vmatpush1.bf16.msra.mxu1 %v4406_v50 }
 0xab0   :  { %2129 = vmatprep.subr.bf16.mxu0 %v4409_v41  ;;  %2170 = vmatprep.subr.bf16.mxu1 %v4412_v4 }
 0xab3   :  { %2130 = vmatpush1.bf16.msra.mxu0 %v4415_v28  ;;  %2171 = vmatpush1.bf16.msra.mxu1 %v4418_v49 }
 0xab4   :  { %2131 = vmatprep.subr.bf16.mxu0 %v4421_v51  ;;  %2172 = vmatprep.subr.bf16.mxu1 %v4424_v30 }
 0xab7   :  { %2132 = vmatpush1.bf16.msra.mxu0 %v4427_v53  ;;  %2173 = vmatpush1.bf16.msra.mxu1 %v4430_v58 }
 0xab8   :  { %2133 = vmatprep.subr.bf16.mxu0 %v4433_v20  ;;  %2174 = vmatprep.subr.bf16.mxu1 %v4436_v10 }
 0xabb   :  { %2134 = vmatpush1.bf16.msra.mxu0 %v4439_v12  ;;  %2175 = vmatpush1.bf16.msra.mxu1 %v4442_v15 }
 0xabc   :  { %2135 = vmatprep.subr.bf16.mxu0 %v4445_v18  ;;  %2176 = vmatprep.subr.bf16.mxu1 %v4448_v13 }
 0xabf   :  { %2136 = vmatpush1.bf16.msra.mxu0 %v4105_v3  ;;  %2177 = vmatpush1.bf16.msra.mxu1 %v4108_v45 }
 0xac0   :  { %2137 = vmatprep.subr.bf16.mxu0 %v4111_v55  ;;  %2178 = vmatprep.subr.bf16.mxu1 %v4114_v42  ;;  %v4781_v55 = vld [vmem:[#allocation40_spill] sm:$0xff] }
 0xac3   :  { %2138 = vmatpush1.bf16.msra.mxu0 %v4117_v43  ;;  %2179 = vmatpush1.bf16.msra.mxu1 %v4120_v44 }
 0xac4   :  { %2139 = vmatprep.subr.bf16.mxu0 %v4123_v48  ;;  %2180 = vmatprep.subr.bf16.mxu1 %v4126_v25 }
 0xac7   :  { %2140 = vmatpush1.bf16.msra.mxu0 %v4129_v47  ;;  %2181 = vmatpush1.bf16.msra.mxu1 %v4132_v26 }
 0xac8   :  { %2251 = vmatprep.subr.bf16.mxu0 %v4370_v57  ;;  %2292 = vmatprep.subr.bf16.mxu1 %v4373_v17 }
 0xb7d   :  { %v2033_v3 = vpop.f32.mrb[72].mxu0  ;;  %v2074_v45 = vpop.f32.mrb[72].mxu1 }
 0xb7e   :  { %v2081_v42 = vadd.f32 %v2033_v3, %v4781_v55  ;;  %v2083_v43 = vadd.f32 %v2074_v45, %v4782_v16  ;;  %v2035_v1 = vpop.f32.mrb[73].mxu0  ;;  %v2076_v44 = vpop.f32.mrb[73].mxu1  ;;  %v4507_v3 = vld [vmem:[#allocation6 + $0xcc] ss:$16 sps:$4 sm:$0xff]   ;;  %v4510_v45 = vld [vmem:[#allocation6 + $0xc0] ss:$16 sps:$4 sm:$0xff]  }
 0xb7f   :  { %v2082_v48 = vadd.f32 %v2035_v1, %v4783_v5  ;;  %v2084_v25 = vadd.f32 %v2076_v44, %v4784_v56  ;;  %v2037_v27 = vpop.f32.mrb[74].mxu0  ;;  %v2078_v47 = vpop.f32.mrb[74].mxu1  ;;  %v4513_v55 = vld [vmem:[#allocation6 + $0xc8] ss:$16 sps:$4 sm:$0xff]   ;;  %v4519_v16 = vld [vmem:[#allocation6 + $0xec] ss:$16 sps:$4 sm:$0xff]  }
 0xb80   :  { %v2886_v8 = vmul.f32 -1.442695, %v2081_v42  ;;  %v2038_v26 = vpop.f32.mrb[75].mxu0  ;;  %v2079_v60 = vpop.f32.mrb[75].mxu1  ;;  %v4516_v42 = vld [vmem:[#allocation6 + $0xe4] ss:$16 sps:$4 sm:$0xff]  }
 0xb81   :  { %v2887_v6 = vmul.f32 -1.442695, %v2082_v48  ;;  %v2888_v22 = vmul.f32 -1.442695, %v2084_v25  ;;  %v4525_v1 = vld [vmem:[#allocation6 + $0xe8] ss:$16 sps:$4 sm:$0xff]  }
 0xb82   :  { %3152 = vpow2.f32 %v2886_v8  ;;  %v4785_v48 = vld [vmem:[#allocation44_spill] sm:$0xff]  ;;  %v4786_v25 = vld [vmem:[#allocation45_spill] sm:$0xff]  ;;  %v4787_v26 = vld [vmem:[#allocation46_spill] sm:$0xff] }
 0xb83   :  { %3154 = vpow2.f32 %v2887_v6  ;;  %v4788_v6 = vld [vmem:[#allocation47_spill] sm:$0xff] }
 0xb84   :  { %3156 = vpow2.f32 %v2888_v22 }
 0xb85   :  { %3158 = vtanh.f32 %v2083_v43  ;;  %v4522_v43 = vld [vmem:[#allocation6 + $0xe0] ss:$16 sps:$4 sm:$0xff]  }
 0xb8c   :  { %v3153_v23 = vpop.eup %3152 }
 0xb8d   :  { %v3155_v24 = vpop.eup %3154  ;;  %v2088_v0 = vadd.f32 1.0, %v3153_v23 }
 0xb8e   :  { %v2094_v14 = vadd.f32 1.0, %v3155_v24  ;;  %v3157_v54 = vpop.eup %3156 }
 0xb8f   :  { %3160 = vrcp.f32 %v2088_v0  ;;  %v3159_v36 = vpop.eup %3158  ;;  %v2101_v35 = vadd.f32 1.0, %v3157_v54 }
 0xb90   :  { %3162 = vrcp.f32 %v2094_v14 }
 0xb91   :  { %3164 = vrcp.f32 %v2101_v35 }
 0xb99   :  { %v3161_v11 = vpop.eup %3160 }
 0xb9a   :  { %v3163_v32 = vpop.eup %3162  ;;  %v2105_v34 = vmul.f32 %v3161_v11, %v3159_v36 }
 0xb9b   :  { %v2104_v37 = vmul.f32 %v3163_v32, %v4382_v40  ;;  %v3165_v19 = vpop.eup %3164 }
 0xb9d   :  { %v2106_v29 = vadd.f32 %v2105_v34, %v2104_v37 }
 0xb9f   :  { %3166 = vtanh.f32 %v2106_v29  ;;  %v4469_v31 = vsel %vm2114_vm12, %v2106_v29, %v4382_v40  ;;  %v4498_v40 = vld [vmem:[#allocation6 + $0xa0] ss:$16 sps:$4 sm:$0xff]  }
 0xba9   :  { %v3167_v21 = vpop.eup %3166 }
 0xbaa   :  { %v2108_v61 = vmul.f32 %v3167_v21, %v3165_v19 }
 0xbac   :  { %v4472_v63 = vsel %vm2114_vm12, %v2108_v61, %v4385_v59  ;;  %v4501_v59 = vld [vmem:[#allocation6 + $0xa8] ss:$16 sps:$4 sm:$0xff]  }
 0xbad   :  { %v2124_v2 = vpack.c.bf16 %v4472_v63, %v4472_v63 }
 0xbaf   :  { %2158 = vmatmul.mubr.bf16.vlgmr.msra.gmra.mrb[76].mxu0 %v2124_v2  ;;  %2199 = vmatmul.mubr.bf16.vlgmr.msra.gmra.mrb[76].mxu1 %v2124_v2 }
 0xbb0   :  { %2252 = vmatpush1.bf16.msra.mxu0 %v4389_v38  ;;  %2293 = vmatpush1.bf16.msra.mxu1 %v4392_v62 }
 0xbb1   :  { %2253 = vmatprep.subr.bf16.mxu0 %v4395_v46  ;;  %2294 = vmatprep.subr.bf16.mxu1 %v4398_v52 }
 0xbb2   :  { %2283 = vmatprep.mubr.bf16.mxu0 %v4752_v7  ;;  %2324 = vmatprep.mubr.bf16.mxu1 %v4752_v7 }
 0xbb4   :  { %2254 = vmatpush1.bf16.msra.mxu0 %v4403_v9  ;;  %2295 = vmatpush1.bf16.msra.mxu1 %v4406_v50 }
 0xbb5   :  { %2255 = vmatprep.subr.bf16.mxu0 %v4409_v41  ;;  %2296 = vmatprep.subr.bf16.mxu1 %v4412_v4 }
 0xbb8   :  { %2256 = vmatpush1.bf16.msra.mxu0 %v4415_v28  ;;  %2297 = vmatpush1.bf16.msra.mxu1 %v4418_v49 }
 0xbb9   :  { %2257 = vmatprep.subr.bf16.mxu0 %v4421_v51  ;;  %2298 = vmatprep.subr.bf16.mxu1 %v4424_v30 }
 0xbbc   :  { %2258 = vmatpush1.bf16.msra.mxu0 %v4427_v53  ;;  %2299 = vmatpush1.bf16.msra.mxu1 %v4430_v58 }
 0xbbd   :  { %2259 = vmatprep.subr.bf16.mxu0 %v4433_v20  ;;  %2300 = vmatprep.subr.bf16.mxu1 %v4436_v10 }
 0xbc0   :  { %2260 = vmatpush1.bf16.msra.mxu0 %v4439_v12  ;;  %2301 = vmatpush1.bf16.msra.mxu1 %v4442_v15 }
 0xbc1   :  { %2261 = vmatprep.subr.bf16.mxu0 %v4445_v18  ;;  %2302 = vmatprep.subr.bf16.mxu1 %v4448_v13 }
 0xbc4   :  { %2262 = vmatpush1.bf16.msra.mxu0 %v4498_v40  ;;  %2303 = vmatpush1.bf16.msra.mxu1 %v4501_v59 }
 0xbc5   :  { %2263 = vmatprep.subr.bf16.mxu0 %v4504_v33  ;;  %2304 = vmatprep.subr.bf16.mxu1 %v4507_v3 }
 0xbc8   :  { %2264 = vmatpush1.bf16.msra.mxu0 %v4510_v45  ;;  %2305 = vmatpush1.bf16.msra.mxu1 %v4513_v55 }
 0xbc9   :  { %2265 = vmatprep.subr.bf16.mxu0 %v4516_v42  ;;  %2306 = vmatprep.subr.bf16.mxu1 %v4519_v16 }
 0xbcc   :  { %2266 = vmatpush1.bf16.msra.mxu0 %v4522_v43  ;;  %2307 = vmatpush1.bf16.msra.mxu1 %v4525_v1 }
 0xbcd   :  { %2377 = vmatprep.subr.bf16.mxu0 %v4370_v57  ;;  %2418 = vmatprep.subr.bf16.mxu1 %v4373_v17 }
 0xc82   :  { %v2159_v44 = vpop.f32.mrb[76].mxu0  ;;  %v2200_v5 = vpop.f32.mrb[76].mxu1 }
 0xc83   :  { %v2207_v56 = vadd.f32 %v2159_v44, %v4785_v48  ;;  %v2209_v27 = vadd.f32 %v2200_v5, %v4786_v25  ;;  %v2161_v47 = vpop.f32.mrb[77].mxu0  ;;  %v2202_v8 = vpop.f32.mrb[77].mxu1 }
 0xc84   :  { %v2208_v60 = vadd.f32 %v2161_v47, %v4787_v26  ;;  %v2210_v22 = vadd.f32 %v2202_v8, %v4788_v6  ;;  %v2163_v23 = vpop.f32.mrb[78].mxu0  ;;  %v2204_v24 = vpop.f32.mrb[78].mxu1 }
 0xc85   :  { %v2889_v0 = vmul.f32 -1.442695, %v2207_v56  ;;  %v2164_v14 = vpop.f32.mrb[79].mxu0  ;;  %v2205_v54 = vpop.f32.mrb[79].mxu1 }
 0xc86   :  { %v2890_v36 = vmul.f32 -1.442695, %v2208_v60  ;;  %v2891_v11 = vmul.f32 -1.442695, %v2210_v22  ;;  %v2239_v5 = vpop.permute.xlu1 %2238  ;;  %v4789_v60 = vld [vmem:[#allocation48_spill] sm:$0xff]  ;;  %v4790_v22 = vld [vmem:[#allocation49_spill] sm:$0xff] }
 0xc87   :  { %3168 = vpow2.f32 %v2889_v0  ;;  %vm2240_vm13 = vcmp.eq.s32.totalorder %v2239_v5, 1  ;;  %v4791_v14 = vld [vmem:[#allocation50_spill] sm:$0xff] }
 0xc88   :  { %3170 = vpow2.f32 %v2890_v36  ;;  %v4792_v36 = vld [vmem:[#allocation51_spill] sm:$0xff] }
 0xc89   :  { %3172 = vpow2.f32 %v2891_v11 }
 0xc8a   :  { %3174 = vtanh.f32 %v2209_v27 }
 0xc91   :  { %v3169_v32 = vpop.eup %3168 }
 0xc92   :  { %v3171_v34 = vpop.eup %3170  ;;  %v2214_v35 = vadd.f32 1.0, %v3169_v32 }
 0xc93   :  { %v2220_v37 = vadd.f32 1.0, %v3171_v34  ;;  %v3173_v39 = vpop.eup %3172 }
 0xc94   :  { %3176 = vrcp.f32 %v2214_v35  ;;  %v3175_v29 = vpop.eup %3174  ;;  %v2227_v2 = vadd.f32 1.0, %v3173_v39 }
 0xc95   :  { %3178 = vrcp.f32 %v2220_v37 }
 0xc96   :  { %3180 = vrcp.f32 %v2227_v2 }
 0xc9e   :  { %v3177_v19 = vpop.eup %3176 }
 0xc9f   :  { %v3179_v21 = vpop.eup %3178  ;;  %v2231_v61 = vmul.f32 %v3177_v19, %v3175_v29 }
 0xca0   :  { %v2230_v44 = vmul.f32 %v3179_v21, %v4469_v31  ;;  %v3181_v25 = vpop.eup %3180 }
 0xca2   :  { %v2232_v48 = vadd.f32 %v2231_v61, %v2230_v44 }
 0xca4   :  { %3182 = vtanh.f32 %v2232_v48  ;;  %v4536_v56 = vsel %vm2240_vm13, %v2232_v48, %v4469_v31 }
 0xcae   :  { %v3183_v27 = vpop.eup %3182 }
 0xcaf   :  { %v2234_v47 = vmul.f32 %v3183_v27, %v3181_v25 }
 0xcb1   :  { %v4539_v8 = vsel %vm2240_vm13, %v2234_v47, %v4472_v63 }
 0xcb2   :  { %v2250_v26 = vpack.c.bf16 %v4539_v8, %v4539_v8 }
 0xcb4   :  { %2284 = vmatmul.mubr.bf16.vlgmr.msra.gmra.mrb[80].mxu0 %v2250_v26  ;;  %2325 = vmatmul.mubr.bf16.vlgmr.msra.gmra.mrb[80].mxu1 %v2250_v26 }
 0xcb5   :  { %2378 = vmatpush1.bf16.msra.mxu0 %v4389_v38  ;;  %2419 = vmatpush1.bf16.msra.mxu1 %v4392_v62 }
 0xcb6   :  { %2379 = vmatprep.subr.bf16.mxu0 %v4395_v46  ;;  %2420 = vmatprep.subr.bf16.mxu1 %v4398_v52 }
 0xcb7   :  { %2409 = vmatprep.mubr.bf16.mxu0 %v4752_v7  ;;  %2450 = vmatprep.mubr.bf16.mxu1 %v4752_v7 }
 0xcb9   :  { %2380 = vmatpush1.bf16.msra.mxu0 %v4403_v9  ;;  %2421 = vmatpush1.bf16.msra.mxu1 %v4406_v50 }
 0xcba   :  { %2381 = vmatprep.subr.bf16.mxu0 %v4409_v41  ;;  %2422 = vmatprep.subr.bf16.mxu1 %v4412_v4 }
 0xcbd   :  { %2382 = vmatpush1.bf16.msra.mxu0 %v4415_v28  ;;  %2423 = vmatpush1.bf16.msra.mxu1 %v4418_v49 }
 0xcbe   :  { %2383 = vmatprep.subr.bf16.mxu0 %v4421_v51  ;;  %2424 = vmatprep.subr.bf16.mxu1 %v4424_v30 }
 0xcc1   :  { %2384 = vmatpush1.bf16.msra.mxu0 %v4427_v53  ;;  %2425 = vmatpush1.bf16.msra.mxu1 %v4430_v58 }
 0xcc2   :  { %2385 = vmatprep.subr.bf16.mxu0 %v4433_v20  ;;  %2426 = vmatprep.subr.bf16.mxu1 %v4436_v10 }
 0xcc5   :  { %2386 = vmatpush1.bf16.msra.mxu0 %v4439_v12  ;;  %2427 = vmatpush1.bf16.msra.mxu1 %v4442_v15 }
 0xcc6   :  { %2387 = vmatprep.subr.bf16.mxu0 %v4445_v18  ;;  %2428 = vmatprep.subr.bf16.mxu1 %v4448_v13 }
 0xcc9   :  { %2388 = vmatpush1.bf16.msra.mxu0 %v4498_v40  ;;  %2429 = vmatpush1.bf16.msra.mxu1 %v4501_v59 }
 0xcca   :  { %2389 = vmatprep.subr.bf16.mxu0 %v4504_v33  ;;  %2430 = vmatprep.subr.bf16.mxu1 %v4507_v3 }
 0xccd   :  { %2390 = vmatpush1.bf16.msra.mxu0 %v4510_v45  ;;  %2431 = vmatpush1.bf16.msra.mxu1 %v4513_v55 }
 0xcce   :  { %2391 = vmatprep.subr.bf16.mxu0 %v4516_v42  ;;  %2432 = vmatprep.subr.bf16.mxu1 %v4519_v16 }
 0xcd1   :  { %2392 = vmatpush1.bf16.msra.mxu0 %v4522_v43  ;;  %2433 = vmatpush1.bf16.msra.mxu1 %v4525_v1 }
 0xcd2   :  { %2503 = vmatprep.subr.bf16.mxu0 %v4370_v57  ;;  %2544 = vmatprep.subr.bf16.mxu1 %v4373_v17 }
 0xd87   :  { %v2285_v31 = vpop.f32.mrb[80].mxu0  ;;  %v2326_v63 = vpop.f32.mrb[80].mxu1 }
 0xd88   :  { %v2333_v6 = vadd.f32 %v2285_v31, %v4789_v60  ;;  %v2335_v23 = vadd.f32 %v2326_v63, %v4790_v22  ;;  %v2287_v24 = vpop.f32.mrb[81].mxu0  ;;  %v2328_v0 = vpop.f32.mrb[81].mxu1 }
 0xd89   :  { %v2334_v54 = vadd.f32 %v2287_v24, %v4791_v14  ;;  %v2336_v11 = vadd.f32 %v2328_v0, %v4792_v36  ;;  %v2289_v32 = vpop.f32.mrb[82].mxu0  ;;  %v2330_v34 = vpop.f32.mrb[82].mxu1 }
 0xd8a   :  { %v2892_v35 = vmul.f32 -1.442695, %v2333_v6  ;;  %v2290_v37 = vpop.f32.mrb[83].mxu0  ;;  %v2331_v39 = vpop.f32.mrb[83].mxu1 }
 0xd8b   :  { %v2893_v29 = vmul.f32 -1.442695, %v2334_v54  ;;  %v2894_v19 = vmul.f32 -1.442695, %v2336_v11  ;;  %v2365_v63 = vpop.permute.xlu0 %2364  ;;  %v4793_v54 = vld [vmem:[#allocation52_spill] sm:$0xff]  ;;  %v4794_v11 = vld [vmem:[#allocation53_spill] sm:$0xff] }
 0xd8c   :  { %3184 = vpow2.f32 %v2892_v35  ;;  %vm2366_vm14 = vcmp.eq.s32.totalorder %v2365_v63, 1  ;;  %v4795_v37 = vld [vmem:[#allocation54_spill] sm:$0xff] }
 0xd8d   :  { %3186 = vpow2.f32 %v2893_v29  ;;  %v4796_v29 = vld [vmem:[#allocation55_spill] sm:$0xff] }
 0xd8e   :  { %3188 = vpow2.f32 %v2894_v19 }
 0xd8f   :  { %3190 = vtanh.f32 %v2335_v23 }
 0xd96   :  { %v3185_v21 = vpop.eup %3184 }
 0xd97   :  { %v3187_v61 = vpop.eup %3186  ;;  %v2340_v2 = vadd.f32 1.0, %v3185_v21 }
 0xd98   :  { %v2346_v44 = vadd.f32 1.0, %v3187_v61  ;;  %v3189_v5 = vpop.eup %3188 }
 0xd99   :  { %3192 = vrcp.f32 %v2340_v2  ;;  %v3191_v48 = vpop.eup %3190  ;;  %v2353_v26 = vadd.f32 1.0, %v3189_v5 }
 0xd9a   :  { %3194 = vrcp.f32 %v2346_v44 }
 0xd9b   :  { %3196 = vrcp.f32 %v2353_v26 }
 0xda3   :  { %v3193_v25 = vpop.eup %3192 }
 0xda4   :  { %v3195_v27 = vpop.eup %3194  ;;  %v2357_v47 = vmul.f32 %v3193_v25, %v3191_v48 }
 0xda5   :  { %v2356_v31 = vmul.f32 %v3195_v27, %v4536_v56  ;;  %v3197_v22 = vpop.eup %3196 }
 0xda7   :  { %v2358_v60 = vadd.f32 %v2357_v47, %v2356_v31 }
 0xda9   :  { %3198 = vtanh.f32 %v2358_v60  ;;  %v4583_v6 = vsel %vm2366_vm14, %v2358_v60, %v4536_v56 }
 0xdb3   :  { %v3199_v23 = vpop.eup %3198 }
 0xdb4   :  { %v2360_v24 = vmul.f32 %v3199_v23, %v3197_v22 }
 0xdb6   :  { %v4586_v0 = vsel %vm2366_vm14, %v2360_v24, %v4539_v8 }
 0xdb7   :  { %v2376_v14 = vpack.c.bf16 %v4586_v0, %v4586_v0 }
 0xdb9   :  { %2410 = vmatmul.mubr.bf16.vlgmr.msra.gmra.mrb[84].mxu0 %v2376_v14  ;;  %2451 = vmatmul.mubr.bf16.vlgmr.msra.gmra.mrb[84].mxu1 %v2376_v14  ;;  %v2491_v14 = vpop.permute.xlu1 %2490 }
 0xdba   :  { %2504 = vmatpush1.bf16.msra.mxu0 %v4389_v38  ;;  %2545 = vmatpush1.bf16.msra.mxu1 %v4392_v62  ;;  %vm2492_vm15 = vcmp.eq.s32.totalorder %v2491_v14, 1 }
 0xdbb   :  { %2505 = vmatprep.subr.bf16.mxu0 %v4395_v46  ;;  %2546 = vmatprep.subr.bf16.mxu1 %v4398_v52 }
 0xdbc   :  { %2535 = vmatprep.mubr.bf16.mxu0 %v4752_v7  ;;  %2576 = vmatprep.mubr.bf16.mxu1 %v4752_v7 }
 0xdbe   :  { %2506 = vmatpush1.bf16.msra.mxu0 %v4403_v9  ;;  %2547 = vmatpush1.bf16.msra.mxu1 %v4406_v50 }
 0xdbf   :  { %2507 = vmatprep.subr.bf16.mxu0 %v4409_v41  ;;  %2548 = vmatprep.subr.bf16.mxu1 %v4412_v4 }
 0xdc2   :  { %2508 = vmatpush1.bf16.msra.mxu0 %v4415_v28  ;;  %2549 = vmatpush1.bf16.msra.mxu1 %v4418_v49 }
 0xdc3   :  { %2509 = vmatprep.subr.bf16.mxu0 %v4421_v51  ;;  %2550 = vmatprep.subr.bf16.mxu1 %v4424_v30 }
 0xdc6   :  { %2510 = vmatpush1.bf16.msra.mxu0 %v4427_v53  ;;  %2551 = vmatpush1.bf16.msra.mxu1 %v4430_v58 }
 0xdc7   :  { %2511 = vmatprep.subr.bf16.mxu0 %v4433_v20  ;;  %2552 = vmatprep.subr.bf16.mxu1 %v4436_v10 }
 0xdca   :  { %2512 = vmatpush1.bf16.msra.mxu0 %v4439_v12  ;;  %2553 = vmatpush1.bf16.msra.mxu1 %v4442_v15 }
 0xdcb   :  { %2513 = vmatprep.subr.bf16.mxu0 %v4445_v18  ;;  %2554 = vmatprep.subr.bf16.mxu1 %v4448_v13 }
 0xdce   :  { %2514 = vmatpush1.bf16.msra.mxu0 %v4498_v40  ;;  %2555 = vmatpush1.bf16.msra.mxu1 %v4501_v59 }
 0xdcf   :  { %2515 = vmatprep.subr.bf16.mxu0 %v4504_v33  ;;  %2556 = vmatprep.subr.bf16.mxu1 %v4507_v3 }
 0xdd2   :  { %2516 = vmatpush1.bf16.msra.mxu0 %v4510_v45  ;;  %2557 = vmatpush1.bf16.msra.mxu1 %v4513_v55 }
 0xdd3   :  { %2517 = vmatprep.subr.bf16.mxu0 %v4516_v42  ;;  %2558 = vmatprep.subr.bf16.mxu1 %v4519_v16 }
 0xdd6   :  { %2518 = vmatpush1.bf16.msra.mxu0 %v4522_v43  ;;  %2559 = vmatpush1.bf16.msra.mxu1 %v4525_v1 }
 0xdd7   :  { %2629 = vmatprep.subr.bf16.mxu0 %v4370_v57  ;;  %2670 = vmatprep.subr.bf16.mxu1 %v4373_v17 }
 0xe8c   :  { %v2411_v56 = vpop.f32.mrb[84].mxu0  ;;  %v2452_v8 = vpop.f32.mrb[84].mxu1 }
 0xe8d   :  { %v2459_v36 = vadd.f32 %v2411_v56, %v4793_v54  ;;  %v2461_v32 = vadd.f32 %v2452_v8, %v4794_v11  ;;  %v2413_v34 = vpop.f32.mrb[85].mxu0  ;;  %v2454_v35 = vpop.f32.mrb[85].mxu1 }
 0xe8e   :  { %v2460_v39 = vadd.f32 %v2413_v34, %v4795_v37  ;;  %v2462_v19 = vadd.f32 %v2454_v35, %v4796_v29  ;;  %v2415_v21 = vpop.f32.mrb[86].mxu0  ;;  %v2456_v61 = vpop.f32.mrb[86].mxu1 }
 0xe8f   :  { %v2895_v2 = vmul.f32 -1.442695, %v2459_v36  ;;  %v2416_v44 = vpop.f32.mrb[87].mxu0  ;;  %v2457_v5 = vpop.f32.mrb[87].mxu1 }
 0xe90   :  { %v2896_v57 = vmul.f32 -1.442695, %v2460_v39  ;;  %v2897_v17 = vmul.f32 -1.442695, %v2462_v19  ;;  %v4802_v5 = vld [vmem:[#allocation61_spill] sm:$0xff] }
 0xe91   :  { %3200 = vpow2.f32 %v2895_v2  ;;  %v4801_v2 = vld [vmem:[#allocation60_spill] sm:$0xff] }
 0xe92   :  { %3202 = vpow2.f32 %v2896_v57 }
 0xe93   :  { %3204 = vpow2.f32 %v2897_v17 }
 0xe94   :  { %3206 = vtanh.f32 %v2461_v32 }
 0xe9b   :  { %v3201_v48 = vpop.eup %3200 }
 0xe9c   :  { %v3203_v25 = vpop.eup %3202  ;;  %v2466_v27 = vadd.f32 1.0, %v3201_v48 }
 0xe9d   :  { %v2472_v47 = vadd.f32 1.0, %v3203_v25  ;;  %v3205_v26 = vpop.eup %3204  ;;  %v4803_v25 = vld [vmem:[#allocation62_spill] sm:$0xff] }
 0xe9e   :  { %3208 = vrcp.f32 %v2466_v27  ;;  %v3207_v31 = vpop.eup %3206  ;;  %v2479_v23 = vadd.f32 1.0, %v3205_v26 }
 0xe9f   :  { %3210 = vrcp.f32 %v2472_v47  ;;  %v4804_v47 = vld [vmem:[#allocation63_spill] sm:$0xff] }
 0xea0   :  { %3212 = vrcp.f32 %v2479_v23 }
 0xea8   :  { %v3209_v63 = vpop.eup %3208 }
 0xea9   :  { %v3211_v60 = vpop.eup %3210  ;;  %v2483_v22 = vmul.f32 %v3209_v63, %v3207_v31 }
 0xeaa   :  { %v2482_v24 = vmul.f32 %v3211_v60, %v4583_v6  ;;  %v3213_v54 = vpop.eup %3212 }
 0xeac   :  { %v2484_v56 = vadd.f32 %v2483_v22, %v2482_v24 }
 0xeae   :  { %3214 = vtanh.f32 %v2484_v56  ;;  %v4630_v8 = vsel %vm2492_vm15, %v2484_v56, %v4583_v6 }
 0xeb8   :  { %v3215_v36 = vpop.eup %3214 }
 0xeb9   :  { %v2486_v11 = vmul.f32 %v3215_v36, %v3213_v54 }
 0xebb   :  { %v4633_v32 = vsel %vm2492_vm15, %v2486_v11, %v4586_v0 }
 0xebc   :  { %v2502_v34 = vpack.c.bf16 %v4633_v32, %v4633_v32 }
 0xebe   :  { %2536 = vmatmul.mubr.bf16.vlgmr.msra.gmra.mrb[88].mxu0 %v2502_v34  ;;  %2577 = vmatmul.mubr.bf16.vlgmr.msra.gmra.mrb[88].mxu1 %v2502_v34 }
 0xebf   :  { %2630 = vmatpush1.bf16.msra.mxu0 %v4389_v38  ;;  %2671 = vmatpush1.bf16.msra.mxu1 %v4392_v62  ;;  %v4797_v62 = vld [vmem:[#allocation56_spill] sm:$0xff] }
 0xec0   :  { %2631 = vmatprep.subr.bf16.mxu0 %v4395_v46  ;;  %2672 = vmatprep.subr.bf16.mxu1 %v4398_v52  ;;  %v4798_v52 = vld [vmem:[#allocation57_spill] sm:$0xff] }
 0xec1   :  { %2661 = vmatprep.mubr.bf16.mxu0 %v4752_v7  ;;  %2702 = vmatprep.mubr.bf16.mxu1 %v4752_v7 }
 0xec3   :  { %2632 = vmatpush1.bf16.msra.mxu0 %v4403_v9  ;;  %2673 = vmatpush1.bf16.msra.mxu1 %v4406_v50 }
 0xec4   :  { %2633 = vmatprep.subr.bf16.mxu0 %v4409_v41  ;;  %2674 = vmatprep.subr.bf16.mxu1 %v4412_v4  ;;  %v4799_v4 = vld [vmem:[#allocation58_spill] sm:$0xff] }
 0xec7   :  { %2634 = vmatpush1.bf16.msra.mxu0 %v4415_v28  ;;  %2675 = vmatpush1.bf16.msra.mxu1 %v4418_v49  ;;  %v4800_v49 = vld [vmem:[#allocation59_spill] sm:$0xff] }
 0xec8   :  { %2635 = vmatprep.subr.bf16.mxu0 %v4421_v51  ;;  %2676 = vmatprep.subr.bf16.mxu1 %v4424_v30 }
 0xecb   :  { %2636 = vmatpush1.bf16.msra.mxu0 %v4427_v53  ;;  %2677 = vmatpush1.bf16.msra.mxu1 %v4430_v58 }
 0xecc   :  { %2637 = vmatprep.subr.bf16.mxu0 %v4433_v20  ;;  %2678 = vmatprep.subr.bf16.mxu1 %v4436_v10 }
 0xecf   :  { %2638 = vmatpush1.bf16.msra.mxu0 %v4439_v12  ;;  %2679 = vmatpush1.bf16.msra.mxu1 %v4442_v15 }
 0xed0   :  { %2639 = vmatprep.subr.bf16.mxu0 %v4445_v18  ;;  %2680 = vmatprep.subr.bf16.mxu1 %v4448_v13 }
 0xed3   :  { %2640 = vmatpush1.bf16.msra.mxu0 %v4498_v40  ;;  %2681 = vmatpush1.bf16.msra.mxu1 %v4501_v59 }
 0xed4   :  { %2641 = vmatprep.subr.bf16.mxu0 %v4504_v33  ;;  %2682 = vmatprep.subr.bf16.mxu1 %v4507_v3 }
 0xed7   :  { %2642 = vmatpush1.bf16.msra.mxu0 %v4510_v45  ;;  %2683 = vmatpush1.bf16.msra.mxu1 %v4513_v55 }
 0xed8   :  { %2643 = vmatprep.subr.bf16.mxu0 %v4516_v42  ;;  %2684 = vmatprep.subr.bf16.mxu1 %v4519_v16 }
 0xedb   :  { %2644 = vmatpush1.bf16.msra.mxu0 %v4522_v43  ;;  %2685 = vmatpush1.bf16.msra.mxu1 %v4525_v1  ;;  %v2617_v43 = vpop.permute.xlu0 %2616 }
 0xedc   :  { %vm2618_vm0 = vcmp.eq.s32.totalorder %v2617_v43, 1 }
 0xf91   :  { %v2537_v7 = vpop.f32.mrb[88].mxu0  ;;  %v2578_v38 = vpop.f32.mrb[88].mxu1 }
 0xf92   :  { %v2585_v46 = vadd.f32 %v2537_v7, %v4797_v62  ;;  %v2587_v9 = vadd.f32 %v2578_v38, %v4798_v52  ;;  %v2539_v50 = vpop.f32.mrb[89].mxu0  ;;  %v2580_v41 = vpop.f32.mrb[89].mxu1 }
 0xf93   :  { %v2586_v28 = vadd.f32 %v2539_v50, %v4799_v4  ;;  %v2588_v51 = vadd.f32 %v2580_v41, %v4800_v49  ;;  %v2541_v30 = vpop.f32.mrb[90].mxu0  ;;  %v2582_v53 = vpop.f32.mrb[90].mxu1 }
 0xf94   :  { %v2898_v58 = vmul.f32 -1.442695, %v2585_v46  ;;  %v2542_v20 = vpop.f32.mrb[91].mxu0  ;;  %v2583_v10 = vpop.f32.mrb[91].mxu1 }
 0xf95   :  { %v2899_v12 = vmul.f32 -1.442695, %v2586_v28  ;;  %v2900_v15 = vmul.f32 -1.442695, %v2588_v51  ;;  %v2743_v50 = vpop.permute.xlu1 %2742 }
 0xf96   :  { %3216 = vpow2.f32 %v2898_v58  ;;  %vm2744_vm1 = vcmp.eq.s32.totalorder %v2743_v50, 1 }
 0xf97   :  { %3218 = vpow2.f32 %v2899_v12 }
 0xf98   :  { %3220 = vpow2.f32 %v2900_v15 }
 0xf99   :  { %3222 = vtanh.f32 %v2587_v9 }
 0xfa0   :  { %v3217_v18 = vpop.eup %3216 }
 0xfa1   :  { %v3219_v13 = vpop.eup %3218  ;;  %v2592_v40 = vadd.f32 1.0, %v3217_v18 }
 0xfa2   :  { %v2598_v59 = vadd.f32 1.0, %v3219_v13  ;;  %v3221_v33 = vpop.eup %3220 }
 0xfa3   :  { %3224 = vrcp.f32 %v2592_v40  ;;  %v3223_v3 = vpop.eup %3222  ;;  %v2605_v16 = vadd.f32 1.0, %v3221_v33 }
 0xfa4   :  { %3226 = vrcp.f32 %v2598_v59 }
 0xfa5   :  { %3228 = vrcp.f32 %v2605_v16 }
 0xfad   :  { %v3225_v45 = vpop.eup %3224 }
 0xfae   :  { %v3227_v55 = vpop.eup %3226  ;;  %v2609_v42 = vmul.f32 %v3225_v45, %v3223_v3 }
 0xfaf   :  { %v2608_v1 = vmul.f32 %v3227_v55, %v4630_v8  ;;  %v3229_v35 = vpop.eup %3228 }
 0xfb1   :  { %v2610_v6 = vadd.f32 %v2609_v42, %v2608_v1 }
 0xfb3   :  { %3230 = vtanh.f32 %v2610_v6  ;;  %v2620_v0 = vsel %vm2618_vm0, %v2610_v6, %v4630_v8 }
 0xfbd   :  { %v3231_v37 = vpop.eup %3230 }
 0xfbe   :  { %v2612_v39 = vmul.f32 %v3231_v37, %v3229_v35 }
 0xfc0   :  { %v2619_v29 = vsel %vm2618_vm0, %v2612_v39, %v4633_v32 }
 0xfc1   :  { %v2628_v19 = vpack.c.bf16 %v2619_v29, %v2619_v29 }
 0xfc3   :  { %2662 = vmatmul.mubr.bf16.vlgmr.msra.gmra.mrb[92].mxu0 %v2628_v19  ;;  %2703 = vmatmul.mubr.bf16.vlgmr.msra.gmra.mrb[92].mxu1 %v2628_v19 }
0x1096   :  { %v2663_v21 = vpop.f32.mrb[92].mxu0  ;;  %v2704_v61 = vpop.f32.mrb[92].mxu1 }
0x1097   :  { %v2711_v44 = vadd.f32 %v2663_v21, %v4801_v2  ;;  %v2713_v57 = vadd.f32 %v2704_v61, %v4802_v5  ;;  %v2665_v17 = vpop.f32.mrb[93].mxu0  ;;  %v2706_v48 = vpop.f32.mrb[93].mxu1 }
0x1098   :  { %v2712_v27 = vadd.f32 %v2665_v17, %v4803_v25  ;;  %v2714_v26 = vadd.f32 %v2706_v48, %v4804_v47  ;;  %v2667_v31 = vpop.f32.mrb[94].mxu0  ;;  %v2708_v63 = vpop.f32.mrb[94].mxu1 }
0x1099   :  { %v2901_v60 = vmul.f32 -1.442695, %v2711_v44  ;;  %v2668_v22 = vpop.f32.mrb[95].mxu0  ;;  %v2709_v23 = vpop.f32.mrb[95].mxu1 }
0x109a   :  { %v2902_v24 = vmul.f32 -1.442695, %v2712_v27  ;;  %v2903_v14 = vmul.f32 -1.442695, %v2714_v26 }
0x109b   :  { %3232 = vpow2.f32 %v2901_v60 }
0x109c   :  { %3234 = vpow2.f32 %v2902_v24 }
0x109d   :  { %3236 = vpow2.f32 %v2903_v14 }
0x109e   :  { %3238 = vtanh.f32 %v2713_v57 }
0x10a5   :  { %v3233_v56 = vpop.eup %3232 }
0x10a6   :  { %v3235_v8 = vpop.eup %3234  ;;  %v2718_v54 = vadd.f32 1.0, %v3233_v56 }
0x10a7   :  { %v2724_v36 = vadd.f32 1.0, %v3235_v8  ;;  %v3237_v11 = vpop.eup %3236 }
0x10a8   :  { %3240 = vrcp.f32 %v2718_v54  ;;  %v3239_v32 = vpop.eup %3238  ;;  %v2731_v62 = vadd.f32 1.0, %v3237_v11 }
0x10a9   :  { %3242 = vrcp.f32 %v2724_v36 }
0x10aa   :  { %3244 = vrcp.f32 %v2731_v62 }
0x10b2   :  { %v3241_v34 = vpop.eup %3240 }
0x10b3   :  { %v3243_v7 = vpop.eup %3242  ;;  %v2735_v38 = vmul.f32 %v3241_v34, %v3239_v32 }
0x10b4   :  { %v2734_v46 = vmul.f32 %v3243_v7, %v2620_v0  ;;  %v3245_v9 = vpop.eup %3244 }
0x10b6   :  { %v2736_v52 = vadd.f32 %v2735_v38, %v2734_v46 }
0x10b8   :  { %3246 = vtanh.f32 %v2736_v52 }
0x10c2   :  { %v3247_v41 = vpop.eup %3246 }
0x10c3   :  { %v2738_v4 = vmul.f32 %v3247_v41, %v3245_v9 }
0x10c5   :  { %v2745_v28 = vsel %vm2744_vm1, %v2738_v4, %v2619_v29 }
0x10c6   :  { %2746 = vst [vmem:[#allocation8] sm:$0xff] %v2745_v28 }
0x10c7   :  { %3367 = shalt.err (!%p3364_p6)
}
0x10c8   :  { %s3368_s14 = scalar_lea.hbm %s4697_s5, 128 }
0x10c9   :  { %p3369_p7 = scmp.ne.s32.totalorder %s4697_s5, %s3368_s14  ;;  %p3372_p8 = scmp.lt.u32.totalorder %s3368_s14, %s4697_s5 }
0x10cb   :  { %p3374_p9 = pnand %p3372_p8, %p3369_p7 }
0x10cd   :  { %3377 = shalt.err (!%p3374_p9)
}
0x10ce   :  { %2756 = dma.vmem_to_hbm [thread:$0]  %s2754_s10, 128, %s4697_s5, [#allocation5]  }
0x10cf   :  { %3382 = dma.done.wait [#allocation5], 128  }
0x10d0   :  { %3383 = vsyncadd [#allocation5], 4294967168 }
0x10d1   :  { %2760 = vsyncpa [#allocation4], 1 }
0x10d2   :  { %2761 = vsyncpa [#allocation7], 1 }
0x10d3   :  { %2762 = vsyncpa [#allocation5], 1 }

</bundles_post_ra>
